<compile_context>
chip_gen: v7x
topology: tpu7x:2x2x1
jax: 0.10.0
libtpu: 0.0.40
codegen_flags: <defaults>
</compile_context>

<pallas_src>
import functools
import math

import jax
import jax.numpy as jnp
from jax import lax
from jax.experimental import pallas as pl
from jax.experimental.pallas import tpu as pltpu


# ----------------------------- Pallas kernel --------------------------------
def _fused_transformer_kernel(x_ref, kmask_ref,
                              ln1_g_ref, ln1_b_ref,
                              wqkv_ref, wo_ref, bo_ref,
                              ln2_g_ref, ln2_b_ref,
                              wff1_ref, bff1_ref, wff2_ref, bff2_ref,
                              o_ref, *, depth, heads, dim_head, batch, n):
    """All `depth` Mask_Transformer layers for the whole batch, fused.

    Per layer (matches the PyTorch reference exactly — residual on the *normed* x):
        x  = LayerNorm1(x)
        x  = MaskedAttention(x, mask) + x
        x  = LayerNorm2(x)
        x  = FeedForward(x) + x
    """
    eps = 1e-5
    inner = heads * dim_head
    scale = dim_head ** (-0.5)
    inv_sqrt2 = 1.0 / math.sqrt(2.0)

    x = x_ref[...]                                          # (B*N, D)

    # Key-pad mask (B, N), 1.0 == masked key.  It is query-independent, so we ship
    # only the row and broadcast once here (replaces the old (B, N, N) HBM input).
    kmask3 = jnp.broadcast_to(kmask_ref[...][:, None, :] > 0.5, (batch, n, n))
    neg_inf = jnp.float32(-1e9)

    def layernorm(v, g, b):
        mu = jnp.mean(v, axis=-1, keepdims=True)
        var = jnp.mean((v - mu) ** 2, axis=-1, keepdims=True)
        return (v - mu) * lax.rsqrt(var + eps) * g + b

    for l in range(depth):                                  # static unroll; weights stay in VMEM
        # ---- p_1 (LayerNorm) ----
        xn = layernorm(x, ln1_g_ref[l], ln1_b_ref[l])       # (B*N, D)

        # ---- masked multi-head attention ----
        qkv = jnp.dot(xn, wqkv_ref[l], preferred_element_type=jnp.float32)   # (B*N, 3*inner)
        q = qkv[:, 0 * inner:1 * inner].reshape(batch, n, inner)
        k = qkv[:, 1 * inner:2 * inner].reshape(batch, n, inner)
        v = qkv[:, 2 * inner:3 * inner].reshape(batch, n, inner)

        head_outs = []
        for h in range(heads):                              # short static loop, batched over B
            lo, hi = h * dim_head, (h + 1) * dim_head
            qh, kh, vh = q[:, :, lo:hi], k[:, :, lo:hi], v[:, :, lo:hi]      # (B, N, dh)
            dots = jnp.einsum('bid,bjd->bij', qh, kh,
                              preferred_element_type=jnp.float32) * scale     # (B, N, N)
            dots = jnp.where(kmask3, neg_inf, dots)                           # masked_fill_
            dots = dots - jnp.max(dots, axis=-1, keepdims=True)
            e = jnp.exp(dots)
            attn = e * pl.reciprocal(jnp.sum(e, axis=-1, keepdims=True), approx=True)
            head_outs.append(jnp.einsum('bij,bjd->bid', attn, vh,
                                        preferred_element_type=jnp.float32))  # (B, N, dh)

        # single concat + ONE output projection (instead of per-head accumulated dots)
        out = jnp.concatenate(head_outs, axis=-1).reshape(batch * n, inner)   # (B*N, inner)
        x1 = jnp.dot(out, wo_ref[l], preferred_element_type=jnp.float32) \
            + bo_ref[l] + xn                                                  # to_out bias + residual

        # ---- p_2 (LayerNorm) ----
        xn2 = layernorm(x1, ln2_g_ref[l], ln2_b_ref[l])

        # ---- FeedForward: Linear -> GELU(exact) -> Linear, residual ----
        h1 = jnp.dot(xn2, wff1_ref[l], preferred_element_type=jnp.float32) + bff1_ref[l]
        h1 = 0.5 * h1 * (1.0 + lax.erf(h1 * inv_sqrt2))
        h2 = jnp.dot(h1, wff2_ref[l], preferred_element_type=jnp.float32) + bff2_ref[l]
        x = h2 + xn2

    o_ref[...] = x


def _cost_estimate(b, n, d, depth, heads, dim_head, mlp_dim):
    inner = heads * dim_head
    rows = b * n
    per_layer_flops = (2 * rows * d * 3 * inner                       # qkv proj
                       + heads * (2 * 2 * b * n * n * dim_head)       # scores + PV
                       + 2 * rows * inner * d                         # out proj
                       + 2 * rows * d * mlp_dim + 2 * rows * mlp_dim * d)
    flops = depth * per_layer_flops
    transcendentals = depth * (heads * b * n * n + rows * mlp_dim + 2 * rows)
    weight_bytes = 4 * depth * (d * 3 * inner + inner * d + d * mlp_dim
                                + mlp_dim * d + 6 * d + mlp_dim)
    act_bytes = 4 * (2 * rows * d + b * n)
    return pl.CostEstimate(flops=flops, transcendentals=transcendentals,
                           bytes_accessed=weight_bytes + act_bytes)


def mask_transformer_fused(x, key_mask, stacked, *, heads, dim_head):
    """x: (B, N, D) activations, key_mask: (B, N) float (1.0 == masked key)."""
    b, n, d = x.shape
    depth = stacked["wqkv"].shape[0]
    mlp_dim = stacked["wff1"].shape[-1]
    kernel = functools.partial(_fused_transformer_kernel, depth=depth, heads=heads,
                               dim_head=dim_head, batch=b, n=n)
    # Single invocation, grid-free: every operand is a whole-array VMEM block, so each
    # array is DMA'd HBM->VMEM exactly once and there is no per-grid-step / per-layer
    # launch overhead.  (On v7x a 2-wide "parallel" batch axis could engage the 2nd
    # TensorCore; kept grid-free since v5e/v6e have one TC and the kernel is tiny.)
    out_flat = pl.pallas_call(
        kernel,
        out_shape=jax.ShapeDtypeStruct((b * n, d), jnp.float32),
        cost_estimate=_cost_estimate(b, n, d, depth, heads, dim_head, mlp_dim),
        compiler_params=pltpu.CompilerParams(vmem_limit_bytes=32 * 1024 * 1024),
    )(x.reshape(b * n, d).astype(jnp.float32), key_mask.astype(jnp.float32),
      stacked["ln1_g"], stacked["ln1_b"],
      stacked["wqkv"], stacked["wo"], stacked["bo"],
      stacked["ln2_g"], stacked["ln2_b"],
      stacked["wff1"], stacked["bff1"], stacked["wff2"], stacked["bff2"])
    return out_flat.reshape(b, n, d)


# ----------------------------- glue / params --------------------------------
def sinusoidal_pos_embedding(n, dim):
    position = jnp.arange(n, dtype=jnp.float32)[:, None]
    div_term = jnp.exp(jnp.arange(0, dim, 2, dtype=jnp.float32) * (-math.log(10000.0) / dim))
    pe = jnp.zeros((n, dim), jnp.float32)
    pe = pe.at[:, 0::2].set(jnp.sin(position * div_term))
    pe = pe.at[:, 1::2].set(jnp.cos(position * div_term))
    return pe


def init_params(key, dict_size, words, dim, depth, heads, dim_head, mlp_dim):
    inner = heads * dim_head
    k_emb, k_cls, k_layers = jax.random.split(key, 3)
    lkeys = jax.random.split(k_layers, depth * 4).reshape(depth, 4, 2)
    stacked = {
        "ln1_g": jnp.ones((depth, 1, dim), jnp.float32),
        "ln1_b": jnp.zeros((depth, 1, dim), jnp.float32),
        "wqkv": jnp.stack([(1.0 / math.sqrt(dim)) *
                           jax.random.normal(lkeys[l, 0], (dim, 3 * inner), jnp.float32)
                           for l in range(depth)]),
        "wo": jnp.stack([(1.0 / math.sqrt(inner)) *
                         jax.random.normal(lkeys[l, 1], (inner, dim), jnp.float32)
                         for l in range(depth)]),
        "bo": jnp.zeros((depth, 1, dim), jnp.float32),
        "ln2_g": jnp.ones((depth, 1, dim), jnp.float32),
        "ln2_b": jnp.zeros((depth, 1, dim), jnp.float32),
        "wff1": jnp.stack([(1.0 / math.sqrt(dim)) *
                           jax.random.normal(lkeys[l, 2], (dim, mlp_dim), jnp.float32)
                           for l in range(depth)]),
        "bff1": jnp.zeros((depth, 1, mlp_dim), jnp.float32),
        "wff2": jnp.stack([(1.0 / math.sqrt(mlp_dim)) *
                           jax.random.normal(lkeys[l, 3], (mlp_dim, dim), jnp.float32)
                           for l in range(depth)]),
        "bff2": jnp.zeros((depth, 1, dim), jnp.float32),
    }
    return {
        "embedding": 0.02 * jax.random.normal(k_emb, (dict_size, dim), jnp.float32),
        "cls_token": 0.02 * jax.random.normal(k_cls, (1, 1, dim), jnp.float32),
        "pos_embedding": sinusoidal_pos_embedding(words + 1, dim),
        "stacked": stacked,
    }


def get_rpm_key_pad_mask(seq_k, mask_value):
    # key-only row of the original (b, len_q, len_k) mask:
    # mask[b, j] = (seq_k[b, j] == mv) | (seq_k[b, (j+1) % n] == mv)
    pad = (seq_k == mask_value)
    return (pad | jnp.roll(pad, -1, axis=1)).astype(jnp.float32)    # (b, n)


def txt_mask_transformer_forward(seq, params, *, heads, dim_head, is_pgm=False):
    # seq: [b, words] int32 token ids
    x = params["embedding"][seq]                                    # (b, words, dim)
    b, n_words, d = x.shape
    seq_ext = jnp.concatenate([jnp.ones((b, 1), seq.dtype), seq], axis=1)
    mask_value = 13 if is_pgm else 0
    key_mask = get_rpm_key_pad_mask(seq_ext, mask_value)            # (b, words+1)

    cls = jnp.broadcast_to(params["cls_token"], (b, 1, d))
    x = jnp.concatenate([cls, x], axis=1)                           # (b, words+1, dim)
    x = x + params["pos_embedding"][None, :, :]
    # dropout: eval / p=0 -> identity

    return mask_transformer_fused(x, key_mask, params["stacked"],
                                  heads=heads, dim_head=dim_head)


# --------------------------------- main --------------------------------------
if __name__ == "__main__":
    dict_size, words = 20, 8
    dim, depth, heads, dim_head, mlp_dim = 32, 2, 4, 8, 64
    batch = 2

    key = jax.random.PRNGKey(0)
    k_param, k_seq = jax.random.split(key)
    params = init_params(k_param, dict_size, words, dim, depth, heads, dim_head, mlp_dim)
    seq = jax.random.randint(k_seq, (batch, words), 0, dict_size, dtype=jnp.int32)

    out = txt_mask_transformer_forward(seq, params, heads=heads, dim_head=dim_head, is_pgm=False)
    out = jax.block_until_ready(out)
    assert out.shape == (batch, words + 1, dim)
    print("KERNEL_OK")
</pallas_src>

<mosaic_0001>
module attributes {stable_mosaic.version = 11 : i64} {
  func.func @_fused_transformer_kernel(%arg0: memref<18x32xf32, #tpu.memory_space<vmem>>, %arg1: memref<2x9xf32, #tpu.memory_space<vmem>>, %arg2: memref<2x1x32xf32, #tpu.memory_space<vmem>>, %arg3: memref<2x1x32xf32, #tpu.memory_space<vmem>>, %arg4: memref<2x32x96xf32, #tpu.memory_space<vmem>>, %arg5: memref<2x32x32xf32, #tpu.memory_space<vmem>>, %arg6: memref<2x1x32xf32, #tpu.memory_space<vmem>>, %arg7: memref<2x1x32xf32, #tpu.memory_space<vmem>>, %arg8: memref<2x1x32xf32, #tpu.memory_space<vmem>>, %arg9: memref<2x32x64xf32, #tpu.memory_space<vmem>>, %arg10: memref<2x1x64xf32, #tpu.memory_space<vmem>>, %arg11: memref<2x64x32xf32, #tpu.memory_space<vmem>>, %arg12: memref<2x1x32xf32, #tpu.memory_space<vmem>>, %arg13: memref<18x32xf32, #tpu.memory_space<vmem>>) attributes {dimension_semantics = [], scalar_prefetch = 0 : i64, scratch_operands = 0 : i64, tpu.core_type = #tpu.core_type<tc>} {
    %c0 = arith.constant 0 : index
    %c0_0 = arith.constant 0 : index
    %0 = vector.load %arg0[%c0, %c0_0] : memref<18x32xf32, #tpu.memory_space<vmem>>, vector<18x32xf32>
    %c0_1 = arith.constant 0 : index
    %c0_2 = arith.constant 0 : index
    %1 = vector.load %arg1[%c0_1, %c0_2] : memref<2x9xf32, #tpu.memory_space<vmem>>, vector<2x9xf32>
    %2 = vector.shape_cast %1 : vector<2x9xf32> to vector<2x1x9xf32>
    %cst = arith.constant 5.000000e-01 : f32
    %3 = vector.broadcast %cst : f32 to vector<2x1x9xf32>
    %4 = arith.cmpf ogt, %2, %3 : vector<2x1x9xf32>
    %5 = vector.shape_cast %4 : vector<2x1x9xi1> to vector<2x1x9xi1>
    %6 = vector.broadcast %5 : vector<2x1x9xi1> to vector<2x9x9xi1>
    %c0_3 = arith.constant 0 : index
    %c0_4 = arith.constant 0 : index
    %c0_5 = arith.constant 0 : index
    %7 = vector.load %arg2[%c0_3, %c0_4, %c0_5] : memref<2x1x32xf32, #tpu.memory_space<vmem>>, vector<1x1x32xf32>
    %8 = vector.shape_cast %7 : vector<1x1x32xf32> to vector<1x32xf32>
    %c0_6 = arith.constant 0 : index
    %c0_7 = arith.constant 0 : index
    %c0_8 = arith.constant 0 : index
    %9 = vector.load %arg3[%c0_6, %c0_7, %c0_8] : memref<2x1x32xf32, #tpu.memory_space<vmem>>, vector<1x1x32xf32>
    %10 = vector.shape_cast %9 : vector<1x1x32xf32> to vector<1x32xf32>
    %cst_9 = arith.constant dense<0.000000e+00> : vector<18xf32>
    %11 = vector.multi_reduction <add>, %0, %cst_9 [1] : vector<18x32xf32> to vector<18xf32>
    %12 = vector.shape_cast %11 : vector<18xf32> to vector<18x1xf32>
    %cst_10 = arith.constant 3.200000e+01 : f32
    %13 = vector.broadcast %cst_10 : f32 to vector<18x1xf32>
    %14 = arith.divf %12, %13 : vector<18x1xf32>
    %15 = vector.broadcast %14 : vector<18x1xf32> to vector<18x32xf32>
    %16 = arith.subf %0, %15 : vector<18x32xf32>
    %17 = arith.mulf %16, %16 : vector<18x32xf32>
    %cst_11 = arith.constant dense<0.000000e+00> : vector<18xf32>
    %18 = vector.multi_reduction <add>, %17, %cst_11 [1] : vector<18x32xf32> to vector<18xf32>
    %19 = vector.shape_cast %18 : vector<18xf32> to vector<18x1xf32>
    %cst_12 = arith.constant 3.200000e+01 : f32
    %20 = vector.broadcast %cst_12 : f32 to vector<18x1xf32>
    %21 = arith.divf %19, %20 : vector<18x1xf32>
    %22 = vector.broadcast %14 : vector<18x1xf32> to vector<18x32xf32>
    %23 = arith.subf %0, %22 : vector<18x32xf32>
    %cst_13 = arith.constant 9.99999974E-6 : f32
    %24 = vector.broadcast %cst_13 : f32 to vector<18x1xf32>
    %25 = arith.addf %21, %24 : vector<18x1xf32>
    %26 = math.rsqrt %25 : vector<18x1xf32>
    %27 = vector.broadcast %26 : vector<18x1xf32> to vector<18x32xf32>
    %28 = arith.mulf %23, %27 : vector<18x32xf32>
    %29 = vector.broadcast %8 : vector<1x32xf32> to vector<18x32xf32>
    %30 = arith.mulf %28, %29 : vector<18x32xf32>
    %31 = vector.broadcast %10 : vector<1x32xf32> to vector<18x32xf32>
    %32 = arith.addf %30, %31 : vector<18x32xf32>
    %c0_14 = arith.constant 0 : index
    %c0_15 = arith.constant 0 : index
    %c0_16 = arith.constant 0 : index
    %33 = vector.load %arg4[%c0_14, %c0_15, %c0_16] : memref<2x32x96xf32, #tpu.memory_space<vmem>>, vector<1x32x96xf32>
    %34 = vector.shape_cast %33 : vector<1x32x96xf32> to vector<32x96xf32>
    %cst_17 = arith.constant dense<0.000000e+00> : vector<18x96xf32>
    %35 = tpu.matmul %32, %34, %cst_17 {dimension_numbers = #tpu.dot_dimension_numbers<[1], [0], [0], [1], [0, 0, 1, 1], [], []>} : vector<18x32xf32>, vector<32x96xf32>, vector<18x96xf32> -> vector<18x96xf32>
    %36 = vector.extract_strided_slice %35 {offsets = [0, 0], sizes = [18, 32], strides = [1, 1]} : vector<18x96xf32> to vector<18x32xf32>
    %37 = vector.shape_cast %36 : vector<18x32xf32> to vector<2x9x32xf32>
    %38 = vector.extract_strided_slice %35 {offsets = [0, 32], sizes = [18, 32], strides = [1, 1]} : vector<18x96xf32> to vector<18x32xf32>
    %39 = vector.shape_cast %38 : vector<18x32xf32> to vector<2x9x32xf32>
    %40 = vector.extract_strided_slice %35 {offsets = [0, 64], sizes = [18, 32], strides = [1, 1]} : vector<18x96xf32> to vector<18x32xf32>
    %41 = vector.shape_cast %40 : vector<18x32xf32> to vector<2x9x32xf32>
    %42 = vector.extract_strided_slice %37 {offsets = [0, 0, 0], sizes = [2, 9, 8], strides = [1, 1, 1]} : vector<2x9x32xf32> to vector<2x9x8xf32>
    %43 = vector.extract_strided_slice %39 {offsets = [0, 0, 0], sizes = [2, 9, 8], strides = [1, 1, 1]} : vector<2x9x32xf32> to vector<2x9x8xf32>
    %44 = vector.extract_strided_slice %41 {offsets = [0, 0, 0], sizes = [2, 9, 8], strides = [1, 1, 1]} : vector<2x9x32xf32> to vector<2x9x8xf32>
    "tpu.trace_start"() <{level = 10 : i32, message = "bid,bjd->bij"}> : () -> ()
    %cst_18 = arith.constant dense<0.000000e+00> : vector<2x9x9xf32>
    %45 = tpu.matmul %42, %43, %cst_18 {dimension_numbers = #tpu.dot_dimension_numbers<[2], [2], [1], [1], [0, 0, 0, 1, 1, 1], [0], [0]>} : vector<2x9x8xf32>, vector<2x9x8xf32>, vector<2x9x9xf32> -> vector<2x9x9xf32>
    "tpu.trace_stop"() : () -> ()
    %cst_19 = arith.constant 0.353553385 : f32
    %46 = vector.broadcast %cst_19 : f32 to vector<2x9x9xf32>
    %47 = arith.mulf %45, %46 : vector<2x9x9xf32>
    %cst_20 = arith.constant -1.000000e+09 : f32
    %48 = vector.broadcast %cst_20 : f32 to vector<2x9x9xf32>
    %49 = arith.select %6, %48, %47 : vector<2x9x9xi1>, vector<2x9x9xf32>
    %cst_21 = arith.constant dense<0xFF800000> : vector<2x9xf32>
    %50 = vector.multi_reduction <maximumf>, %49, %cst_21 [2] : vector<2x9x9xf32> to vector<2x9xf32>
    %51 = vector.shape_cast %50 : vector<2x9xf32> to vector<2x9x1xf32>
    %52 = vector.broadcast %51 : vector<2x9x1xf32> to vector<2x9x9xf32>
    %53 = arith.subf %49, %52 : vector<2x9x9xf32>
    %54 = math.exp %53 : vector<2x9x9xf32>
    %cst_22 = arith.constant dense<0.000000e+00> : vector<2x9xf32>
    %55 = vector.multi_reduction <add>, %54, %cst_22 [2] : vector<2x9x9xf32> to vector<2x9xf32>
    %56 = vector.shape_cast %55 : vector<2x9xf32> to vector<2x9x1xf32>
    %57 = tpu.reciprocal %56 {approx = true} : vector<2x9x1xf32> -> vector<2x9x1xf32>
    %58 = vector.broadcast %57 : vector<2x9x1xf32> to vector<2x9x9xf32>
    %59 = arith.mulf %54, %58 : vector<2x9x9xf32>
    "tpu.trace_start"() <{level = 10 : i32, message = "bij,bjd->bid"}> : () -> ()
    %cst_23 = arith.constant dense<0.000000e+00> : vector<2x9x8xf32>
    %60 = tpu.matmul %59, %44, %cst_23 {dimension_numbers = #tpu.dot_dimension_numbers<[2], [1], [1], [2], [0, 0, 0, 1, 1, 2], [0], [0]>} : vector<2x9x9xf32>, vector<2x9x8xf32>, vector<2x9x8xf32> -> vector<2x9x8xf32>
    "tpu.trace_stop"() : () -> ()
    %61 = vector.extract_strided_slice %37 {offsets = [0, 0, 8], sizes = [2, 9, 8], strides = [1, 1, 1]} : vector<2x9x32xf32> to vector<2x9x8xf32>
    %62 = vector.extract_strided_slice %39 {offsets = [0, 0, 8], sizes = [2, 9, 8], strides = [1, 1, 1]} : vector<2x9x32xf32> to vector<2x9x8xf32>
    %63 = vector.extract_strided_slice %41 {offsets = [0, 0, 8], sizes = [2, 9, 8], strides = [1, 1, 1]} : vector<2x9x32xf32> to vector<2x9x8xf32>
    "tpu.trace_start"() <{level = 10 : i32, message = "bid,bjd->bij"}> : () -> ()
    %cst_24 = arith.constant dense<0.000000e+00> : vector<2x9x9xf32>
    %64 = tpu.matmul %61, %62, %cst_24 {dimension_numbers = #tpu.dot_dimension_numbers<[2], [2], [1], [1], [0, 0, 0, 1, 1, 1], [0], [0]>} : vector<2x9x8xf32>, vector<2x9x8xf32>, vector<2x9x9xf32> -> vector<2x9x9xf32>
    "tpu.trace_stop"() : () -> ()
    %cst_25 = arith.constant 0.353553385 : f32
    %65 = vector.broadcast %cst_25 : f32 to vector<2x9x9xf32>
    %66 = arith.mulf %64, %65 : vector<2x9x9xf32>
    %cst_26 = arith.constant -1.000000e+09 : f32
    %67 = vector.broadcast %cst_26 : f32 to vector<2x9x9xf32>
    %68 = arith.select %6, %67, %66 : vector<2x9x9xi1>, vector<2x9x9xf32>
    %cst_27 = arith.constant dense<0xFF800000> : vector<2x9xf32>
    %69 = vector.multi_reduction <maximumf>, %68, %cst_27 [2] : vector<2x9x9xf32> to vector<2x9xf32>
    %70 = vector.shape_cast %69 : vector<2x9xf32> to vector<2x9x1xf32>
    %71 = vector.broadcast %70 : vector<2x9x1xf32> to vector<2x9x9xf32>
    %72 = arith.subf %68, %71 : vector<2x9x9xf32>
    %73 = math.exp %72 : vector<2x9x9xf32>
    %cst_28 = arith.constant dense<0.000000e+00> : vector<2x9xf32>
    %74 = vector.multi_reduction <add>, %73, %cst_28 [2] : vector<2x9x9xf32> to vector<2x9xf32>
    %75 = vector.shape_cast %74 : vector<2x9xf32> to vector<2x9x1xf32>
    %76 = tpu.reciprocal %75 {approx = true} : vector<2x9x1xf32> -> vector<2x9x1xf32>
    %77 = vector.broadcast %76 : vector<2x9x1xf32> to vector<2x9x9xf32>
    %78 = arith.mulf %73, %77 : vector<2x9x9xf32>
    "tpu.trace_start"() <{level = 10 : i32, message = "bij,bjd->bid"}> : () -> ()
    %cst_29 = arith.constant dense<0.000000e+00> : vector<2x9x8xf32>
    %79 = tpu.matmul %78, %63, %cst_29 {dimension_numbers = #tpu.dot_dimension_numbers<[2], [1], [1], [2], [0, 0, 0, 1, 1, 2], [0], [0]>} : vector<2x9x9xf32>, vector<2x9x8xf32>, vector<2x9x8xf32> -> vector<2x9x8xf32>
    "tpu.trace_stop"() : () -> ()
    %80 = vector.extract_strided_slice %37 {offsets = [0, 0, 16], sizes = [2, 9, 8], strides = [1, 1, 1]} : vector<2x9x32xf32> to vector<2x9x8xf32>
    %81 = vector.extract_strided_slice %39 {offsets = [0, 0, 16], sizes = [2, 9, 8], strides = [1, 1, 1]} : vector<2x9x32xf32> to vector<2x9x8xf32>
    %82 = vector.extract_strided_slice %41 {offsets = [0, 0, 16], sizes = [2, 9, 8], strides = [1, 1, 1]} : vector<2x9x32xf32> to vector<2x9x8xf32>
    "tpu.trace_start"() <{level = 10 : i32, message = "bid,bjd->bij"}> : () -> ()
    %cst_30 = arith.constant dense<0.000000e+00> : vector<2x9x9xf32>
    %83 = tpu.matmul %80, %81, %cst_30 {dimension_numbers = #tpu.dot_dimension_numbers<[2], [2], [1], [1], [0, 0, 0, 1, 1, 1], [0], [0]>} : vector<2x9x8xf32>, vector<2x9x8xf32>, vector<2x9x9xf32> -> vector<2x9x9xf32>
    "tpu.trace_stop"() : () -> ()
    %cst_31 = arith.constant 0.353553385 : f32
    %84 = vector.broadcast %cst_31 : f32 to vector<2x9x9xf32>
    %85 = arith.mulf %83, %84 : vector<2x9x9xf32>
    %cst_32 = arith.constant -1.000000e+09 : f32
    %86 = vector.broadcast %cst_32 : f32 to vector<2x9x9xf32>
    %87 = arith.select %6, %86, %85 : vector<2x9x9xi1>, vector<2x9x9xf32>
    %cst_33 = arith.constant dense<0xFF800000> : vector<2x9xf32>
    %88 = vector.multi_reduction <maximumf>, %87, %cst_33 [2] : vector<2x9x9xf32> to vector<2x9xf32>
    %89 = vector.shape_cast %88 : vector<2x9xf32> to vector<2x9x1xf32>
    %90 = vector.broadcast %89 : vector<2x9x1xf32> to vector<2x9x9xf32>
    %91 = arith.subf %87, %90 : vector<2x9x9xf32>
    %92 = math.exp %91 : vector<2x9x9xf32>
    %cst_34 = arith.constant dense<0.000000e+00> : vector<2x9xf32>
    %93 = vector.multi_reduction <add>, %92, %cst_34 [2] : vector<2x9x9xf32> to vector<2x9xf32>
    %94 = vector.shape_cast %93 : vector<2x9xf32> to vector<2x9x1xf32>
    %95 = tpu.reciprocal %94 {approx = true} : vector<2x9x1xf32> -> vector<2x9x1xf32>
    %96 = vector.broadcast %95 : vector<2x9x1xf32> to vector<2x9x9xf32>
    %97 = arith.mulf %92, %96 : vector<2x9x9xf32>
    "tpu.trace_start"() <{level = 10 : i32, message = "bij,bjd->bid"}> : () -> ()
    %cst_35 = arith.constant dense<0.000000e+00> : vector<2x9x8xf32>
    %98 = tpu.matmul %97, %82, %cst_35 {dimension_numbers = #tpu.dot_dimension_numbers<[2], [1], [1], [2], [0, 0, 0, 1, 1, 2], [0], [0]>} : vector<2x9x9xf32>, vector<2x9x8xf32>, vector<2x9x8xf32> -> vector<2x9x8xf32>
    "tpu.trace_stop"() : () -> ()
    %99 = vector.extract_strided_slice %37 {offsets = [0, 0, 24], sizes = [2, 9, 8], strides = [1, 1, 1]} : vector<2x9x32xf32> to vector<2x9x8xf32>
    %100 = vector.extract_strided_slice %39 {offsets = [0, 0, 24], sizes = [2, 9, 8], strides = [1, 1, 1]} : vector<2x9x32xf32> to vector<2x9x8xf32>
    %101 = vector.extract_strided_slice %41 {offsets = [0, 0, 24], sizes = [2, 9, 8], strides = [1, 1, 1]} : vector<2x9x32xf32> to vector<2x9x8xf32>
    "tpu.trace_start"() <{level = 10 : i32, message = "bid,bjd->bij"}> : () -> ()
    %cst_36 = arith.constant dense<0.000000e+00> : vector<2x9x9xf32>
    %102 = tpu.matmul %99, %100, %cst_36 {dimension_numbers = #tpu.dot_dimension_numbers<[2], [2], [1], [1], [0, 0, 0, 1, 1, 1], [0], [0]>} : vector<2x9x8xf32>, vector<2x9x8xf32>, vector<2x9x9xf32> -> vector<2x9x9xf32>
    "tpu.trace_stop"() : () -> ()
    %cst_37 = arith.constant 0.353553385 : f32
    %103 = vector.broadcast %cst_37 : f32 to vector<2x9x9xf32>
    %104 = arith.mulf %102, %103 : vector<2x9x9xf32>
    %cst_38 = arith.constant -1.000000e+09 : f32
    %105 = vector.broadcast %cst_38 : f32 to vector<2x9x9xf32>
    %106 = arith.select %6, %105, %104 : vector<2x9x9xi1>, vector<2x9x9xf32>
    %cst_39 = arith.constant dense<0xFF800000> : vector<2x9xf32>
    %107 = vector.multi_reduction <maximumf>, %106, %cst_39 [2] : vector<2x9x9xf32> to vector<2x9xf32>
    %108 = vector.shape_cast %107 : vector<2x9xf32> to vector<2x9x1xf32>
    %109 = vector.broadcast %108 : vector<2x9x1xf32> to vector<2x9x9xf32>
    %110 = arith.subf %106, %109 : vector<2x9x9xf32>
    %111 = math.exp %110 : vector<2x9x9xf32>
    %cst_40 = arith.constant dense<0.000000e+00> : vector<2x9xf32>
    %112 = vector.multi_reduction <add>, %111, %cst_40 [2] : vector<2x9x9xf32> to vector<2x9xf32>
    %113 = vector.shape_cast %112 : vector<2x9xf32> to vector<2x9x1xf32>
    %114 = tpu.reciprocal %113 {approx = true} : vector<2x9x1xf32> -> vector<2x9x1xf32>
    %115 = vector.broadcast %114 : vector<2x9x1xf32> to vector<2x9x9xf32>
    %116 = arith.mulf %111, %115 : vector<2x9x9xf32>
    "tpu.trace_start"() <{level = 10 : i32, message = "bij,bjd->bid"}> : () -> ()
    %cst_41 = arith.constant dense<0.000000e+00> : vector<2x9x8xf32>
    %117 = tpu.matmul %116, %101, %cst_41 {dimension_numbers = #tpu.dot_dimension_numbers<[2], [1], [1], [2], [0, 0, 0, 1, 1, 2], [0], [0]>} : vector<2x9x9xf32>, vector<2x9x8xf32>, vector<2x9x8xf32> -> vector<2x9x8xf32>
    "tpu.trace_stop"() : () -> ()
    %118 = tpu.concatenate %60, %79, %98, %117 in 2 : vector<2x9x8xf32>, vector<2x9x8xf32>, vector<2x9x8xf32>, vector<2x9x8xf32> -> vector<2x9x32xf32>
    %119 = vector.shape_cast %118 : vector<2x9x32xf32> to vector<18x32xf32>
    %c0_42 = arith.constant 0 : index
    %c0_43 = arith.constant 0 : index
    %c0_44 = arith.constant 0 : index
    %120 = vector.load %arg5[%c0_42, %c0_43, %c0_44] : memref<2x32x32xf32, #tpu.memory_space<vmem>>, vector<1x32x32xf32>
    %121 = vector.shape_cast %120 : vector<1x32x32xf32> to vector<32x32xf32>
    %cst_45 = arith.constant dense<0.000000e+00> : vector<18x32xf32>
    %122 = tpu.matmul %119, %121, %cst_45 {dimension_numbers = #tpu.dot_dimension_numbers<[1], [0], [0], [1], [0, 0, 1, 1], [], []>} : vector<18x32xf32>, vector<32x32xf32>, vector<18x32xf32> -> vector<18x32xf32>
    %c0_46 = arith.constant 0 : index
    %c0_47 = arith.constant 0 : index
    %c0_48 = arith.constant 0 : index
    %123 = vector.load %arg6[%c0_46, %c0_47, %c0_48] : memref<2x1x32xf32, #tpu.memory_space<vmem>>, vector<1x1x32xf32>
    %124 = vector.shape_cast %123 : vector<1x1x32xf32> to vector<1x32xf32>
    %125 = vector.broadcast %124 : vector<1x32xf32> to vector<18x32xf32>
    %126 = arith.addf %122, %125 : vector<18x32xf32>
    %127 = arith.addf %126, %32 : vector<18x32xf32>
    %c0_49 = arith.constant 0 : index
    %c0_50 = arith.constant 0 : index
    %c0_51 = arith.constant 0 : index
    %128 = vector.load %arg7[%c0_49, %c0_50, %c0_51] : memref<2x1x32xf32, #tpu.memory_space<vmem>>, vector<1x1x32xf32>
    %129 = vector.shape_cast %128 : vector<1x1x32xf32> to vector<1x32xf32>
    %c0_52 = arith.constant 0 : index
    %c0_53 = arith.constant 0 : index
    %c0_54 = arith.constant 0 : index
    %130 = vector.load %arg8[%c0_52, %c0_53, %c0_54] : memref<2x1x32xf32, #tpu.memory_space<vmem>>, vector<1x1x32xf32>
    %131 = vector.shape_cast %130 : vector<1x1x32xf32> to vector<1x32xf32>
    %cst_55 = arith.constant dense<0.000000e+00> : vector<18xf32>
    %132 = vector.multi_reduction <add>, %127, %cst_55 [1] : vector<18x32xf32> to vector<18xf32>
    %133 = vector.shape_cast %132 : vector<18xf32> to vector<18x1xf32>
    %cst_56 = arith.constant 3.200000e+01 : f32
    %134 = vector.broadcast %cst_56 : f32 to vector<18x1xf32>
    %135 = arith.divf %133, %134 : vector<18x1xf32>
    %136 = vector.broadcast %135 : vector<18x1xf32> to vector<18x32xf32>
    %137 = arith.subf %127, %136 : vector<18x32xf32>
    %138 = arith.mulf %137, %137 : vector<18x32xf32>
    %cst_57 = arith.constant dense<0.000000e+00> : vector<18xf32>
    %139 = vector.multi_reduction <add>, %138, %cst_57 [1] : vector<18x32xf32> to vector<18xf32>
    %140 = vector.shape_cast %139 : vector<18xf32> to vector<18x1xf32>
    %cst_58 = arith.constant 3.200000e+01 : f32
    %141 = vector.broadcast %cst_58 : f32 to vector<18x1xf32>
    %142 = arith.divf %140, %141 : vector<18x1xf32>
    %143 = vector.broadcast %135 : vector<18x1xf32> to vector<18x32xf32>
    %144 = arith.subf %127, %143 : vector<18x32xf32>
    %cst_59 = arith.constant 9.99999974E-6 : f32
    %145 = vector.broadcast %cst_59 : f32 to vector<18x1xf32>
    %146 = arith.addf %142, %145 : vector<18x1xf32>
    %147 = math.rsqrt %146 : vector<18x1xf32>
    %148 = vector.broadcast %147 : vector<18x1xf32> to vector<18x32xf32>
    %149 = arith.mulf %144, %148 : vector<18x32xf32>
    %150 = vector.broadcast %129 : vector<1x32xf32> to vector<18x32xf32>
    %151 = arith.mulf %149, %150 : vector<18x32xf32>
    %152 = vector.broadcast %131 : vector<1x32xf32> to vector<18x32xf32>
    %153 = arith.addf %151, %152 : vector<18x32xf32>
    %c0_60 = arith.constant 0 : index
    %c0_61 = arith.constant 0 : index
    %c0_62 = arith.constant 0 : index
    %154 = vector.load %arg9[%c0_60, %c0_61, %c0_62] : memref<2x32x64xf32, #tpu.memory_space<vmem>>, vector<1x32x64xf32>
    %155 = vector.shape_cast %154 : vector<1x32x64xf32> to vector<32x64xf32>
    %cst_63 = arith.constant dense<0.000000e+00> : vector<18x64xf32>
    %156 = tpu.matmul %153, %155, %cst_63 {dimension_numbers = #tpu.dot_dimension_numbers<[1], [0], [0], [1], [0, 0, 1, 1], [], []>} : vector<18x32xf32>, vector<32x64xf32>, vector<18x64xf32> -> vector<18x64xf32>
    %c0_64 = arith.constant 0 : index
    %c0_65 = arith.constant 0 : index
    %c0_66 = arith.constant 0 : index
    %157 = vector.load %arg10[%c0_64, %c0_65, %c0_66] : memref<2x1x64xf32, #tpu.memory_space<vmem>>, vector<1x1x64xf32>
    %158 = vector.shape_cast %157 : vector<1x1x64xf32> to vector<1x64xf32>
    %159 = vector.broadcast %158 : vector<1x64xf32> to vector<18x64xf32>
    %160 = arith.addf %156, %159 : vector<18x64xf32>
    %cst_67 = arith.constant 5.000000e-01 : f32
    %161 = vector.broadcast %cst_67 : f32 to vector<18x64xf32>
    %162 = arith.mulf %161, %160 : vector<18x64xf32>
    %cst_68 = arith.constant 0.707106769 : f32
    %163 = vector.broadcast %cst_68 : f32 to vector<18x64xf32>
    %164 = arith.mulf %160, %163 : vector<18x64xf32>
    %165 = math.erf %164 : vector<18x64xf32>
    %cst_69 = arith.constant 1.000000e+00 : f32
    %166 = vector.broadcast %cst_69 : f32 to vector<18x64xf32>
    %167 = arith.addf %166, %165 : vector<18x64xf32>
    %168 = arith.mulf %162, %167 : vector<18x64xf32>
    %c0_70 = arith.constant 0 : index
    %c0_71 = arith.constant 0 : index
    %c0_72 = arith.constant 0 : index
    %169 = vector.load %arg11[%c0_70, %c0_71, %c0_72] : memref<2x64x32xf32, #tpu.memory_space<vmem>>, vector<1x64x32xf32>
    %170 = vector.shape_cast %169 : vector<1x64x32xf32> to vector<64x32xf32>
    %cst_73 = arith.constant dense<0.000000e+00> : vector<18x32xf32>
    %171 = tpu.matmul %168, %170, %cst_73 {dimension_numbers = #tpu.dot_dimension_numbers<[1], [0], [0], [1], [0, 0, 1, 1], [], []>} : vector<18x64xf32>, vector<64x32xf32>, vector<18x32xf32> -> vector<18x32xf32>
    %c0_74 = arith.constant 0 : index
    %c0_75 = arith.constant 0 : index
    %c0_76 = arith.constant 0 : index
    %172 = vector.load %arg12[%c0_74, %c0_75, %c0_76] : memref<2x1x32xf32, #tpu.memory_space<vmem>>, vector<1x1x32xf32>
    %173 = vector.shape_cast %172 : vector<1x1x32xf32> to vector<1x32xf32>
    %174 = vector.broadcast %173 : vector<1x32xf32> to vector<18x32xf32>
    %175 = arith.addf %171, %174 : vector<18x32xf32>
    %176 = arith.addf %175, %153 : vector<18x32xf32>
    %c1 = arith.constant 1 : index
    %c0_77 = arith.constant 0 : index
    %c0_78 = arith.constant 0 : index
    %177 = vector.load %arg2[%c1, %c0_77, %c0_78] : memref<2x1x32xf32, #tpu.memory_space<vmem>>, vector<1x1x32xf32>
    %178 = vector.shape_cast %177 : vector<1x1x32xf32> to vector<1x32xf32>
    %c1_79 = arith.constant 1 : index
    %c0_80 = arith.constant 0 : index
    %c0_81 = arith.constant 0 : index
    %179 = vector.load %arg3[%c1_79, %c0_80, %c0_81] : memref<2x1x32xf32, #tpu.memory_space<vmem>>, vector<1x1x32xf32>
    %180 = vector.shape_cast %179 : vector<1x1x32xf32> to vector<1x32xf32>
    %cst_82 = arith.constant dense<0.000000e+00> : vector<18xf32>
    %181 = vector.multi_reduction <add>, %176, %cst_82 [1] : vector<18x32xf32> to vector<18xf32>
    %182 = vector.shape_cast %181 : vector<18xf32> to vector<18x1xf32>
    %cst_83 = arith.constant 3.200000e+01 : f32
    %183 = vector.broadcast %cst_83 : f32 to vector<18x1xf32>
    %184 = arith.divf %182, %183 : vector<18x1xf32>
    %185 = vector.broadcast %184 : vector<18x1xf32> to vector<18x32xf32>
    %186 = arith.subf %176, %185 : vector<18x32xf32>
    %187 = arith.mulf %186, %186 : vector<18x32xf32>
    %cst_84 = arith.constant dense<0.000000e+00> : vector<18xf32>
    %188 = vector.multi_reduction <add>, %187, %cst_84 [1] : vector<18x32xf32> to vector<18xf32>
    %189 = vector.shape_cast %188 : vector<18xf32> to vector<18x1xf32>
    %cst_85 = arith.constant 3.200000e+01 : f32
    %190 = vector.broadcast %cst_85 : f32 to vector<18x1xf32>
    %191 = arith.divf %189, %190 : vector<18x1xf32>
    %192 = vector.broadcast %184 : vector<18x1xf32> to vector<18x32xf32>
    %193 = arith.subf %176, %192 : vector<18x32xf32>
    %cst_86 = arith.constant 9.99999974E-6 : f32
    %194 = vector.broadcast %cst_86 : f32 to vector<18x1xf32>
    %195 = arith.addf %191, %194 : vector<18x1xf32>
    %196 = math.rsqrt %195 : vector<18x1xf32>
    %197 = vector.broadcast %196 : vector<18x1xf32> to vector<18x32xf32>
    %198 = arith.mulf %193, %197 : vector<18x32xf32>
    %199 = vector.broadcast %178 : vector<1x32xf32> to vector<18x32xf32>
    %200 = arith.mulf %198, %199 : vector<18x32xf32>
    %201 = vector.broadcast %180 : vector<1x32xf32> to vector<18x32xf32>
    %202 = arith.addf %200, %201 : vector<18x32xf32>
    %c1_87 = arith.constant 1 : index
    %c0_88 = arith.constant 0 : index
    %c0_89 = arith.constant 0 : index
    %203 = vector.load %arg4[%c1_87, %c0_88, %c0_89] : memref<2x32x96xf32, #tpu.memory_space<vmem>>, vector<1x32x96xf32>
    %204 = vector.shape_cast %203 : vector<1x32x96xf32> to vector<32x96xf32>
    %cst_90 = arith.constant dense<0.000000e+00> : vector<18x96xf32>
    %205 = tpu.matmul %202, %204, %cst_90 {dimension_numbers = #tpu.dot_dimension_numbers<[1], [0], [0], [1], [0, 0, 1, 1], [], []>} : vector<18x32xf32>, vector<32x96xf32>, vector<18x96xf32> -> vector<18x96xf32>
    %206 = vector.extract_strided_slice %205 {offsets = [0, 0], sizes = [18, 32], strides = [1, 1]} : vector<18x96xf32> to vector<18x32xf32>
    %207 = vector.shape_cast %206 : vector<18x32xf32> to vector<2x9x32xf32>
    %208 = vector.extract_strided_slice %205 {offsets = [0, 32], sizes = [18, 32], strides = [1, 1]} : vector<18x96xf32> to vector<18x32xf32>
    %209 = vector.shape_cast %208 : vector<18x32xf32> to vector<2x9x32xf32>
    %210 = vector.extract_strided_slice %205 {offsets = [0, 64], sizes = [18, 32], strides = [1, 1]} : vector<18x96xf32> to vector<18x32xf32>
    %211 = vector.shape_cast %210 : vector<18x32xf32> to vector<2x9x32xf32>
    %212 = vector.extract_strided_slice %207 {offsets = [0, 0, 0], sizes = [2, 9, 8], strides = [1, 1, 1]} : vector<2x9x32xf32> to vector<2x9x8xf32>
    %213 = vector.extract_strided_slice %209 {offsets = [0, 0, 0], sizes = [2, 9, 8], strides = [1, 1, 1]} : vector<2x9x32xf32> to vector<2x9x8xf32>
    %214 = vector.extract_strided_slice %211 {offsets = [0, 0, 0], sizes = [2, 9, 8], strides = [1, 1, 1]} : vector<2x9x32xf32> to vector<2x9x8xf32>
    "tpu.trace_start"() <{level = 10 : i32, message = "bid,bjd->bij"}> : () -> ()
    %cst_91 = arith.constant dense<0.000000e+00> : vector<2x9x9xf32>
    %215 = tpu.matmul %212, %213, %cst_91 {dimension_numbers = #tpu.dot_dimension_numbers<[2], [2], [1], [1], [0, 0, 0, 1, 1, 1], [0], [0]>} : vector<2x9x8xf32>, vector<2x9x8xf32>, vector<2x9x9xf32> -> vector<2x9x9xf32>
    "tpu.trace_stop"() : () -> ()
    %cst_92 = arith.constant 0.353553385 : f32
    %216 = vector.broadcast %cst_92 : f32 to vector<2x9x9xf32>
    %217 = arith.mulf %215, %216 : vector<2x9x9xf32>
    %cst_93 = arith.constant -1.000000e+09 : f32
    %218 = vector.broadcast %cst_93 : f32 to vector<2x9x9xf32>
    %219 = arith.select %6, %218, %217 : vector<2x9x9xi1>, vector<2x9x9xf32>
    %cst_94 = arith.constant dense<0xFF800000> : vector<2x9xf32>
    %220 = vector.multi_reduction <maximumf>, %219, %cst_94 [2] : vector<2x9x9xf32> to vector<2x9xf32>
    %221 = vector.shape_cast %220 : vector<2x9xf32> to vector<2x9x1xf32>
    %222 = vector.broadcast %221 : vector<2x9x1xf32> to vector<2x9x9xf32>
    %223 = arith.subf %219, %222 : vector<2x9x9xf32>
    %224 = math.exp %223 : vector<2x9x9xf32>
    %cst_95 = arith.constant dense<0.000000e+00> : vector<2x9xf32>
    %225 = vector.multi_reduction <add>, %224, %cst_95 [2] : vector<2x9x9xf32> to vector<2x9xf32>
    %226 = vector.shape_cast %225 : vector<2x9xf32> to vector<2x9x1xf32>
    %227 = tpu.reciprocal %226 {approx = true} : vector<2x9x1xf32> -> vector<2x9x1xf32>
    %228 = vector.broadcast %227 : vector<2x9x1xf32> to vector<2x9x9xf32>
    %229 = arith.mulf %224, %228 : vector<2x9x9xf32>
    "tpu.trace_start"() <{level = 10 : i32, message = "bij,bjd->bid"}> : () -> ()
    %cst_96 = arith.constant dense<0.000000e+00> : vector<2x9x8xf32>
    %230 = tpu.matmul %229, %214, %cst_96 {dimension_numbers = #tpu.dot_dimension_numbers<[2], [1], [1], [2], [0, 0, 0, 1, 1, 2], [0], [0]>} : vector<2x9x9xf32>, vector<2x9x8xf32>, vector<2x9x8xf32> -> vector<2x9x8xf32>
    "tpu.trace_stop"() : () -> ()
    %231 = vector.extract_strided_slice %207 {offsets = [0, 0, 8], sizes = [2, 9, 8], strides = [1, 1, 1]} : vector<2x9x32xf32> to vector<2x9x8xf32>
    %232 = vector.extract_strided_slice %209 {offsets = [0, 0, 8], sizes = [2, 9, 8], strides = [1, 1, 1]} : vector<2x9x32xf32> to vector<2x9x8xf32>
    %233 = vector.extract_strided_slice %211 {offsets = [0, 0, 8], sizes = [2, 9, 8], strides = [1, 1, 1]} : vector<2x9x32xf32> to vector<2x9x8xf32>
    "tpu.trace_start"() <{level = 10 : i32, message = "bid,bjd->bij"}> : () -> ()
    %cst_97 = arith.constant dense<0.000000e+00> : vector<2x9x9xf32>
    %234 = tpu.matmul %231, %232, %cst_97 {dimension_numbers = #tpu.dot_dimension_numbers<[2], [2], [1], [1], [0, 0, 0, 1, 1, 1], [0], [0]>} : vector<2x9x8xf32>, vector<2x9x8xf32>, vector<2x9x9xf32> -> vector<2x9x9xf32>
    "tpu.trace_stop"() : () -> ()
    %cst_98 = arith.constant 0.353553385 : f32
    %235 = vector.broadcast %cst_98 : f32 to vector<2x9x9xf32>
    %236 = arith.mulf %234, %235 : vector<2x9x9xf32>
    %cst_99 = arith.constant -1.000000e+09 : f32
    %237 = vector.broadcast %cst_99 : f32 to vector<2x9x9xf32>
    %238 = arith.select %6, %237, %236 : vector<2x9x9xi1>, vector<2x9x9xf32>
    %cst_100 = arith.constant dense<0xFF800000> : vector<2x9xf32>
    %239 = vector.multi_reduction <maximumf>, %238, %cst_100 [2] : vector<2x9x9xf32> to vector<2x9xf32>
    %240 = vector.shape_cast %239 : vector<2x9xf32> to vector<2x9x1xf32>
    %241 = vector.broadcast %240 : vector<2x9x1xf32> to vector<2x9x9xf32>
    %242 = arith.subf %238, %241 : vector<2x9x9xf32>
    %243 = math.exp %242 : vector<2x9x9xf32>
    %cst_101 = arith.constant dense<0.000000e+00> : vector<2x9xf32>
    %244 = vector.multi_reduction <add>, %243, %cst_101 [2] : vector<2x9x9xf32> to vector<2x9xf32>
    %245 = vector.shape_cast %244 : vector<2x9xf32> to vector<2x9x1xf32>
    %246 = tpu.reciprocal %245 {approx = true} : vector<2x9x1xf32> -> vector<2x9x1xf32>
    %247 = vector.broadcast %246 : vector<2x9x1xf32> to vector<2x9x9xf32>
    %248 = arith.mulf %243, %247 : vector<2x9x9xf32>
    "tpu.trace_start"() <{level = 10 : i32, message = "bij,bjd->bid"}> : () -> ()
    %cst_102 = arith.constant dense<0.000000e+00> : vector<2x9x8xf32>
    %249 = tpu.matmul %248, %233, %cst_102 {dimension_numbers = #tpu.dot_dimension_numbers<[2], [1], [1], [2], [0, 0, 0, 1, 1, 2], [0], [0]>} : vector<2x9x9xf32>, vector<2x9x8xf32>, vector<2x9x8xf32> -> vector<2x9x8xf32>
    "tpu.trace_stop"() : () -> ()
    %250 = vector.extract_strided_slice %207 {offsets = [0, 0, 16], sizes = [2, 9, 8], strides = [1, 1, 1]} : vector<2x9x32xf32> to vector<2x9x8xf32>
    %251 = vector.extract_strided_slice %209 {offsets = [0, 0, 16], sizes = [2, 9, 8], strides = [1, 1, 1]} : vector<2x9x32xf32> to vector<2x9x8xf32>
    %252 = vector.extract_strided_slice %211 {offsets = [0, 0, 16], sizes = [2, 9, 8], strides = [1, 1, 1]} : vector<2x9x32xf32> to vector<2x9x8xf32>
    "tpu.trace_start"() <{level = 10 : i32, message = "bid,bjd->bij"}> : () -> ()
    %cst_103 = arith.constant dense<0.000000e+00> : vector<2x9x9xf32>
    %253 = tpu.matmul %250, %251, %cst_103 {dimension_numbers = #tpu.dot_dimension_numbers<[2], [2], [1], [1], [0, 0, 0, 1, 1, 1], [0], [0]>} : vector<2x9x8xf32>, vector<2x9x8xf32>, vector<2x9x9xf32> -> vector<2x9x9xf32>
    "tpu.trace_stop"() : () -> ()
    %cst_104 = arith.constant 0.353553385 : f32
    %254 = vector.broadcast %cst_104 : f32 to vector<2x9x9xf32>
    %255 = arith.mulf %253, %254 : vector<2x9x9xf32>
    %cst_105 = arith.constant -1.000000e+09 : f32
    %256 = vector.broadcast %cst_105 : f32 to vector<2x9x9xf32>
    %257 = arith.select %6, %256, %255 : vector<2x9x9xi1>, vector<2x9x9xf32>
    %cst_106 = arith.constant dense<0xFF800000> : vector<2x9xf32>
    %258 = vector.multi_reduction <maximumf>, %257, %cst_106 [2] : vector<2x9x9xf32> to vector<2x9xf32>
    %259 = vector.shape_cast %258 : vector<2x9xf32> to vector<2x9x1xf32>
    %260 = vector.broadcast %259 : vector<2x9x1xf32> to vector<2x9x9xf32>
    %261 = arith.subf %257, %260 : vector<2x9x9xf32>
    %262 = math.exp %261 : vector<2x9x9xf32>
    %cst_107 = arith.constant dense<0.000000e+00> : vector<2x9xf32>
    %263 = vector.multi_reduction <add>, %262, %cst_107 [2] : vector<2x9x9xf32> to vector<2x9xf32>
    %264 = vector.shape_cast %263 : vector<2x9xf32> to vector<2x9x1xf32>
    %265 = tpu.reciprocal %264 {approx = true} : vector<2x9x1xf32> -> vector<2x9x1xf32>
    %266 = vector.broadcast %265 : vector<2x9x1xf32> to vector<2x9x9xf32>
    %267 = arith.mulf %262, %266 : vector<2x9x9xf32>
    "tpu.trace_start"() <{level = 10 : i32, message = "bij,bjd->bid"}> : () -> ()
    %cst_108 = arith.constant dense<0.000000e+00> : vector<2x9x8xf32>
    %268 = tpu.matmul %267, %252, %cst_108 {dimension_numbers = #tpu.dot_dimension_numbers<[2], [1], [1], [2], [0, 0, 0, 1, 1, 2], [0], [0]>} : vector<2x9x9xf32>, vector<2x9x8xf32>, vector<2x9x8xf32> -> vector<2x9x8xf32>
    "tpu.trace_stop"() : () -> ()
    %269 = vector.extract_strided_slice %207 {offsets = [0, 0, 24], sizes = [2, 9, 8], strides = [1, 1, 1]} : vector<2x9x32xf32> to vector<2x9x8xf32>
    %270 = vector.extract_strided_slice %209 {offsets = [0, 0, 24], sizes = [2, 9, 8], strides = [1, 1, 1]} : vector<2x9x32xf32> to vector<2x9x8xf32>
    %271 = vector.extract_strided_slice %211 {offsets = [0, 0, 24], sizes = [2, 9, 8], strides = [1, 1, 1]} : vector<2x9x32xf32> to vector<2x9x8xf32>
    "tpu.trace_start"() <{level = 10 : i32, message = "bid,bjd->bij"}> : () -> ()
    %cst_109 = arith.constant dense<0.000000e+00> : vector<2x9x9xf32>
    %272 = tpu.matmul %269, %270, %cst_109 {dimension_numbers = #tpu.dot_dimension_numbers<[2], [2], [1], [1], [0, 0, 0, 1, 1, 1], [0], [0]>} : vector<2x9x8xf32>, vector<2x9x8xf32>, vector<2x9x9xf32> -> vector<2x9x9xf32>
    "tpu.trace_stop"() : () -> ()
    %cst_110 = arith.constant 0.353553385 : f32
    %273 = vector.broadcast %cst_110 : f32 to vector<2x9x9xf32>
    %274 = arith.mulf %272, %273 : vector<2x9x9xf32>
    %cst_111 = arith.constant -1.000000e+09 : f32
    %275 = vector.broadcast %cst_111 : f32 to vector<2x9x9xf32>
    %276 = arith.select %6, %275, %274 : vector<2x9x9xi1>, vector<2x9x9xf32>
    %cst_112 = arith.constant dense<0xFF800000> : vector<2x9xf32>
    %277 = vector.multi_reduction <maximumf>, %276, %cst_112 [2] : vector<2x9x9xf32> to vector<2x9xf32>
    %278 = vector.shape_cast %277 : vector<2x9xf32> to vector<2x9x1xf32>
    %279 = vector.broadcast %278 : vector<2x9x1xf32> to vector<2x9x9xf32>
    %280 = arith.subf %276, %279 : vector<2x9x9xf32>
    %281 = math.exp %280 : vector<2x9x9xf32>
    %cst_113 = arith.constant dense<0.000000e+00> : vector<2x9xf32>
    %282 = vector.multi_reduction <add>, %281, %cst_113 [2] : vector<2x9x9xf32> to vector<2x9xf32>
    %283 = vector.shape_cast %282 : vector<2x9xf32> to vector<2x9x1xf32>
    %284 = tpu.reciprocal %283 {approx = true} : vector<2x9x1xf32> -> vector<2x9x1xf32>
    %285 = vector.broadcast %284 : vector<2x9x1xf32> to vector<2x9x9xf32>
    %286 = arith.mulf %281, %285 : vector<2x9x9xf32>
    "tpu.trace_start"() <{level = 10 : i32, message = "bij,bjd->bid"}> : () -> ()
    %cst_114 = arith.constant dense<0.000000e+00> : vector<2x9x8xf32>
    %287 = tpu.matmul %286, %271, %cst_114 {dimension_numbers = #tpu.dot_dimension_numbers<[2], [1], [1], [2], [0, 0, 0, 1, 1, 2], [0], [0]>} : vector<2x9x9xf32>, vector<2x9x8xf32>, vector<2x9x8xf32> -> vector<2x9x8xf32>
    "tpu.trace_stop"() : () -> ()
    %288 = tpu.concatenate %230, %249, %268, %287 in 2 : vector<2x9x8xf32>, vector<2x9x8xf32>, vector<2x9x8xf32>, vector<2x9x8xf32> -> vector<2x9x32xf32>
    %289 = vector.shape_cast %288 : vector<2x9x32xf32> to vector<18x32xf32>
    %c1_115 = arith.constant 1 : index
    %c0_116 = arith.constant 0 : index
    %c0_117 = arith.constant 0 : index
    %290 = vector.load %arg5[%c1_115, %c0_116, %c0_117] : memref<2x32x32xf32, #tpu.memory_space<vmem>>, vector<1x32x32xf32>
    %291 = vector.shape_cast %290 : vector<1x32x32xf32> to vector<32x32xf32>
    %cst_118 = arith.constant dense<0.000000e+00> : vector<18x32xf32>
    %292 = tpu.matmul %289, %291, %cst_118 {dimension_numbers = #tpu.dot_dimension_numbers<[1], [0], [0], [1], [0, 0, 1, 1], [], []>} : vector<18x32xf32>, vector<32x32xf32>, vector<18x32xf32> -> vector<18x32xf32>
    %c1_119 = arith.constant 1 : index
    %c0_120 = arith.constant 0 : index
    %c0_121 = arith.constant 0 : index
    %293 = vector.load %arg6[%c1_119, %c0_120, %c0_121] : memref<2x1x32xf32, #tpu.memory_space<vmem>>, vector<1x1x32xf32>
    %294 = vector.shape_cast %293 : vector<1x1x32xf32> to vector<1x32xf32>
    %295 = vector.broadcast %294 : vector<1x32xf32> to vector<18x32xf32>
    %296 = arith.addf %292, %295 : vector<18x32xf32>
    %297 = arith.addf %296, %202 : vector<18x32xf32>
    %c1_122 = arith.constant 1 : index
    %c0_123 = arith.constant 0 : index
    %c0_124 = arith.constant 0 : index
    %298 = vector.load %arg7[%c1_122, %c0_123, %c0_124] : memref<2x1x32xf32, #tpu.memory_space<vmem>>, vector<1x1x32xf32>
    %299 = vector.shape_cast %298 : vector<1x1x32xf32> to vector<1x32xf32>
    %c1_125 = arith.constant 1 : index
    %c0_126 = arith.constant 0 : index
    %c0_127 = arith.constant 0 : index
    %300 = vector.load %arg8[%c1_125, %c0_126, %c0_127] : memref<2x1x32xf32, #tpu.memory_space<vmem>>, vector<1x1x32xf32>
    %301 = vector.shape_cast %300 : vector<1x1x32xf32> to vector<1x32xf32>
    %cst_128 = arith.constant dense<0.000000e+00> : vector<18xf32>
    %302 = vector.multi_reduction <add>, %297, %cst_128 [1] : vector<18x32xf32> to vector<18xf32>
    %303 = vector.shape_cast %302 : vector<18xf32> to vector<18x1xf32>
    %cst_129 = arith.constant 3.200000e+01 : f32
    %304 = vector.broadcast %cst_129 : f32 to vector<18x1xf32>
    %305 = arith.divf %303, %304 : vector<18x1xf32>
    %306 = vector.broadcast %305 : vector<18x1xf32> to vector<18x32xf32>
    %307 = arith.subf %297, %306 : vector<18x32xf32>
    %308 = arith.mulf %307, %307 : vector<18x32xf32>
    %cst_130 = arith.constant dense<0.000000e+00> : vector<18xf32>
    %309 = vector.multi_reduction <add>, %308, %cst_130 [1] : vector<18x32xf32> to vector<18xf32>
    %310 = vector.shape_cast %309 : vector<18xf32> to vector<18x1xf32>
    %cst_131 = arith.constant 3.200000e+01 : f32
    %311 = vector.broadcast %cst_131 : f32 to vector<18x1xf32>
    %312 = arith.divf %310, %311 : vector<18x1xf32>
    %313 = vector.broadcast %305 : vector<18x1xf32> to vector<18x32xf32>
    %314 = arith.subf %297, %313 : vector<18x32xf32>
    %cst_132 = arith.constant 9.99999974E-6 : f32
    %315 = vector.broadcast %cst_132 : f32 to vector<18x1xf32>
    %316 = arith.addf %312, %315 : vector<18x1xf32>
    %317 = math.rsqrt %316 : vector<18x1xf32>
    %318 = vector.broadcast %317 : vector<18x1xf32> to vector<18x32xf32>
    %319 = arith.mulf %314, %318 : vector<18x32xf32>
    %320 = vector.broadcast %299 : vector<1x32xf32> to vector<18x32xf32>
    %321 = arith.mulf %319, %320 : vector<18x32xf32>
    %322 = vector.broadcast %301 : vector<1x32xf32> to vector<18x32xf32>
    %323 = arith.addf %321, %322 : vector<18x32xf32>
    %c1_133 = arith.constant 1 : index
    %c0_134 = arith.constant 0 : index
    %c0_135 = arith.constant 0 : index
    %324 = vector.load %arg9[%c1_133, %c0_134, %c0_135] : memref<2x32x64xf32, #tpu.memory_space<vmem>>, vector<1x32x64xf32>
    %325 = vector.shape_cast %324 : vector<1x32x64xf32> to vector<32x64xf32>
    %cst_136 = arith.constant dense<0.000000e+00> : vector<18x64xf32>
    %326 = tpu.matmul %323, %325, %cst_136 {dimension_numbers = #tpu.dot_dimension_numbers<[1], [0], [0], [1], [0, 0, 1, 1], [], []>} : vector<18x32xf32>, vector<32x64xf32>, vector<18x64xf32> -> vector<18x64xf32>
    %c1_137 = arith.constant 1 : index
    %c0_138 = arith.constant 0 : index
    %c0_139 = arith.constant 0 : index
    %327 = vector.load %arg10[%c1_137, %c0_138, %c0_139] : memref<2x1x64xf32, #tpu.memory_space<vmem>>, vector<1x1x64xf32>
    %328 = vector.shape_cast %327 : vector<1x1x64xf32> to vector<1x64xf32>
    %329 = vector.broadcast %328 : vector<1x64xf32> to vector<18x64xf32>
    %330 = arith.addf %326, %329 : vector<18x64xf32>
    %cst_140 = arith.constant 5.000000e-01 : f32
    %331 = vector.broadcast %cst_140 : f32 to vector<18x64xf32>
    %332 = arith.mulf %331, %330 : vector<18x64xf32>
    %cst_141 = arith.constant 0.707106769 : f32
    %333 = vector.broadcast %cst_141 : f32 to vector<18x64xf32>
    %334 = arith.mulf %330, %333 : vector<18x64xf32>
    %335 = math.erf %334 : vector<18x64xf32>
    %cst_142 = arith.constant 1.000000e+00 : f32
    %336 = vector.broadcast %cst_142 : f32 to vector<18x64xf32>
    %337 = arith.addf %336, %335 : vector<18x64xf32>
    %338 = arith.mulf %332, %337 : vector<18x64xf32>
    %c1_143 = arith.constant 1 : index
    %c0_144 = arith.constant 0 : index
    %c0_145 = arith.constant 0 : index
    %339 = vector.load %arg11[%c1_143, %c0_144, %c0_145] : memref<2x64x32xf32, #tpu.memory_space<vmem>>, vector<1x64x32xf32>
    %340 = vector.shape_cast %339 : vector<1x64x32xf32> to vector<64x32xf32>
    %cst_146 = arith.constant dense<0.000000e+00> : vector<18x32xf32>
    %341 = tpu.matmul %338, %340, %cst_146 {dimension_numbers = #tpu.dot_dimension_numbers<[1], [0], [0], [1], [0, 0, 1, 1], [], []>} : vector<18x64xf32>, vector<64x32xf32>, vector<18x32xf32> -> vector<18x32xf32>
    %c1_147 = arith.constant 1 : index
    %c0_148 = arith.constant 0 : index
    %c0_149 = arith.constant 0 : index
    %342 = vector.load %arg12[%c1_147, %c0_148, %c0_149] : memref<2x1x32xf32, #tpu.memory_space<vmem>>, vector<1x1x32xf32>
    %343 = vector.shape_cast %342 : vector<1x1x32xf32> to vector<1x32xf32>
    %344 = vector.broadcast %343 : vector<1x32xf32> to vector<18x32xf32>
    %345 = arith.addf %341, %344 : vector<18x32xf32>
    %346 = arith.addf %345, %323 : vector<18x32xf32>
    %c0_150 = arith.constant 0 : index
    %c0_151 = arith.constant 0 : index
    %347 = vector.load %arg13[%c0_150, %c0_151] : memref<18x32xf32, #tpu.memory_space<vmem>>, vector<18x32xf32>
    tpu.vector_store %arg13[%c0_150, %c0_151], %346 {strides = array<i32>} : memref<18x32xf32, #tpu.memory_space<vmem>>, vector<18x32xf32>,
    return
  }
}

</mosaic_0001>

<bundles_post_ra>
// kernel: tpu_custom_call.1
= control target key start
LH: loop header
LB: loop body
LE: loop exit
PB: predicated region body
PF: predicated region fallthrough
CT: control target
= control target key end

     0   :  { %18 = vsyncpa [#allocation3], 0  ;;  %s8159_s0 = inlined_call_operand.hbm [shape: f32[18,32], index: 0, kind: input, shape index: {}]   ;;  %s8160_s1 = inlined_call_operand.vmem [shape: f32[2,9], index: 1, kind: input, shape index: {}]   ;;  %s8161_s2 = inlined_call_operand.vmem [shape: f32[2,1,32], index: 2, kind: input, shape index: {}]   ;;  %s8162_s3 = inlined_call_operand.vmem [shape: f32[2,1,32], index: 3, kind: input, shape index: {}]   ;;  %s8163_s4 = inlined_call_operand.vmem [shape: f32[2,32,96], index: 4, kind: input, shape index: {}]   ;;  %s8164_s5 = inlined_call_operand.vmem [shape: f32[2,32,32], index: 5, kind: input, shape index: {}]   ;;  %s8165_s6 = inlined_call_operand.vmem [shape: f32[2,1,32], index: 6, kind: input, shape index: {}]   ;;  %s8166_s7 = inlined_call_operand.vmem [shape: f32[2,1,32], index: 7, kind: input, shape index: {}]   ;;  %s8167_s8 = inlined_call_operand.vmem [shape: f32[2,1,32], index: 8, kind: input, shape index: {}]   ;;  %s8168_s9 = inlined_call_operand.vmem [shape: f32[2,32,64], index: 9, kind: input, shape index: {}]   ;;  %s8169_s10 = inlined_call_operand.vmem [shape: f32[2,1,64], index: 10, kind: input, shape index: {}]   ;;  %s8170_s11 = inlined_call_operand.vmem [shape: f32[2,64,32], index: 11, kind: input, shape index: {}]   ;;  %s8171_s12 = inlined_call_operand.vmem [shape: f32[2,1,32], index: 12, kind: input, shape index: {}]   ;;  %s8172_s13 = inlined_call_operand.hbm [shape: f32[18,32], index: 13, kind: output, shape index: {}]  }
   0x1   :  { %19 = vsyncpa [#allocation4], 0  ;;  %s6978_s25 = smov [#allocation2]   ;;  %s6930_s29 = scalar_lea.hbm %s8159_s0, 384 }
   0x2   :  { %s25_s26 = sshll.u32 %s6978_s25, 4  ;;  %p6931_p0 = scmp.ne.s32.totalorder %s8159_s0, %s6930_s29  ;;  %s26_s26 = int_to_ptr.vmem [resolvable:$true] %s25_s26 }
   0x3   :  { %p6934_p1 = scmp.lt.u32.totalorder %s6930_s29, %s8159_s0 }
   0x5   :  { %p6936_p2 = pnand %p6934_p1, %p6931_p0 }
   0x7   :  { %6939 = shalt.err (!%p6936_p2)
}
   0x8   :  { %s6940_s17 = scalar_lea.vmem %s26_s26, 384  ;;  %p6945_p4 = scmp.lt.s32.totalorder %s26_s26, %s26_s26 }
   0x9   :  { %p6941_p3 = scmp.ne.s32.totalorder %s26_s26, %s6940_s17  ;;  %p6946_p5 = scmp.lt.s32.totalorder %s6940_s17, %s6940_s17 }
   0xb   :  { %p6947_p6 = por %p6946_p5, %p6945_p4 }
   0xd   :  { %p6948_p7 = pnand %p6947_p6, %p6941_p3 }
   0xf   :  { %6951 = shalt.err (!%p6948_p7)
}
  0x10   :  { %s8173_s18 = smov 128   ;;  %s6980_s19 = smov 8  }
  0x11   :  { %31 = dma.hbm_to_vmem [thread:$0]  %s8159_s0, 384, %s26_s26, [#allocation3], %s8173_s18, %s8173_s18, %s6980_s19  }
  0x12   :  { %6974 = dma.done.wait [#allocation3], 384  }
  0x13   :  { %6975 = vsyncadd [#allocation3], 4294966912  ;;  %vm104_vm0 = vcmask 261120   ;;  %vm111_vm1 = vcmask 254976   ;;  %v59_v0 = vld [vmem:[#allocation2] sm:$0xff]  ;;  %v60_v2 = vld [vmem:[#allocation2 + $0x8] sm:$0xff]  ;;  %v75_v54 = vlaneseq }
  0x14   :  { %v61_v1 = vld [vmem:[#allocation2 + $0x10] sm:$0x3]  ;;  %v105_v3 = vsel %vm104_vm0, %v59_v0, 0.0  ;;  %v108_v5 = vsel %vm104_vm0, %v60_v2, 0.0  ;;  %v164_v21 = vld [vmem:[%s8163_s4] sm:$0xff]  ;;  %v165_v22 = vld [vmem:[%s8163_s4 + $0x8] sm:$0xff] }
  0x15   :  { %v112_v4 = vsel %vm111_vm1, %v61_v1, 0.0  ;;  %106 = vadd.xlane.f32.xlu0 %v105_v3  ;;  %v166_v23 = vld [vmem:[%s8163_s4 + $0x10] sm:$0xff]  ;;  %v6981_v24 = vmov 0.0|0.0   ;;  %v6332_v25 = vpack.c.bf16 %v165_v22, %v164_v21  ;;  %v167_v26 = vld [vmem:[%s8163_s4 + $0x18] sm:$0xff]  ;;  %vm6982_vm2 = vmmov 0   ;;  %s6985_s16 = smov 96  }
  0x16   :  { %113 = vadd.xlane.f32.xlu1 %v112_v4  ;;  %6331 = vmatprep.subr.bf16.mxu0 %v6981_v24  ;;  %v6983_v27 = vmov 0.0   ;;  %v6335_v28 = vpack.c.bf16 %v167_v26, %v166_v23  ;;  %v5578_v39 = vld [vmem:[%s8161_s2] ss:$0 sm:$0xff]  ;;  %v6984_v52 = vmov 1966171168   ;;  %v7130_v56 = vshrl.u32 %v75_v54, 7 }
  0x17   :  { %5963 = vmatprep.mubr.msk.f32.mxu0 %vm6982_vm2, %v6983_v27  ;;  %6333 = vmatpush3.bf16.msra.mxu0 %v6332_v25  ;;  %v5579_v41 = vld [vmem:[%s8162_s3] ss:$0 sm:$0xff]  ;;  %v73_v53 = vunpack.c.l.s4 %v6984_v52  ;;  %vm447_vm3 = vcmask 64512   ;;  %vm693_vm8 = vcmask 65536   ;;  %vm689_vm9 = vcmask 72704   ;;  %s6988_s21 = smov 88  }
  0x18   :  { %6334 = vmatprep.subr.bf16.mxu0 %v6981_v24  ;;  %vm7192_vm4 = vmpackc.low %vm447_vm3, %vm447_vm3  ;;  %vm746_vm11 = vcmask 1040384   ;;  %vm6989_vm12 = vmmov 1   ;;  %s6990_s0 = smov 120   ;;  %s6991_s22 = smov 56   ;;  %vm2194_vm14 = vcmask 130048   ;;  %vm2199_vm15 = vcmask 195584  }
  0x19   :  { %109 = vadd.xlane.f32.xlu0 %v108_v5  ;;  %v74_v55 = vunpack.c.0.s8 %v73_v53  ;;  %vm7240_vm13 = vmpackc.low %vm746_vm11, %vm6989_vm12  ;;  %s6992_s23 = smov 80   ;;  %s6993_s24 = smov 112  }
  0x1a   :  { %s6994_s25 = smov 48   ;;  %s8178_s26 = smov 72  }
  0x1b   :  { %6336 = vmatpush3.bf16.msra.mxu0 %v6335_v28  ;;  %v7133_v57 = vsub.s32 %v74_v55, %v7130_v56  ;;  %s8176_s27 = smov 104   ;;  %s8174_s28 = smov 40  }
  0x1c   :  { %s6998_s29 = smov 16   ;;  %s6999_s20 = smov 24  }
  0x1d   :  { %s7000_s18 = smov [#allocation5]  }
  0xa2   :  { %v107_v6 = vpop.xlane.xlu0 %106 }
  0xa3   :  { %v114_v7 = vpop.xlane.xlu1 %113  ;;  %v116_v8 = vmul.f32 0.03125, %v107_v6 }
  0xa4   :  { %v118_v9 = vmul.f32 0.03125, %v114_v7 }
  0xa5   :  { %v119_v10 = vsub.f32 %v59_v0, %v116_v8 }
  0xa6   :  { %v121_v11 = vsub.f32 %v61_v1, %v118_v9  ;;  %v110_v12 = vpop.xlane.xlu0 %109 }
  0xa7   :  { %v117_v13 = vmul.f32 0.03125, %v110_v12  ;;  %v122_v14 = vmul.f32 %v119_v10, %v119_v10 }
  0xa8   :  { %v124_v15 = vmul.f32 %v121_v11, %v121_v11 }
  0xa9   :  { %v120_v16 = vsub.f32 %v60_v2, %v117_v13  ;;  %v125_v17 = vsel %vm104_vm0, %v122_v14, 0.0 }
  0xaa   :  { %126 = vadd.xlane.f32.xlu1 %v125_v17  ;;  %v131_v18 = vsel %vm111_vm1, %v124_v15, 0.0 }
  0xab   :  { %v123_v19 = vmul.f32 %v120_v16, %v120_v16 }
  0xad   :  { %v128_v20 = vsel %vm104_vm0, %v123_v19, 0.0 }
  0xae   :  { %132 = vadd.xlane.f32.xlu1 %v131_v18  ;;  %129 = vadd.xlane.f32.xlu0 %v128_v20 }
 0x137   :  { %v127_v29 = vpop.xlane.xlu1 %126 }
 0x138   :  { %v134_v30 = vmul.f32 0.03125, %v127_v29 }
 0x13a   :  { %v137_v31 = vadd.f32 1e-05, %v134_v30 }
 0x13b   :  { %v133_v32 = vpop.xlane.xlu1 %132  ;;  %v130_v33 = vpop.xlane.xlu0 %129 }
 0x13c   :  { %6766 = vrsqrt.f32 %v137_v31  ;;  %v136_v34 = vmul.f32 0.03125, %v133_v32  ;;  %v135_v35 = vmul.f32 0.03125, %v130_v33 }
 0x13e   :  { %v139_v36 = vadd.f32 1e-05, %v136_v34  ;;  %v138_v37 = vadd.f32 1e-05, %v135_v35 }
 0x140   :  { %6768 = vrsqrt.f32 %v139_v36 }
 0x141   :  { %6770 = vrsqrt.f32 %v138_v37 }
 0x146   :  { %v6767_v38 = vpop.eup %6766 }
 0x147   :  { %v143_v40 = vmul.f32 %v6767_v38, %v119_v10 }
 0x149   :  { %v152_v42 = vmul.f32 %v5578_v39, %v143_v40 }
 0x14a   :  { %v6769_v43 = vpop.eup %6768 }
 0x14b   :  { %v6771_v44 = vpop.eup %6770  ;;  %v7114_v45 = vadd.f32 %v5579_v41, %v152_v42  ;;  %v145_v47 = vmul.f32 %v6769_v43, %v121_v11 }
 0x14c   :  { %v144_v46 = vmul.f32 %v6771_v44, %v120_v16 }
 0x14d   :  { %5964 = vmatmul.mubr.msk.f32.vlgmr.msra.gmra.mrb[0].mxu0 %vm104_vm0, %v7114_v45  ;;  %v154_v50 = vmul.f32 %v5578_v39, %v145_v47 }
 0x14e   :  { %5966 = vmatprep.mubr.msk.f32.mxu0 %vm6982_vm2, %v6983_v27  ;;  %v153_v48 = vmul.f32 %v5578_v39, %v144_v46 }
 0x14f   :  { %v7126_v51 = vadd.f32 %v5579_v41, %v154_v50 }
 0x150   :  { %v7120_v49 = vadd.f32 %v5579_v41, %v153_v48 }
 0x152   :  { %5967 = vmatmul.mubr.msk.f32.gmra.mrb[2].mxu0 %vm104_vm0, %v7120_v49 }
 0x153   :  { %5969 = vmatprep.mubr.msk.f32.mxu0 %vm6982_vm2, %v6983_v27 }
 0x156   :  { %5970 = vmatmul.mubr.msk.f32.gmra.mrb[4].mxu0 %vm104_vm0, %v7126_v51 }
 0x220   :  { %v243_v58 = vpop.f32.mrb[0].mxu0 }
 0x221   :  { %v260_v59 = vcombine.high %v243_v58, %v243_v58  ;;  %v267_v60 = vrot.slane %v243_v58, %v7133_v57  ;;  %v5965_v61 = vpop.f32.mrb[1].mxu0 }
 0x223   :  { %v274_v62 = vrot.slane %v260_v59, %v7133_v57  ;;  %v275_v63 = vcombine.high %v267_v60, %v267_v60  ;;  %v283_v1 = vrot.slane %v267_v60, %v7133_v57 }
 0x225   :  { %v276_v0 = vcombine.high %v274_v62, %v274_v62  ;;  %v297_v2 = vrot.slane %v275_v63, %v7133_v57  ;;  %v248_v3 = vpop.f32.mrb[2].mxu0  ;;  %v290_v7 = vrot.slane %v274_v62, %v7133_v57 }
 0x226   :  { %v309_v4 = vcombine.high %v248_v3, %v248_v3  ;;  %v316_v5 = vrot.slane %v248_v3, %v7133_v57  ;;  %v5968_v6 = vpop.f32.mrb[3].mxu0 }
 0x227   :  { %v304_v8 = vrot.slane %v276_v0, %v7133_v57  ;;  %v380_v9 = vcombine.low %v283_v1, %v297_v2  ;;  %v5583_v10 = vcombine.high %v283_v1, %v297_v2 }
 0x228   :  { %v323_v11 = vrot.slane %v309_v4, %v7133_v57  ;;  %v324_v12 = vcombine.high %v316_v5, %v316_v5  ;;  %v332_v13 = vrot.slane %v316_v5, %v7133_v57 }
 0x229   :  { %v382_v14 = vcombine.low %v290_v7, %v304_v8  ;;  %v5584_v15 = vcombine.high %v290_v7, %v304_v8  ;;  %v390_v16 = vrot.slane %v380_v9, %v7133_v57  ;;  %v397_v17 = vrot.slane %v5583_v10, %v7133_v57  ;;  %v253_v18 = vpop.f32.mrb[4].mxu0  ;;  %v5577_v10 = vld.sshfl [vmem:[%s8160_s1] sm:$0x11 pattern:$0x75316420]  ;;  %s6987_s1 = smov 64  }
 0x22a   :  { %v325_v19 = vcombine.high %v323_v11, %v323_v11  ;;  %v339_v20 = vrot.slane %v323_v11, %v7133_v57  ;;  %v346_v21 = vrot.slane %v324_v12, %v7133_v57  ;;  %v354_v22 = vcombine.high %v332_v13, %v332_v13  ;;  %v5971_v23 = vpop.f32.mrb[5].mxu0 }
 0x22b   :  { %v404_v25 = vrot.slane %v382_v14, %v7133_v57  ;;  %v411_v26 = vrot.slane %v5584_v15, %v7133_v57  ;;  %v412_v28 = vcombine.low %v390_v16, %v397_v17  ;;  %v435_v32 = vrot.slane %v332_v13, %v7133_v57 }
 0x22c   :  { %v353_v29 = vrot.slane %v325_v19, %v7133_v57  ;;  %v355_v30 = vcombine.high %v339_v20, %v339_v20  ;;  %v356_v31 = vcombine.high %v346_v21, %v346_v21  ;;  %v531_v34 = vcombine.low %v346_v21, %v354_v22 }
 0x22d   :  { %v413_v33 = vcombine.low %v404_v25, %v411_v26  ;;  %v364_v35 = vrot.slane %v253_v18, %v7133_v57  ;;  %v420_v36 = vrot.slane %v412_v28, %v7133_v57  ;;  %v7157_v43 = vrot.slane %v435_v32, %v7133_v57 }
 0x22e   :  { %v532_v37 = vcombine.low %v356_v31, %v339_v20  ;;  %v357_v38 = vcombine.high %v353_v29, %v353_v29  ;;  %v533_v40 = vcombine.low %v353_v29, %v355_v30  ;;  %v541_v47 = vrot.slane %v531_v34, %v7133_v57 }
 0x22f   :  { %v427_v39 = vrot.slane %v413_v33, %v7133_v57  ;;  %v365_v41 = vcombine.high %v364_v35, %v364_v35  ;;  %v372_v42 = vrot.slane %v364_v35, %v7133_v57  ;;  %v78_v11 = vrot.slane %v5577_v10, %v7133_v57 }
 0x230   :  { %v548_v44 = vrot.slane %v532_v37, %v7133_v57  ;;  %v555_v53 = vrot.slane %v533_v40, %v7133_v57  ;;  %v71_v12 = vcombine.high %v5577_v10, %v5577_v10  ;;  %v94_v13 = vsub.s32 0, %v7130_v56 }
 0x231   :  { %v7160_v46 = vcombine.low %v420_v36, %v427_v39  ;;  %v379_v48 = vrot.slane %v365_v41, %v7133_v57  ;;  %v534_v50 = vcombine.low %v357_v38, %v372_v42  ;;  %vm88_vm5 = vcmp.gt.f32.partialorder %v78_v11, 0.5 }
 0x232   :  { %v563_v52 = vcombine.low %v541_v47, %v548_v44  ;;  %v6986_v14 = vmov 0   ;;  %v85_v16 = vrot.slane %v71_v12, %v7133_v57 }
 0x233   :  { %v562_v54 = vrot.slane %v534_v50, %v7133_v57  ;;  %5976 = vmatprep.mubr.msk.f32.mxu0 %vm447_vm3, %v7160_v46  ;;  %v7170_v55 = vpack.i.bf16 %v7157_v43, %v7160_v46  ;;  %v586_v59 = vrot.slane %v379_v48, %v7133_v57  ;;  %v90_v15 = vsel %vm88_vm5, 1, %v6986_v14 }
 0x234   :  { %v571_v60 = vrot.slane %v563_v52, %v7133_v57  ;;  %v7214_v17 = vrot.slane %v90_v15, %v94_v13  ;;  %vm89_vm6 = vcmp.gt.f32.partialorder %v85_v16, 0.5  ;;  %vm2736_vm5 = vcmask 523264  }
 0x235   :  { %v564_v58 = vcombine.low %v555_v53, %v562_v54  ;;  %6607 = vrot.lane.b32.xlu0 %v7170_v55, %s6985_s16  ;;  %v7180_v63 = vrot.slane %v586_v59, %v7133_v57  ;;  %v91_v21 = vsel %vm89_vm6, 1, %v6986_v14 }
 0x236   :  { %vm100_vm7 = vcmp.eq.s32.totalorder %v7214_v17, 1  ;;  %v7222_v26 = vrot.slane %v91_v21, %v94_v13 }
 0x237   :  { %v578_v61 = vrot.slane %v564_v58, %v7133_v57 }
 0x238   :  { %vm101_vm10 = vcmp.eq.s32.totalorder %v7222_v26, 1 }
 0x239   :  { %v7177_v62 = vcombine.low %v571_v60, %v578_v61 }
 0x23b   :  { %5983 = vmatprep.mubr.msk.f32.mxu1 %vm447_vm3, %v7177_v62  ;;  %v7186_v0 = vpack.i.bf16 %v7180_v63, %v7177_v62 }
 0x23d   :  { %6612 = vrot.lane.b32.xlu1 %v7186_v0, %s6985_s16 }
 0x2a7   :  { %v6608_v1 = vpop.permute.xlu0 %6607 }
 0x2a8   :  { %v6610_v2 = vunpack.i.h.bf16 %v6608_v1  ;;  %v6609_v3 = vunpack.i.l.bf16 %v6608_v1 }
 0x2aa   :  { %v6337_v5 = vpack.c.bf16 %v6610_v2, %v6609_v3  ;;  %v5726_v2 = vld [vmem:[%s8164_s5 + $0x20] sm:$0xff] }
 0x2ac   :  { %6339 = vmatprep.subr.msk.bf16.mxu0 %vm7192_vm4, %v6337_v5 }
 0x2ad   :  { %6342 = vmatpush3.bf16.xpose.msk.msra.mxu0 %vm7192_vm4, %v6337_v5 }
 0x2af   :  { %v6613_v6 = vpop.permute.xlu1 %6612 }
 0x2b0   :  { %v6615_v7 = vunpack.i.h.bf16 %v6613_v6  ;;  %v6614_v8 = vunpack.i.l.bf16 %v6613_v6 }
 0x2b2   :  { %v6343_v9 = vpack.c.bf16 %v6615_v7, %v6614_v8 }
 0x2b4   :  { %6345 = vmatprep.subr.msk.bf16.mxu1 %vm7192_vm4, %v6343_v9  ;;  %5977 = vmatmul.mubr.msk.f32.vlgmr.msra.gmra.mrb[6].mxu0 %vm447_vm3, %v7157_v43 }
 0x2b5   :  { %6348 = vmatpush3.bf16.xpose.msk.msra.mxu1 %vm7192_vm4, %v6343_v9 }
 0x2bc   :  { %5984 = vmatmul.mubr.msk.f32.vlgmr.msra.gmra.mrb[0].mxu1 %vm447_vm3, %v7180_v63 }
 0x387   :  { %v5978_v18 = vpop.f32.mrb[6].mxu0 }
 0x388   :  { %v682_v19 = vmul.f32 0.35355338, %v5978_v18  ;;  %v522_v20 = vpop.f32.mrb[7].mxu0 }
 0x389   :  { %v681_v22 = vmul.f32 0.35355338, %v522_v20 }
 0x38a   :  { %v686_v23 = vsel %vm100_vm7, -1e+09, %v682_v19 }
 0x38b   :  { %v694_v56 = vsel %vm693_vm8, %v686_v23, -inf  ;;  %v685_v25 = vsel %vm100_vm7, -1e+09, %v681_v22 }
 0x38c   :  { %695 = vmax.xlane.f32.xlu0 %v694_v56  ;;  %v690_v28 = vsel %vm689_vm9, %v685_v25, -inf }
 0x38d   :  { %691 = vmax.xlane.f32.xlu1 %v690_v28 }
 0x38f   :  { %v5985_v29 = vpop.f32.mrb[0].mxu1 }
 0x390   :  { %v684_v30 = vmul.f32 0.35355338, %v5985_v29  ;;  %v672_v31 = vpop.f32.mrb[1].mxu1 }
 0x391   :  { %v683_v32 = vmul.f32 0.35355338, %v672_v31 }
 0x392   :  { %v688_v33 = vsel %vm101_vm10, -1e+09, %v684_v30 }
 0x393   :  { %v700_v34 = vsel %vm693_vm8, %v688_v33, -inf  ;;  %v687_v35 = vsel %vm101_vm10, -1e+09, %v683_v32 }
 0x394   :  { %701 = vmax.xlane.f32.xlu1 %v700_v34  ;;  %v697_v36 = vsel %vm689_vm9, %v687_v35, -inf }
 0x395   :  { %698 = vmax.xlane.f32.xlu0 %v697_v36 }
 0x3a5   :  { %6622 = vrot.lane.b32.xlu1 %v7186_v0, %s6987_s1 }
 0x3a9   :  { %6627 = vrot.lane.b32.xlu1 %v7170_v55, %s6988_s21 }
 0x3ab   :  { %6617 = vrot.lane.b32.xlu0 %v7170_v55, %s6987_s1 }
 0x3ad   :  { %6632 = vrot.lane.b32.xlu1 %v7186_v0, %s6988_s21 }
 0x419   :  { %v696_v37 = vpop.xlane.xlu0 %695 }
 0x41a   :  { %v704_v38 = vsub.f32 %v686_v23, %v696_v37  ;;  %v692_v39 = vpop.xlane.xlu1 %691 }
 0x41b   :  { %v703_v40 = vsub.f32 %v685_v25, %v692_v39 }
 0x41c   :  { %v709_v41 = vmul.f32 1.442695, %v704_v38 }
 0x41d   :  { %v707_v42 = vmul.f32 1.442695, %v703_v40 }
 0x41e   :  { %6772 = vpow2.f32 %v709_v41 }
 0x41f   :  { %6774 = vpow2.f32 %v707_v42 }
 0x421   :  { %v702_v44 = vpop.xlane.xlu1 %701 }
 0x422   :  { %v706_v47 = vsub.f32 %v688_v33, %v702_v44  ;;  %v699_v48 = vpop.xlane.xlu0 %698 }
 0x423   :  { %v705_v50 = vsub.f32 %v687_v35, %v699_v48 }
 0x424   :  { %v713_v52 = vmul.f32 1.442695, %v706_v47 }
 0x425   :  { %v711_v53 = vmul.f32 1.442695, %v705_v50  ;;  %v6623_v54 = vpop.permute.xlu1 %6622 }
 0x426   :  { %6776 = vpow2.f32 %v713_v52  ;;  %v6625_v58 = vunpack.i.h.bf16 %v6623_v54  ;;  %v6624_v59 = vunpack.i.l.bf16 %v6623_v54  ;;  %v6618_v60 = vpop.permute.xlu0 %6617 }
 0x427   :  { %6778 = vpow2.f32 %v711_v53  ;;  %v6620_v61 = vunpack.i.h.bf16 %v6618_v60  ;;  %v6619_v1 = vunpack.i.l.bf16 %v6618_v60 }
 0x428   :  { %v6773_v3 = vpop.eup %6772  ;;  %v6355_v5 = vpack.c.bf16 %v6625_v58, %v6624_v59 }
 0x429   :  { %v6775_v6 = vpop.eup %6774  ;;  %v6349_v7 = vpack.c.bf16 %v6620_v61, %v6619_v1  ;;  %v6628_v8 = vpop.permute.xlu1 %6627  ;;  %v718_v9 = vsel %vm693_vm8, %v6773_v3, 0.0 }
 0x42a   :  { %v6630_v10 = vunpack.i.h.bf16 %v6628_v8  ;;  %v6629_v11 = vunpack.i.l.bf16 %v6628_v8  ;;  %6357 = vmatprep.subr.msk.bf16.mxu1 %vm7240_vm13, %v6355_v5  ;;  %719 = vadd.xlane.f32.xlu1 %v718_v9  ;;  %v715_v12 = vsel %vm689_vm9, %v6775_v6, 0.0 }
 0x42b   :  { %6351 = vmatprep.subr.msk.bf16.mxu0 %vm7240_vm13, %v6349_v7  ;;  %6360 = vmatpush3.bf16.msk.msra.mxu1 %vm7240_vm13, %v6355_v5 }
 0x42c   :  { %v6361_v13 = vpack.c.bf16 %v6630_v10, %v6629_v11  ;;  %6354 = vmatpush3.bf16.msk.msra.mxu0 %vm7240_vm13, %v6349_v7  ;;  %716 = vadd.xlane.f32.xlu0 %v715_v12 }
 0x42d   :  { %v6633_v14 = vpop.permute.xlu1 %6632 }
 0x42e   :  { %v6635_v15 = vunpack.i.h.bf16 %v6633_v14  ;;  %v6634_v16 = vunpack.i.l.bf16 %v6633_v14  ;;  %6363 = vmatprep.subr.msk.bf16.mxu0 %vm7192_vm4, %v6361_v13 }
 0x430   :  { %v6777_v18 = vpop.eup %6776  ;;  %v6367_v19 = vpack.c.bf16 %v6635_v15, %v6634_v16 }
 0x431   :  { %v6779_v20 = vpop.eup %6778  ;;  %v724_v21 = vsel %vm693_vm8, %v6777_v18, 0.0 }
 0x432   :  { %725 = vadd.xlane.f32.xlu1 %v724_v21  ;;  %6369 = vmatprep.subr.msk.bf16.mxu1 %vm7192_vm4, %v6367_v19  ;;  %v721_v22 = vsel %vm689_vm9, %v6779_v20, 0.0 }
 0x433   :  { %722 = vadd.xlane.f32.xlu0 %v721_v22 }
 0x443   :  { %914 = vrot.lane.b32.xlu1 %v7157_v43, %s6990_s0 }
 0x447   :  { %1005 = vrot.lane.b32.xlu1 %v7180_v63, %s6990_s0 }
 0x449   :  { %912 = vrot.lane.b32.xlu0 %v7160_v46, %s6990_s0 }
 0x44d   :  { %1003 = vrot.lane.b32.xlu0 %v7177_v62, %s6990_s0 }
 0x4b7   :  { %v720_v23 = vpop.xlane.xlu1 %719 }
 0x4b8   :  { %6780 = vrcp.f32 %v720_v23 }
 0x4b9   :  { %v717_v56 = vpop.xlane.xlu0 %716 }
 0x4ba   :  { %6782 = vrcp.f32 %v717_v56 }
 0x4bf   :  { %v726_v25 = vpop.xlane.xlu1 %725 }
 0x4c0   :  { %6784 = vrcp.f32 %v726_v25  ;;  %v723_v28 = vpop.xlane.xlu0 %722 }
 0x4c1   :  { %6786 = vrcp.f32 %v723_v28 }
 0x4c2   :  { %v6781_v29 = vpop.eup %6780 }
 0x4c3   :  { %v732_v32 = vmul.f32 %v6781_v29, %v6773_v3  ;;  %v915_v38 = vpop.permute.xlu1 %914 }
 0x4c4   :  { %v6783_v30 = vpop.eup %6782  ;;  %v913_v33 = vpop.permute.xlu0 %912 }
 0x4c5   :  { %v731_v31 = vmul.f32 %v6783_v30, %v6775_v6 }
 0x4c7   :  { %5990 = vmatprep.mubr.msk.f32.mxu0 %vm689_vm9, %v731_v31  ;;  %v1006_v40 = vpop.permute.xlu1 %1005 }
 0x4c8   :  { %5991 = vmatmul.mubr.msk.f32.vlgmr.msra.gmra.mrb[8].mxu0 %vm689_vm9, %v732_v32  ;;  %v1004_v39 = vpop.permute.xlu0 %1003 }
 0x4c9   :  { %6366 = vmatpush3.bf16.xpose.msk.msra.mxu0 %vm7192_vm4, %v6361_v13  ;;  %6004 = vmatprep.mubr.msk.f32.mxu0 %vm447_vm3, %v913_v33 }
 0x4ca   :  { %v6785_v34 = vpop.eup %6784 }
 0x4cb   :  { %v6787_v35 = vpop.eup %6786  ;;  %v734_v37 = vmul.f32 %v6785_v34, %v6777_v18 }
 0x4cc   :  { %v733_v36 = vmul.f32 %v6787_v35, %v6779_v20 }
 0x4ce   :  { %5997 = vmatprep.mubr.msk.f32.mxu1 %vm689_vm9, %v733_v36 }
 0x4cf   :  { %5998 = vmatmul.mubr.msk.f32.vlgmr.msra.gmra.mrb[2].mxu1 %vm689_vm9, %v734_v37 }
 0x4d0   :  { %6372 = vmatpush3.bf16.xpose.msk.msra.mxu1 %vm7192_vm4, %v6367_v19  ;;  %6005 = vmatmul.mubr.msk.f32.vlgmr.msra.gmra.mrb[10].mxu0 %vm447_vm3, %v915_v38 }
 0x4d1   :  { %6011 = vmatprep.mubr.msk.f32.mxu1 %vm447_vm3, %v1004_v39 }
 0x4d7   :  { %6012 = vmatmul.mubr.msk.f32.vlgmr.msra.gmra.mrb[4].mxu1 %vm447_vm3, %v1006_v40 }
 0x59b   :  { %v7280_v41 = vpop.f32.mrb[8].mxu0 }
 0x59c   :  { %v7282_v42 = vpop.f32.mrb[9].mxu0 }
 0x5a2   :  { %v7284_v44 = vpop.f32.mrb[2].mxu1 }
 0x5a3   :  { %v7286_v47 = vpop.f32.mrb[3].mxu1  ;;  %v6006_v48 = vpop.f32.mrb[10].mxu0 }
 0x5a4   :  { %v1095_v50 = vmul.f32 0.35355338, %v6006_v48  ;;  %v994_v52 = vpop.f32.mrb[11].mxu0 }
 0x5a5   :  { %v1094_v53 = vmul.f32 0.35355338, %v994_v52 }
 0x5a6   :  { %v1099_v54 = vsel %vm100_vm7, -1e+09, %v1095_v50 }
 0x5a7   :  { %v1105_v58 = vsel %vm693_vm8, %v1099_v54, -inf  ;;  %v1098_v59 = vsel %vm100_vm7, -1e+09, %v1094_v53 }
 0x5a8   :  { %1106 = vmax.xlane.f32.xlu1 %v1105_v58  ;;  %v1102_v60 = vsel %vm689_vm9, %v1098_v59, -inf }
 0x5a9   :  { %1103 = vmax.xlane.f32.xlu0 %v1102_v60 }
 0x5aa   :  { %v6013_v61 = vpop.f32.mrb[4].mxu1 }
 0x5ab   :  { %v1085_v1 = vpop.f32.mrb[5].mxu1  ;;  %v1097_v3 = vmul.f32 0.35355338, %v6013_v61 }
 0x5ac   :  { %v1096_v5 = vmul.f32 0.35355338, %v1085_v1 }
 0x5ad   :  { %v1101_v8 = vsel %vm101_vm10, -1e+09, %v1097_v3 }
 0x5ae   :  { %v1100_v6 = vsel %vm101_vm10, -1e+09, %v1096_v5  ;;  %v1111_v9 = vsel %vm693_vm8, %v1101_v8, -inf }
 0x5af   :  { %v1108_v7 = vsel %vm689_vm9, %v1100_v6, -inf }
 0x5b0   :  { %1109 = vmax.xlane.f32.xlu0 %v1108_v7 }
 0x5b4   :  { %1112 = vmax.xlane.f32.xlu0 %v1111_v9 }
 0x5b9   :  { %6642 = vrot.lane.b32.xlu1 %v7186_v0, %s6991_s22 }
 0x5bd   :  { %6647 = vrot.lane.b32.xlu1 %v7170_v55, %s6992_s23 }
 0x5c1   :  { %6652 = vrot.lane.b32.xlu1 %v7186_v0, %s6992_s23 }
 0x5ca   :  { %6637 = vrot.lane.b32.xlu0 %v7170_v55, %s6991_s22 }
 0x635   :  { %v1107_v10 = vpop.xlane.xlu1 %1106 }
 0x636   :  { %v1115_v11 = vsub.f32 %v1099_v54, %v1107_v10  ;;  %v1104_v12 = vpop.xlane.xlu0 %1103 }
 0x637   :  { %v1114_v13 = vsub.f32 %v1098_v59, %v1104_v12 }
 0x638   :  { %v1120_v14 = vmul.f32 1.442695, %v1115_v11 }
 0x639   :  { %v1118_v15 = vmul.f32 1.442695, %v1114_v13  ;;  %v6643_v16 = vpop.permute.xlu1 %6642 }
 0x63a   :  { %6788 = vpow2.f32 %v1120_v14  ;;  %v6645_v18 = vunpack.i.h.bf16 %v6643_v16  ;;  %v6644_v19 = vunpack.i.l.bf16 %v6643_v16 }
 0x63b   :  { %6790 = vpow2.f32 %v1118_v15 }
 0x63c   :  { %v6379_v20 = vpack.c.bf16 %v6645_v18, %v6644_v19 }
 0x63d   :  { %v1110_v21 = vpop.xlane.xlu0 %1109  ;;  %v6648_v22 = vpop.permute.xlu1 %6647 }
 0x63e   :  { %v1116_v23 = vsub.f32 %v1100_v6, %v1110_v21  ;;  %6381 = vmatprep.subr.msk.bf16.mxu1 %vm7240_vm13, %v6379_v20  ;;  %v6650_v36 = vunpack.i.h.bf16 %v6648_v22  ;;  %v6649_v37 = vunpack.i.l.bf16 %v6648_v22 }
 0x63f   :  { %6384 = vmatpush3.bf16.msk.msra.mxu1 %vm7240_vm13, %v6379_v20 }
 0x640   :  { %v1122_v56 = vmul.f32 1.442695, %v1116_v23  ;;  %v6385_v53 = vpack.c.bf16 %v6650_v36, %v6649_v37 }
 0x641   :  { %v1113_v25 = vpop.xlane.xlu0 %1112  ;;  %v6653_v28 = vpop.permute.xlu1 %6652 }
 0x642   :  { %6792 = vpow2.f32 %v1122_v56  ;;  %v1117_v29 = vsub.f32 %v1101_v8, %v1113_v25  ;;  %v6655_v30 = vunpack.i.h.bf16 %v6653_v28  ;;  %v6654_v31 = vunpack.i.l.bf16 %v6653_v28 }
 0x644   :  { %v6789_v32 = vpop.eup %6788  ;;  %v1124_v33 = vmul.f32 1.442695, %v1117_v29  ;;  %v6391_v34 = vpack.c.bf16 %v6655_v30, %v6654_v31 }
 0x645   :  { %v6791_v35 = vpop.eup %6790  ;;  %v6638_v38 = vpop.permute.xlu0 %6637  ;;  %v1129_v39 = vsel %vm693_vm8, %v6789_v32, 0.0 }
 0x646   :  { %6794 = vpow2.f32 %v1124_v33  ;;  %v6640_v40 = vunpack.i.h.bf16 %v6638_v38  ;;  %v6639_v48 = vunpack.i.l.bf16 %v6638_v38  ;;  %1130 = vadd.xlane.f32.xlu1 %v1129_v39  ;;  %6393 = vmatprep.subr.msk.bf16.mxu1 %vm7192_vm4, %v6391_v34  ;;  %v1126_v50 = vsel %vm689_vm9, %v6791_v35, 0.0 }
 0x647   :  { %1127 = vadd.xlane.f32.xlu0 %v1126_v50 }
 0x648   :  { %v6373_v52 = vpack.c.bf16 %v6640_v40, %v6639_v48 }
 0x64a   :  { %6375 = vmatprep.subr.msk.bf16.mxu0 %vm7240_vm13, %v6373_v52 }
 0x64b   :  { %6378 = vmatpush3.bf16.msk.msra.mxu0 %vm7240_vm13, %v6373_v52 }
 0x64c   :  { %v6793_v54 = vpop.eup %6792  ;;  %6387 = vmatprep.subr.msk.bf16.mxu0 %vm7192_vm4, %v6385_v53 }
 0x64d   :  { %v1132_v58 = vsel %vm689_vm9, %v6793_v54, 0.0 }
 0x64e   :  { %1133 = vadd.xlane.f32.xlu0 %v1132_v58 }
 0x650   :  { %v6795_v59 = vpop.eup %6794 }
 0x651   :  { %v1135_v60 = vsel %vm693_vm8, %v6795_v59, 0.0 }
 0x652   :  { %1136 = vadd.xlane.f32.xlu1 %v1135_v60 }
 0x663   :  { %1324 = vrot.lane.b32.xlu1 %v7157_v43, %s6993_s24 }
 0x664   :  { %1322 = vrot.lane.b32.xlu0 %v7160_v46, %s6993_s24 }
 0x667   :  { %1415 = vrot.lane.b32.xlu1 %v7180_v63, %s6993_s24 }
 0x668   :  { %1413 = vrot.lane.b32.xlu0 %v7177_v62, %s6993_s24 }
 0x6d3   :  { %v1131_v61 = vpop.xlane.xlu1 %1130 }
 0x6d4   :  { %6796 = vrcp.f32 %v1131_v61  ;;  %v1128_v1 = vpop.xlane.xlu0 %1127 }
 0x6d5   :  { %6798 = vrcp.f32 %v1128_v1 }
 0x6db   :  { %v1134_v3 = vpop.xlane.xlu0 %1133 }
 0x6dc   :  { %6800 = vrcp.f32 %v1134_v3 }
 0x6de   :  { %v6797_v5 = vpop.eup %6796 }
 0x6df   :  { %v6799_v6 = vpop.eup %6798  ;;  %v1137_v7 = vpop.xlane.xlu1 %1136  ;;  %v1143_v9 = vmul.f32 %v6797_v5, %v6789_v32 }
 0x6e0   :  { %6802 = vrcp.f32 %v1137_v7  ;;  %v1142_v8 = vmul.f32 %v6799_v6, %v6791_v35  ;;  %v1323_v10 = vpop.permute.xlu0 %1322 }
 0x6e2   :  { %6018 = vmatprep.mubr.msk.f32.mxu0 %vm689_vm9, %v1142_v8 }
 0x6e3   :  { %6019 = vmatmul.mubr.msk.f32.vlgmr.msra.gmra.mrb[12].mxu0 %vm689_vm9, %v1143_v9  ;;  %v1325_v14 = vpop.permute.xlu1 %1324 }
 0x6e4   :  { %6390 = vmatpush3.bf16.xpose.msk.msra.mxu0 %vm7192_vm4, %v6385_v53  ;;  %6032 = vmatprep.mubr.msk.f32.mxu0 %vm447_vm3, %v1323_v10  ;;  %v1414_v16 = vpop.permute.xlu0 %1413 }
 0x6e6   :  { %v6801_v11 = vpop.eup %6800 }
 0x6e7   :  { %v1144_v12 = vmul.f32 %v6801_v11, %v6793_v54  ;;  %v1416_v18 = vpop.permute.xlu1 %1415 }
 0x6e9   :  { %6025 = vmatprep.mubr.msk.f32.mxu1 %vm689_vm9, %v1144_v12 }
 0x6ea   :  { %v6803_v13 = vpop.eup %6802 }
 0x6eb   :  { %6033 = vmatmul.mubr.msk.f32.vlgmr.msra.gmra.mrb[14].mxu0 %vm447_vm3, %v1325_v14  ;;  %v1145_v15 = vmul.f32 %v6803_v13, %v6795_v59 }
 0x6ed   :  { %6026 = vmatmul.mubr.msk.f32.vlgmr.msra.gmra.mrb[6].mxu1 %vm689_vm9, %v1145_v15 }
 0x6ee   :  { %6396 = vmatpush3.bf16.xpose.msk.msra.mxu1 %vm7192_vm4, %v6391_v34  ;;  %6039 = vmatprep.mubr.msk.f32.mxu1 %vm447_vm3, %v1414_v16 }
 0x6f5   :  { %6040 = vmatmul.mubr.msk.f32.vlgmr.msra.gmra.mrb[8].mxu1 %vm447_vm3, %v1416_v18 }
 0x7b6   :  { %v7344_v19 = vpop.f32.mrb[12].mxu0 }
 0x7b7   :  { %v7346_v20 = vpop.f32.mrb[13].mxu0 }
 0x7be   :  { %v6034_v21 = vpop.f32.mrb[14].mxu0 }
 0x7bf   :  { %v1505_v22 = vmul.f32 0.35355338, %v6034_v21  ;;  %v1404_v23 = vpop.f32.mrb[15].mxu0 }
 0x7c0   :  { %v1504_v56 = vmul.f32 0.35355338, %v1404_v23  ;;  %v7348_v25 = vpop.f32.mrb[6].mxu1 }
 0x7c1   :  { %v7350_v28 = vpop.f32.mrb[7].mxu1  ;;  %v1509_v29 = vsel %vm100_vm7, -1e+09, %v1505_v22 }
 0x7c2   :  { %v1515_v30 = vsel %vm693_vm8, %v1509_v29, -inf  ;;  %v1508_v31 = vsel %vm100_vm7, -1e+09, %v1504_v56 }
 0x7c3   :  { %1516 = vmax.xlane.f32.xlu1 %v1515_v30  ;;  %v1512_v32 = vsel %vm689_vm9, %v1508_v31, -inf }
 0x7c4   :  { %1513 = vmax.xlane.f32.xlu0 %v1512_v32 }
 0x7c8   :  { %v6041_v33 = vpop.f32.mrb[8].mxu1 }
 0x7c9   :  { %v1495_v34 = vpop.f32.mrb[9].mxu1  ;;  %v1507_v35 = vmul.f32 0.35355338, %v6041_v33 }
 0x7ca   :  { %v1506_v36 = vmul.f32 0.35355338, %v1495_v34 }
 0x7cb   :  { %v1511_v39 = vsel %vm101_vm10, -1e+09, %v1507_v35 }
 0x7cc   :  { %v1510_v37 = vsel %vm101_vm10, -1e+09, %v1506_v36  ;;  %v1521_v40 = vsel %vm693_vm8, %v1511_v39, -inf }
 0x7cd   :  { %v1518_v38 = vsel %vm689_vm9, %v1510_v37, -inf }
 0x7ce   :  { %1519 = vmax.xlane.f32.xlu0 %v1518_v38 }
 0x7d2   :  { %1522 = vmax.xlane.f32.xlu0 %v1521_v40 }
 0x7d4   :  { %6662 = vrot.lane.b32.xlu1 %v7186_v0, %s6994_s25 }
 0x7d8   :  { %6667 = vrot.lane.b32.xlu1 %v7170_v55, %s8178_s26 }
 0x7dc   :  { %6672 = vrot.lane.b32.xlu1 %v7186_v0, %s8178_s26  ;;  %s5565_s26 = sshll.u32 %s7000_s18, 4  ;;  %s5566_s26 = int_to_ptr.vmem [resolvable:$true] %s5565_s26 }
 0x7dd   :  { %p6957_p9 = scmp.lt.s32.totalorder %s5566_s26, %s5566_s26 }
 0x7e8   :  { %6657 = vrot.lane.b32.xlu0 %v7170_v55, %s6994_s25 }
 0x850   :  { %v1517_v48 = vpop.xlane.xlu1 %1516 }
 0x851   :  { %v1525_v50 = vsub.f32 %v1509_v29, %v1517_v48  ;;  %v1514_v52 = vpop.xlane.xlu0 %1513 }
 0x852   :  { %v1524_v53 = vsub.f32 %v1508_v31, %v1514_v52 }
 0x853   :  { %v1530_v54 = vmul.f32 1.442695, %v1525_v50 }
 0x854   :  { %v1528_v58 = vmul.f32 1.442695, %v1524_v53  ;;  %v6663_v59 = vpop.permute.xlu1 %6662 }
 0x855   :  { %6804 = vpow2.f32 %v1530_v54  ;;  %v6665_v60 = vunpack.i.h.bf16 %v6663_v59  ;;  %v6664_v61 = vunpack.i.l.bf16 %v6663_v59 }
 0x856   :  { %6806 = vpow2.f32 %v1528_v58 }
 0x857   :  { %v6403_v1 = vpack.c.bf16 %v6665_v60, %v6664_v61 }
 0x858   :  { %v6668_v3 = vpop.permute.xlu1 %6667 }
 0x859   :  { %6405 = vmatprep.subr.msk.bf16.mxu1 %vm7240_vm13, %v6403_v1  ;;  %v6670_v22 = vunpack.i.h.bf16 %v6668_v3  ;;  %v6669_v56 = vunpack.i.l.bf16 %v6668_v3 }
 0x85a   :  { %6408 = vmatpush3.bf16.msk.msra.mxu1 %vm7240_vm13, %v6403_v1 }
 0x85b   :  { %v1520_v5 = vpop.xlane.xlu0 %1519  ;;  %v6409_v32 = vpack.c.bf16 %v6670_v22, %v6669_v56 }
 0x85c   :  { %v1526_v6 = vsub.f32 %v1510_v37, %v1520_v5  ;;  %v6673_v7 = vpop.permute.xlu1 %6672 }
 0x85d   :  { %v6675_v8 = vunpack.i.h.bf16 %v6673_v7  ;;  %v6674_v9 = vunpack.i.l.bf16 %v6673_v7 }
 0x85e   :  { %v1532_v10 = vmul.f32 1.442695, %v1526_v6 }
 0x85f   :  { %v6805_v11 = vpop.eup %6804  ;;  %v6415_v12 = vpack.c.bf16 %v6675_v8, %v6674_v9  ;;  %v1523_v13 = vpop.xlane.xlu0 %1522 }
 0x860   :  { %v6807_v14 = vpop.eup %6806  ;;  %6808 = vpow2.f32 %v1532_v10  ;;  %v1527_v15 = vsub.f32 %v1511_v39, %v1523_v13  ;;  %v1539_v16 = vsel %vm693_vm8, %v6805_v11, 0.0 }
 0x861   :  { %1540 = vadd.xlane.f32.xlu1 %v1539_v16  ;;  %6417 = vmatprep.subr.msk.bf16.mxu1 %vm7192_vm4, %v6415_v12  ;;  %v1536_v18 = vsel %vm689_vm9, %v6807_v14, 0.0 }
 0x862   :  { %v1534_v21 = vmul.f32 1.442695, %v1527_v15  ;;  %1537 = vadd.xlane.f32.xlu0 %v1536_v18 }
 0x863   :  { %v6658_v23 = vpop.permute.xlu0 %6657 }
 0x864   :  { %6810 = vpow2.f32 %v1534_v21  ;;  %v6660_v29 = vunpack.i.h.bf16 %v6658_v23  ;;  %v6659_v30 = vunpack.i.l.bf16 %v6658_v23 }
 0x866   :  { %v6397_v31 = vpack.c.bf16 %v6660_v29, %v6659_v30 }
 0x868   :  { %6399 = vmatprep.subr.msk.bf16.mxu0 %vm7240_vm13, %v6397_v31 }
 0x869   :  { %6402 = vmatpush3.bf16.msk.msra.mxu0 %vm7240_vm13, %v6397_v31 }
 0x86a   :  { %v6809_v33 = vpop.eup %6808  ;;  %6411 = vmatprep.subr.msk.bf16.mxu0 %vm7192_vm4, %v6409_v32 }
 0x86b   :  { %v1542_v34 = vsel %vm689_vm9, %v6809_v33, 0.0 }
 0x86c   :  { %1543 = vadd.xlane.f32.xlu0 %v1542_v34 }
 0x86e   :  { %v6811_v35 = vpop.eup %6810 }
 0x86f   :  { %v1545_v36 = vsel %vm693_vm8, %v6811_v35, 0.0 }
 0x870   :  { %1546 = vadd.xlane.f32.xlu1 %v1545_v36 }
 0x881   :  { %1734 = vrot.lane.b32.xlu1 %v7157_v43, %s8176_s27 }
 0x882   :  { %1732 = vrot.lane.b32.xlu0 %v7160_v46, %s8176_s27 }
 0x885   :  { %1825 = vrot.lane.b32.xlu1 %v7180_v63, %s8176_s27 }
 0x886   :  { %1823 = vrot.lane.b32.xlu0 %v7177_v62, %s8176_s27 }
 0x8ee   :  { %v1541_v37 = vpop.xlane.xlu1 %1540 }
 0x8ef   :  { %6812 = vrcp.f32 %v1541_v37  ;;  %v1538_v38 = vpop.xlane.xlu0 %1537 }
 0x8f0   :  { %6814 = vrcp.f32 %v1538_v38 }
 0x8f9   :  { %v6813_v39 = vpop.eup %6812  ;;  %v1544_v40 = vpop.xlane.xlu0 %1543 }
 0x8fa   :  { %v6815_v48 = vpop.eup %6814  ;;  %6816 = vrcp.f32 %v1544_v40  ;;  %v1553_v52 = vmul.f32 %v6813_v39, %v6805_v11 }
 0x8fb   :  { %v1552_v50 = vmul.f32 %v6815_v48, %v6807_v14 }
 0x8fd   :  { %v1547_v43 = vpop.xlane.xlu1 %1546  ;;  %6046 = vmatprep.mubr.msk.f32.mxu0 %vm689_vm9, %v1552_v50  ;;  %v1733_v46 = vpop.permute.xlu0 %1732 }
 0x8fe   :  { %6818 = vrcp.f32 %v1547_v43  ;;  %6047 = vmatmul.mubr.msk.f32.vlgmr.msra.gmra.mrb[16].mxu0 %vm689_vm9, %v1553_v52 }
 0x8ff   :  { %6414 = vmatpush3.bf16.xpose.msk.msra.mxu0 %vm7192_vm4, %v6409_v32  ;;  %6060 = vmatprep.mubr.msk.f32.mxu0 %vm447_vm3, %v1733_v46 }
 0x901   :  { %v1735_v63 = vpop.permute.xlu1 %1734  ;;  %v1824_v59 = vpop.permute.xlu0 %1823 }
 0x904   :  { %v6817_v62 = vpop.eup %6816 }
 0x905   :  { %v1554_v53 = vmul.f32 %v6817_v62, %v6809_v33  ;;  %v1826_v60 = vpop.permute.xlu1 %1825 }
 0x906   :  { %6061 = vmatmul.mubr.msk.f32.vlgmr.msra.gmra.mrb[18].mxu0 %vm447_vm3, %v1735_v63 }
 0x907   :  { %6053 = vmatprep.mubr.msk.f32.mxu1 %vm689_vm9, %v1554_v53 }
 0x908   :  { %v6819_v54 = vpop.eup %6818 }
 0x909   :  { %v1555_v58 = vmul.f32 %v6819_v54, %v6811_v35 }
 0x90b   :  { %6054 = vmatmul.mubr.msk.f32.vlgmr.msra.gmra.mrb[10].mxu1 %vm689_vm9, %v1555_v58 }
 0x90c   :  { %6420 = vmatpush3.bf16.xpose.msk.msra.mxu1 %vm7192_vm4, %v6415_v12  ;;  %6067 = vmatprep.mubr.msk.f32.mxu1 %vm447_vm3, %v1824_v59 }
 0x913   :  { %6068 = vmatmul.mubr.msk.f32.vlgmr.msra.gmra.mrb[12].mxu1 %vm447_vm3, %v1826_v60 }
 0x9d1   :  { %v7408_v61 = vpop.f32.mrb[16].mxu0 }
 0x9d2   :  { %v1635_v1 = vpop.f32.mrb[17].mxu0 }
 0x9d9   :  { %v6062_v3 = vpop.f32.mrb[18].mxu0 }
 0x9da   :  { %v1915_v5 = vmul.f32 0.35355338, %v6062_v3  ;;  %v1814_v6 = vpop.f32.mrb[19].mxu0 }
 0x9db   :  { %v1914_v7 = vmul.f32 0.35355338, %v1814_v6 }
 0x9dc   :  { %v1919_v8 = vsel %vm100_vm7, -1e+09, %v1915_v5 }
 0x9dd   :  { %v1925_v9 = vsel %vm693_vm8, %v1919_v8, -inf  ;;  %v1918_v10 = vsel %vm100_vm7, -1e+09, %v1914_v7 }
 0x9de   :  { %v7415_v11 = vpop.f32.mrb[10].mxu1  ;;  %1926 = vmax.xlane.f32.xlu1 %v1925_v9  ;;  %v1922_v12 = vsel %vm689_vm9, %v1918_v10, -inf }
 0x9df   :  { %v1723_v13 = vpop.f32.mrb[11].mxu1  ;;  %1923 = vmax.xlane.f32.xlu0 %v1922_v12 }
 0x9e6   :  { %v6069_v14 = vpop.f32.mrb[12].mxu1 }
 0x9e7   :  { %v1905_v15 = vpop.f32.mrb[13].mxu1  ;;  %v1917_v16 = vmul.f32 0.35355338, %v6069_v14 }
 0x9e8   :  { %v1916_v18 = vmul.f32 0.35355338, %v1905_v15 }
 0x9e9   :  { %v1921_v23 = vsel %vm101_vm10, -1e+09, %v1917_v16 }
 0x9ea   :  { %v1920_v21 = vsel %vm101_vm10, -1e+09, %v1916_v18  ;;  %v1931_v56 = vsel %vm693_vm8, %v1921_v23, -inf }
 0x9eb   :  { %v1928_v22 = vsel %vm689_vm9, %v1920_v21, -inf }
 0x9ec   :  { %1929 = vmax.xlane.f32.xlu0 %v1928_v22  ;;  %v2335_v22 = vld [vmem:[%s8164_s5 + $0x8] sm:$0xff] }
 0x9f0   :  { %1932 = vmax.xlane.f32.xlu0 %v1931_v56 }
 0xa6b   :  { %v1927_v29 = vpop.xlane.xlu1 %1926 }
 0xa6c   :  { %v1935_v30 = vsub.f32 %v1919_v8, %v1927_v29  ;;  %v1924_v31 = vpop.xlane.xlu0 %1923  ;;  %v2336_v29 = vld [vmem:[%s8164_s5 + $0x10] sm:$0xff] }
 0xa6d   :  { %v1934_v32 = vsub.f32 %v1918_v10, %v1924_v31 }
 0xa6e   :  { %v1940_v33 = vmul.f32 1.442695, %v1935_v30  ;;  %v2337_v30 = vld [vmem:[%s8164_s5 + $0x18] sm:$0xff] }
 0xa6f   :  { %v1938_v34 = vmul.f32 1.442695, %v1934_v32  ;;  %v6437_v32 = vpack.c.bf16 %v2337_v30, %v2336_v29 }
 0xa70   :  { %6820 = vpow2.f32 %v1940_v33 }
 0xa71   :  { %6822 = vpow2.f32 %v1938_v34 }
 0xa79   :  { %v1930_v35 = vpop.xlane.xlu0 %1929 }
 0xa7a   :  { %v6821_v36 = vpop.eup %6820  ;;  %v1936_v37 = vsub.f32 %v1920_v21, %v1930_v35  ;;  %v2334_v21 = vld [vmem:[%s8164_s5] sm:$0xff] }
 0xa7b   :  { %v6823_v38 = vpop.eup %6822  ;;  %v1949_v39 = vsel %vm693_vm8, %v6821_v36, 0.0 }
 0xa7c   :  { %v1942_v40 = vmul.f32 1.442695, %v1936_v37  ;;  %1950 = vadd.xlane.f32.xlu1 %v1949_v39  ;;  %v1946_v48 = vsel %vm689_vm9, %v6823_v38, 0.0 }
 0xa7d   :  { %v1933_v50 = vpop.xlane.xlu0 %1932  ;;  %1947 = vadd.xlane.f32.xlu0 %v1946_v48 }
 0xa7e   :  { %6824 = vpow2.f32 %v1942_v40  ;;  %v1937_v52 = vsub.f32 %v1921_v23, %v1933_v50  ;;  %v6434_v23 = vpack.c.bf16 %v2335_v22, %v2334_v21 }
 0xa80   :  { %v1944_v43 = vmul.f32 1.442695, %v1937_v52 }
 0xa82   :  { %6826 = vpow2.f32 %v1944_v43 }
 0xa88   :  { %v6825_v46 = vpop.eup %6824 }
 0xa89   :  { %v1952_v62 = vsel %vm689_vm9, %v6825_v46, 0.0 }
 0xa8a   :  { %1953 = vadd.xlane.f32.xlu0 %v1952_v62 }
 0xa8c   :  { %v6827_v63 = vpop.eup %6826 }
 0xa8d   :  { %v1955_v53 = vsel %vm693_vm8, %v6827_v63, 0.0 }
 0xa8e   :  { %1956 = vadd.xlane.f32.xlu1 %v1955_v53 }
 0xa9f   :  { %6682 = vrot.lane.b32.xlu1 %v7186_v0, %s8174_s28 }
 0xaa0   :  { %6677 = vrot.lane.b32.xlu0 %v7170_v55, %s8174_s28 }
 0xaa3   :  { %2146 = vrot.lane.b32.xlu1 %v7346_v20, %s6980_s19 }
 0xaa4   :  { %2166 = vrot.lane.b32.xlu0 %v1723_v13, %s6998_s29 }
 0xaa7   :  { %2162 = vrot.lane.b32.xlu1 %v1635_v1, %s6998_s29 }
 0xaab   :  { %2150 = vrot.lane.b32.xlu1 %v7350_v28, %s6980_s19 }
 0xb09   :  { %v1951_v58 = vpop.xlane.xlu1 %1950 }
 0xb0a   :  { %v1948_v54 = vpop.xlane.xlu0 %1947 }
 0xb0b   :  { %6828 = vrcp.f32 %v1948_v54 }
 0xb0c   :  { %6830 = vrcp.f32 %v1951_v58 }
 0xb15   :  { %v6829_v59 = vpop.eup %6828 }
 0xb16   :  { %v1962_v0 = vmul.f32 %v6829_v59, %v6823_v38  ;;  %v6831_v1 = vpop.eup %6830 }
 0xb17   :  { %v1954_v60 = vpop.xlane.xlu0 %1953  ;;  %v1963_v12 = vmul.f32 %v6831_v1, %v6821_v36 }
 0xb18   :  { %6832 = vrcp.f32 %v1954_v60  ;;  %6074 = vmatprep.mubr.msk.f32.mxu0 %vm689_vm9, %v1962_v0 }
 0xb1b   :  { %v1957_v55 = vpop.xlane.xlu1 %1956  ;;  %v6678_v20 = vpop.permute.xlu0 %6677 }
 0xb1c   :  { %6834 = vrcp.f32 %v1957_v55  ;;  %v6680_v3 = vunpack.i.h.bf16 %v6678_v20  ;;  %v6679_v5 = vunpack.i.l.bf16 %v6678_v20 }
 0xb1e   :  { %v6421_v6 = vpack.c.bf16 %v6680_v3, %v6679_v5 }
 0xb1f   :  { %v6683_v7 = vpop.permute.xlu1 %6682  ;;  %v2167_v34 = vpop.permute.xlu0 %2166 }
 0xb20   :  { %v6685_v8 = vunpack.i.h.bf16 %v6683_v7  ;;  %v6684_v28 = vunpack.i.l.bf16 %v6683_v7  ;;  %6423 = vmatprep.subr.msk.bf16.mxu0 %vm7240_vm13, %v6421_v6 }
 0xb21   :  { %6426 = vmatpush3.bf16.msk.msra.mxu0 %vm7240_vm13, %v6421_v6 }
 0xb22   :  { %v6833_v9 = vpop.eup %6832  ;;  %v6427_v10 = vpack.c.bf16 %v6685_v8, %v6684_v28  ;;  %6433 = vmatprep.subr.bf16.mxu0 %v6981_v24 }
 0xb23   :  { %v1964_v13 = vmul.f32 %v6833_v9, %v6825_v46 }
 0xb24   :  { %6075 = vmatmul.mubr.msk.f32.vlgmr.msra.gmra.mrb[20].mxu0 %vm689_vm9, %v1963_v12  ;;  %6429 = vmatprep.subr.msk.bf16.mxu1 %vm7240_vm13, %v6427_v10 }
 0xb25   :  { %6432 = vmatpush3.bf16.msk.msra.mxu1 %vm7240_vm13, %v6427_v10  ;;  %6081 = vmatprep.mubr.msk.f32.mxu1 %vm689_vm9, %v1964_v13 }
 0xb26   :  { %v6835_v14 = vpop.eup %6834  ;;  %6092 = vmatprep.mubr.msk.f32.mxu0 %vm6982_vm2, %v6983_v27  ;;  %6439 = vmatprep.subr.bf16.mxu1 %v6981_v24 }
 0xb27   :  { %v1965_v15 = vmul.f32 %v6835_v14, %v6827_v63  ;;  %6435 = vmatpush3.bf16.msra.mxu0 %v6434_v23 }
 0xb28   :  { %6436 = vmatprep.subr.bf16.mxu0 %v6981_v24 }
 0xb29   :  { %6082 = vmatmul.mubr.msk.f32.vlgmr.msra.gmra.mrb[14].mxu1 %vm689_vm9, %v1965_v15 }
 0xb2a   :  { %6109 = vmatprep.mubr.msk.f32.mxu1 %vm6982_vm2, %v6983_v27 }
 0xb2b   :  { %6438 = vmatpush3.bf16.msra.mxu0 %v6437_v32 }
 0xb2c   :  { %6445 = vmatprep.subr.bf16.mxu0 %v6981_v24 }
 0xbf7   :  { %v6076_v16 = vpop.f32.mrb[20].mxu0 }
 0xbf8   :  { %v2045_v18 = vpop.f32.mrb[21].mxu0 }
 0xbf9   :  { %2178 = vrot.lane.b32.xlu0 %v2045_v18, %s6999_s20 }
 0xbfc   :  { %v6083_v56 = vpop.f32.mrb[14].mxu1 }
 0xbfd   :  { %v2133_v31 = vpop.f32.mrb[15].mxu1  ;;  %2148 = vrot.lane.b32.xlu0 %v7344_v19, %s6980_s19  ;;  %v2147_v19 = vpop.permute.xlu1 %2146 }
 0xbfe   :  { %2182 = vrot.lane.b32.xlu1 %v2133_v31, %s6999_s20  ;;  %v2190_v35 = vsel %vm447_vm3, %v7282_v42, %v2147_v19 }
 0xc01   :  { %2180 = vrot.lane.b32.xlu0 %v6076_v16, %s6999_s20  ;;  %v2163_v33 = vpop.permute.xlu1 %2162 }
 0xc02   :  { %2164 = vrot.lane.b32.xlu1 %v7408_v61, %s6998_s29  ;;  %v2195_v37 = vsel %vm2194_vm14, %v2190_v35, %v2163_v33 }
 0xc05   :  { %2168 = vrot.lane.b32.xlu0 %v7415_v11, %s6998_s29  ;;  %v2151_v36 = vpop.permute.xlu1 %2150 }
 0xc06   :  { %2152 = vrot.lane.b32.xlu1 %v7348_v25, %s6980_s19  ;;  %v2192_v11 = vsel %vm447_vm3, %v7286_v47, %v2151_v36 }
 0xc07   :  { %v2197_v43 = vsel %vm2194_vm14, %v2192_v11, %v2167_v34 }
 0xc0a   :  { %2184 = vrot.lane.b32.xlu1 %v6083_v56, %s6999_s20 }
 0xc6b   :  { %v2179_v61 = vpop.permute.xlu0 %2178 }
 0xc6c   :  { %v2200_v38 = vsel %vm2199_vm15, %v2195_v37, %v2179_v61 }
 0xc6d   :  { %v2208_v25 = vcombine.high %v2200_v38, %v2200_v38  ;;  %v2215_v39 = vrot.slane %v2200_v38, %v7133_v57 }
 0xc6f   :  { %v2222_v40 = vrot.slane %v2208_v25, %v7133_v57  ;;  %v2223_v48 = vcombine.high %v2215_v39, %v2215_v39  ;;  %v2149_v50 = vpop.permute.xlu0 %2148  ;;  %v2231_v46 = vrot.slane %v2215_v39, %v7133_v57 }
 0xc70   :  { %v2183_v52 = vpop.permute.xlu1 %2182  ;;  %v2191_v60 = vsel %vm447_vm3, %v7280_v41, %v2149_v50 }
 0xc71   :  { %v2224_v42 = vcombine.high %v2222_v40, %v2222_v40  ;;  %v2245_v62 = vrot.slane %v2223_v48, %v7133_v57  ;;  %v2202_v63 = vsel %vm2199_vm15, %v2197_v43, %v2183_v52  ;;  %v2238_v54 = vrot.slane %v2222_v40, %v7133_v57 }
 0xc72   :  { %v2271_v53 = vcombine.high %v2202_v63, %v2202_v63  ;;  %v2278_v47 = vrot.slane %v2202_v63, %v7133_v57 }
 0xc73   :  { %v2252_v58 = vrot.slane %v2224_v42, %v7133_v57  ;;  %v2345_v59 = vcombine.low %v2231_v46, %v2245_v62  ;;  %v5642_v0 = vcombine.high %v2231_v46, %v2245_v62  ;;  %v2181_v28 = vpop.permute.xlu0 %2180 }
 0xc74   :  { %v2285_v55 = vrot.slane %v2271_v53, %v7133_v57  ;;  %v2286_v20 = vcombine.high %v2278_v47, %v2278_v47  ;;  %v2294_v3 = vrot.slane %v2278_v47, %v7133_v57  ;;  %v2165_v5 = vpop.permute.xlu1 %2164 }
 0xc75   :  { %v2347_v6 = vcombine.low %v2238_v54, %v2252_v58  ;;  %v5643_v1 = vcombine.high %v2238_v54, %v2252_v58  ;;  %v2355_v7 = vrot.slane %v2345_v59, %v7133_v57  ;;  %v2362_v8 = vrot.slane %v5642_v0, %v7133_v57  ;;  %v5641_v0 = vld [vmem:[%s8165_s6] ss:$0 sm:$0xff] }
 0xc76   :  { %v2287_v9 = vcombine.high %v2285_v55, %v2285_v55  ;;  %v2301_v10 = vrot.slane %v2285_v55, %v7133_v57  ;;  %v2308_v12 = vrot.slane %v2286_v20, %v7133_v57  ;;  %v2316_v13 = vcombine.high %v2294_v3, %v2294_v3 }
 0xc77   :  { %v2369_v41 = vrot.slane %v2347_v6, %v7133_v57  ;;  %v2376_v14 = vrot.slane %v5643_v1, %v7133_v57  ;;  %v2377_v15 = vcombine.low %v2355_v7, %v2362_v8  ;;  %v2196_v16 = vsel %vm2194_vm14, %v2191_v60, %v2165_v5  ;;  %v2169_v35 = vpop.permute.xlu0 %2168 }
 0xc78   :  { %v2315_v18 = vrot.slane %v2287_v9, %v7133_v57  ;;  %v2317_v21 = vcombine.high %v2301_v10, %v2301_v10  ;;  %v2318_v22 = vcombine.high %v2308_v12, %v2308_v12  ;;  %v2153_v23 = vpop.permute.xlu1 %2152  ;;  %v2201_v29 = vsel %vm2199_vm15, %v2196_v16, %v2181_v28 }
 0xc79   :  { %v2378_v56 = vcombine.low %v2369_v41, %v2376_v14  ;;  %v2193_v30 = vsel %vm447_vm3, %v7284_v44, %v2153_v23  ;;  %v2263_v19 = vrot.slane %v2201_v29, %v7133_v57  ;;  %v2385_v33 = vrot.slane %v2377_v15, %v7133_v57 }
 0xc7a   :  { %v2396_v31 = vcombine.low %v2318_v22, %v2301_v10  ;;  %v2397_v32 = vcombine.low %v2315_v18, %v2317_v21  ;;  %v2395_v34 = vcombine.low %v2308_v12, %v2316_v13  ;;  %v2198_v25 = vsel %vm2194_vm14, %v2193_v30, %v2169_v35  ;;  %v2608_v35 = vld [vmem:[%s8168_s9 + $0x10] sm:$0xff] }
 0xc7b   :  { %v2392_v36 = vrot.slane %v2378_v56, %v7133_v57  ;;  %v2270_v38 = vrot.slane %v2263_v19, %v7133_v57  ;;  %v2319_v42 = vcombine.high %v2315_v18, %v2315_v18  ;;  %v2606_v19 = vld [vmem:[%s8168_s9] sm:$0xff] }
 0xc7c   :  { %v2418_v37 = vrot.slane %v2396_v31, %v7133_v57  ;;  %v2425_v61 = vrot.slane %v2397_v32, %v7133_v57  ;;  %v2185_v11 = vpop.permute.xlu1 %2184  ;;  %v2411_v52 = vrot.slane %v2395_v34, %v7133_v57 }
 0xc7d   :  { %v2203_v44 = vsel %vm2199_vm15, %v2198_v25, %v2185_v11  ;;  %v2393_v39 = vcombine.low %v2385_v33, %v2392_v36  ;;  %v2394_v40 = vcombine.low %v2270_v38, %v2294_v3  ;;  %v2607_v33 = vld [vmem:[%s8168_s9 + $0x8] sm:$0xff]  ;;  %v2609_v36 = vld [vmem:[%s8168_s9 + $0x18] sm:$0xff] }
 0xc7e   :  { %v2326_v48 = vrot.slane %v2203_v44, %v7133_v57  ;;  %v2427_v50 = vcombine.low %v2418_v37, %v2425_v61  ;;  %v6440_v34 = vpack.c.bf16 %v2607_v33, %v2606_v19  ;;  %v6443_v37 = vpack.c.bf16 %v2609_v36, %v2608_v35 }
 0xc7f   :  { %6093 = vmatmul.mubr.msk.f32.vlgmr.msra.gmra.mrb[22].mxu0 %vm104_vm0, %v2393_v39  ;;  %v2404_v43 = vrot.slane %v2394_v40, %v7133_v57 }
 0xc80   :  { %v2333_v46 = vrot.slane %v2326_v48, %v7133_v57  ;;  %6095 = vmatprep.mubr.msk.f32.mxu0 %vm6982_vm2, %v6983_v27  ;;  %v2441_v53 = vrot.slane %v2427_v50, %v7133_v57  ;;  %6441 = vmatpush3.bf16.msra.mxu1 %v6440_v34 }
 0xc81   :  { %v2426_v63 = vcombine.low %v2404_v43, %v2411_v52  ;;  %6442 = vmatprep.subr.bf16.mxu1 %v6981_v24  ;;  %v5647_v52 = vld [vmem:[%s8166_s7] ss:$0 sm:$0xff] }
 0xc82   :  { %v2443_v62 = vcombine.low %v2319_v42, %v2333_v46  ;;  %v5648_v46 = vld [vmem:[%s8167_s8] ss:$0 sm:$0xff] }
 0xc83   :  { %v2434_v54 = vrot.slane %v2426_v63, %v7133_v57 }
 0xc84   :  { %v2450_v47 = vrot.slane %v2443_v62, %v7133_v57  ;;  %6444 = vmatpush3.bf16.msra.mxu1 %v6443_v37 }
 0xc85   :  { %v2442_v58 = vcombine.low %v2434_v54, %v2441_v53  ;;  %6457 = vmatprep.subr.bf16.mxu1 %v6981_v24 }
 0xc86   :  { %v2457_v59 = vrot.slane %v2450_v47, %v7133_v57 }
 0xc87   :  { %6096 = vmatmul.mubr.msk.f32.gmra.mrb[24].mxu0 %vm104_vm0, %v2442_v58 }
 0xc88   :  { %6098 = vmatprep.mubr.msk.f32.mxu0 %vm6982_vm2, %v6983_v27 }
 0xc8b   :  { %6099 = vmatmul.mubr.msk.f32.gmra.mrb[26].mxu0 %vm104_vm0, %v2457_v59 }
 0xc8c   :  { %6134 = vmatprep.mubr.msk.f32.mxu0 %vm6982_vm2, %v6983_v27 }
 0xd52   :  { %v2530_v60 = vpop.f32.mrb[22].mxu0 }
 0xd53   :  { %v2531_v55 = vadd.f32 %v5641_v0, %v2530_v60  ;;  %v6094_v20 = vpop.f32.mrb[23].mxu0 }
 0xd54   :  { %v2721_v20 = vld [vmem:[%s8170_s11] sm:$0xff] }
 0xd55   :  { %v2544_v3 = vadd.f32 %v2531_v55, %v7114_v45 }
 0xd57   :  { %v2549_v5 = vsel %vm104_vm0, %v2544_v3, 0.0 }
 0xd58   :  { %2550 = vadd.xlane.f32.xlu0 %v2549_v5 }
 0xd5a   :  { %v2535_v6 = vpop.f32.mrb[24].mxu0 }
 0xd5b   :  { %v2536_v1 = vadd.f32 %v5641_v0, %v2535_v6  ;;  %v6097_v7 = vpop.f32.mrb[25].mxu0  ;;  %v2723_v6 = vld [vmem:[%s8170_s11 + $0x10] sm:$0xff] }
 0xd5d   :  { %v2545_v8 = vadd.f32 %v2536_v1, %v7120_v49  ;;  %v2724_v1 = vld [vmem:[%s8170_s11 + $0x18] sm:$0xff] }
 0xd5e   :  { %v2540_v28 = vpop.f32.mrb[26].mxu0  ;;  %v6449_v7 = vpack.c.bf16 %v2724_v1, %v2723_v6 }
 0xd5f   :  { %v2541_v9 = vadd.f32 %v5641_v0, %v2540_v28  ;;  %v6100_v10 = vpop.f32.mrb[27].mxu0  ;;  %v2552_v12 = vsel %vm104_vm0, %v2545_v8, 0.0  ;;  %v2726_v28 = vld [vmem:[%s8170_s11 + $0x28] sm:$0xff] }
 0xd60   :  { %2553 = vadd.xlane.f32.xlu1 %v2552_v12  ;;  %v2727_v10 = vld [vmem:[%s8170_s11 + $0x30] sm:$0xff]  ;;  %v2728_v12 = vld [vmem:[%s8170_s11 + $0x38] sm:$0xff] }
 0xd61   :  { %v2546_v13 = vadd.f32 %v2541_v9, %v7126_v51 }
 0xd63   :  { %v2555_v41 = vsel %vm111_vm1, %v2546_v13, 0.0 }
 0xd64   :  { %2556 = vadd.xlane.f32.xlu0 %v2555_v41  ;;  %v5649_v41 = vld [vmem:[%s8169_s10] ss:$0 sm:$0xff] }
 0xde5   :  { %v2551_v45 = vpop.xlane.xlu0 %2550 }
 0xde6   :  { %v2558_v14 = vmul.f32 0.03125, %v2551_v45 }
 0xde8   :  { %v2561_v15 = vsub.f32 %v2544_v3, %v2558_v14  ;;  %v2722_v3 = vld [vmem:[%s8170_s11 + $0x8] sm:$0xff] }
 0xde9   :  { %v6446_v5 = vpack.c.bf16 %v2722_v3, %v2721_v20 }
 0xdea   :  { %v2564_v16 = vmul.f32 %v2561_v15, %v2561_v15 }
 0xdeb   :  { %6447 = vmatpush3.bf16.msra.mxu0 %v6446_v5 }
 0xdec   :  { %v2567_v18 = vsel %vm104_vm0, %v2564_v16, 0.0  ;;  %6448 = vmatprep.subr.bf16.mxu0 %v6981_v24 }
 0xded   :  { %2568 = vadd.xlane.f32.xlu0 %v2567_v18  ;;  %v2554_v21 = vpop.xlane.xlu1 %2553 }
 0xdee   :  { %v2559_v49 = vmul.f32 0.03125, %v2554_v21 }
 0xdef   :  { %6450 = vmatpush3.bf16.msra.mxu0 %v6449_v7 }
 0xdf0   :  { %v2562_v22 = vsub.f32 %v2545_v8, %v2559_v49  ;;  %6451 = vmatprep.subr.bf16.mxu0 %v6981_v24  ;;  %v2725_v8 = vld [vmem:[%s8170_s11 + $0x20] sm:$0xff] }
 0xdf1   :  { %v2557_v23 = vpop.xlane.xlu0 %2556  ;;  %v6452_v9 = vpack.c.bf16 %v2726_v28, %v2725_v8 }
 0xdf2   :  { %v2560_v56 = vmul.f32 0.03125, %v2557_v23  ;;  %v2565_v29 = vmul.f32 %v2562_v22, %v2562_v22 }
 0xdf3   :  { %6453 = vmatpush3.bf16.msra.mxu0 %v6452_v9 }
 0xdf4   :  { %v2563_v30 = vsub.f32 %v2546_v13, %v2560_v56  ;;  %v2570_v31 = vsel %vm104_vm0, %v2565_v29, 0.0  ;;  %6454 = vmatprep.subr.bf16.mxu0 %v6981_v24  ;;  %v6455_v13 = vpack.c.bf16 %v2728_v12, %v2727_v10 }
 0xdf5   :  { %2571 = vadd.xlane.f32.xlu0 %v2570_v31 }
 0xdf6   :  { %v2566_v51 = vmul.f32 %v2563_v30, %v2563_v30 }
 0xdf7   :  { %6456 = vmatpush3.bf16.msra.mxu0 %v6455_v13  ;;  %v5661_v13 = vld [vmem:[%s8163_s4 + $0x20] sm:$0xff] }
 0xdf8   :  { %v2573_v32 = vsel %vm111_vm1, %v2566_v51, 0.0 }
 0xdf9   :  { %2574 = vadd.xlane.f32.xlu1 %v2573_v32 }
 0xe7a   :  { %v2569_v61 = vpop.xlane.xlu0 %2568 }
 0xe7b   :  { %v2576_v38 = vmul.f32 0.03125, %v2569_v61 }
 0xe7d   :  { %v2579_v11 = vadd.f32 1e-05, %v2576_v38 }
 0xe7f   :  { %6836 = vrsqrt.f32 %v2579_v11 }
 0xe82   :  { %v2572_v25 = vpop.xlane.xlu0 %2571 }
 0xe83   :  { %v2577_v44 = vmul.f32 0.03125, %v2572_v25  ;;  %v5653_v25 = vld [vmem:[%s8171_s12] ss:$0 sm:$0xff] }
 0xe85   :  { %v2580_v39 = vadd.f32 1e-05, %v2577_v44 }
 0xe86   :  { %v2575_v40 = vpop.xlane.xlu1 %2574 }
 0xe87   :  { %6838 = vrsqrt.f32 %v2580_v39  ;;  %v2578_v48 = vmul.f32 0.03125, %v2575_v40 }
 0xe89   :  { %v6837_v50 = vpop.eup %6836  ;;  %v2581_v42 = vadd.f32 1e-05, %v2578_v48 }
 0xe8a   :  { %v2585_v43 = vmul.f32 %v6837_v50, %v2561_v15 }
 0xe8b   :  { %6840 = vrsqrt.f32 %v2581_v42 }
 0xe8c   :  { %v2594_v62 = vmul.f32 %v5647_v52, %v2585_v43 }
 0xe8e   :  { %v7569_v63 = vadd.f32 %v5648_v46, %v2594_v62 }
 0xe90   :  { %6110 = vmatmul.mubr.msk.f32.vlgmr.msra.gmra.mrb[16].mxu1 %vm104_vm0, %v7569_v63 }
 0xe91   :  { %6112 = vmatprep.mubr.msk.f32.mxu1 %vm6982_vm2, %v6983_v27  ;;  %v6839_v53 = vpop.eup %6838 }
 0xe92   :  { %v2586_v47 = vmul.f32 %v6839_v53, %v2562_v22 }
 0xe94   :  { %v2595_v54 = vmul.f32 %v5647_v52, %v2586_v47 }
 0xe95   :  { %v6841_v58 = vpop.eup %6840 }
 0xe96   :  { %v7575_v59 = vadd.f32 %v5648_v46, %v2595_v54  ;;  %v2587_v0 = vmul.f32 %v6841_v58, %v2563_v30 }
 0xe98   :  { %6113 = vmatmul.mubr.msk.f32.gmra.mrb[18].mxu1 %vm104_vm0, %v7575_v59  ;;  %v2596_v60 = vmul.f32 %v5647_v52, %v2587_v0 }
 0xe99   :  { %6115 = vmatprep.mubr.msk.f32.mxu1 %vm6982_vm2, %v6983_v27 }
 0xe9a   :  { %v7581_v55 = vadd.f32 %v5648_v46, %v2596_v60 }
 0xe9c   :  { %6116 = vmatmul.mubr.msk.f32.gmra.mrb[20].mxu1 %vm104_vm0, %v7581_v55 }
 0xe9d   :  { %6151 = vmatprep.mubr.msk.f32.mxu1 %vm6982_vm2, %v6983_v27 }
 0xf63   :  { %v2692_v45 = vpop.f32.mrb[16].mxu1 }
 0xf64   :  { %v2693_v14 = vadd.f32 %v5649_v41, %v2692_v45  ;;  %v6111_v15 = vpop.f32.mrb[17].mxu1 }
 0xf65   :  { %v5664_v15 = vld [vmem:[%s8163_s4 + $0x38] sm:$0xff] }
 0xf66   :  { %v2709_v16 = vmul.f32 0.70710677, %v2693_v14  ;;  %v2706_v31 = vmul.f32 0.5, %v2693_v14  ;;  %v5663_v14 = vld [vmem:[%s8163_s4 + $0x30] sm:$0xff] }
 0xf68   :  { %6842 = verf.f32 %v2709_v16  ;;  %v6461_v16 = vpack.c.bf16 %v5664_v15, %v5663_v14 }
 0xf6b   :  { %v2697_v18 = vpop.f32.mrb[18].mxu1 }
 0xf6c   :  { %v2698_v21 = vadd.f32 %v5649_v41, %v2697_v18  ;;  %v6114_v49 = vpop.f32.mrb[19].mxu1 }
 0xf6e   :  { %v2710_v22 = vmul.f32 0.70710677, %v2698_v21  ;;  %v2707_v34 = vmul.f32 0.5, %v2698_v21 }
 0xf6f   :  { %v2702_v23 = vpop.f32.mrb[20].mxu1 }
 0xf70   :  { %6844 = verf.f32 %v2710_v22  ;;  %v2703_v56 = vadd.f32 %v5649_v41, %v2702_v23  ;;  %v6117_v29 = vpop.f32.mrb[21].mxu1  ;;  %v5662_v41 = vld [vmem:[%s8163_s4 + $0x28] sm:$0xff] }
 0xf71   :  { %v6458_v45 = vpack.c.bf16 %v5662_v41, %v5661_v13 }
 0xf72   :  { %v6843_v30 = vpop.eup %6842  ;;  %v2711_v32 = vmul.f32 0.70710677, %v2703_v56  ;;  %v2708_v61 = vmul.f32 0.5, %v2703_v56 }
 0xf73   :  { %v2715_v51 = vadd.f32 1.0, %v6843_v30  ;;  %6459 = vmatpush3.bf16.msra.mxu1 %v6458_v45 }
 0xf74   :  { %6846 = verf.f32 %v2711_v32  ;;  %6460 = vmatprep.subr.bf16.mxu1 %v6981_v24 }
 0xf75   :  { %v2718_v19 = vmul.f32 %v2715_v51, %v2706_v31  ;;  %v5659_v51 = vld [vmem:[%s8161_s2 + $0x1] ss:$0 sm:$0xff]  ;;  %s8184_s2 = smov 72  }
 0xf77   :  { %6135 = vmatmul.mubr.msk.f32.vlgmr.msra.gmra.mrb[28].mxu0 %vm2736_vm5, %v2718_v19  ;;  %6462 = vmatpush3.bf16.msra.mxu1 %v6461_v16 }
 0xf78   :  { %6137 = vmatprep.mubr.msk.f32.mxu0 %vm6982_vm2, %v6983_v27 }
 0xf7a   :  { %v6845_v33 = vpop.eup %6844 }
 0xf7b   :  { %v2716_v35 = vadd.f32 1.0, %v6845_v33  ;;  %v5660_v33 = vld [vmem:[%s8162_s3 + $0x1] ss:$0 sm:$0xff]  ;;  %s8185_s3 = smov 104  }
 0xf7d   :  { %v2719_v36 = vmul.f32 %v2716_v35, %v2707_v34 }
 0xf7e   :  { %v6847_v37 = vpop.eup %6846 }
 0xf7f   :  { %v2717_v38 = vadd.f32 1.0, %v6847_v37  ;;  %6138 = vmatmul.mubr.msk.f32.gmra.mrb[30].mxu0 %vm2736_vm5, %v2719_v36 }
 0xf80   :  { %6140 = vmatprep.mubr.msk.f32.mxu0 %vm6982_vm2, %v6983_v27 }
 0xf81   :  { %v2720_v11 = vmul.f32 %v2717_v38, %v2708_v61 }
 0xf83   :  { %6141 = vmatmul.mubr.msk.f32.gmra.mrb[32].mxu0 %vm2736_vm5, %v2720_v11 }
0x104a   :  { %v2812_v44 = vpop.f32.mrb[28].mxu0 }
0x104b   :  { %v2813_v39 = vadd.f32 %v5653_v25, %v2812_v44  ;;  %v6136_v40 = vpop.f32.mrb[29].mxu0 }
0x104d   :  { %v2826_v48 = vadd.f32 %v2813_v39, %v7569_v63 }
0x104f   :  { %v2833_v50 = vsel %vm104_vm0, %v2826_v48, 0.0 }
0x1050   :  { %2834 = vadd.xlane.f32.xlu0 %v2833_v50 }
0x1052   :  { %v2817_v52 = vpop.f32.mrb[30].mxu0 }
0x1053   :  { %v2818_v43 = vadd.f32 %v5653_v25, %v2817_v52  ;;  %v6139_v42 = vpop.f32.mrb[31].mxu0 }
0x1055   :  { %v2827_v46 = vadd.f32 %v2818_v43, %v7575_v59 }
0x1056   :  { %v2822_v62 = vpop.f32.mrb[32].mxu0 }
0x1057   :  { %v2823_v53 = vadd.f32 %v5653_v25, %v2822_v62  ;;  %v6142_v47 = vpop.f32.mrb[33].mxu0  ;;  %v2836_v54 = vsel %vm104_vm0, %v2827_v46, 0.0 }
0x1058   :  { %2837 = vadd.xlane.f32.xlu1 %v2836_v54 }
0x1059   :  { %v2828_v58 = vadd.f32 %v2823_v53, %v7581_v55 }
0x105b   :  { %v2839_v0 = vsel %vm111_vm1, %v2828_v58, 0.0 }
0x105c   :  { %2840 = vadd.xlane.f32.xlu0 %v2839_v0 }
0x10dd   :  { %v2835_v63 = vpop.xlane.xlu0 %2834 }
0x10de   :  { %v2842_v60 = vmul.f32 0.03125, %v2835_v63 }
0x10e0   :  { %v2845_v20 = vsub.f32 %v2826_v48, %v2842_v60 }
0x10e2   :  { %v2848_v3 = vmul.f32 %v2845_v20, %v2845_v20 }
0x10e4   :  { %v2851_v5 = vsel %vm104_vm0, %v2848_v3, 0.0 }
0x10e5   :  { %2852 = vadd.xlane.f32.xlu1 %v2851_v5  ;;  %v2838_v6 = vpop.xlane.xlu1 %2837 }
0x10e6   :  { %v2843_v59 = vmul.f32 0.03125, %v2838_v6 }
0x10e8   :  { %v2846_v1 = vsub.f32 %v2827_v46, %v2843_v59 }
0x10e9   :  { %v2841_v7 = vpop.xlane.xlu0 %2840 }
0x10ea   :  { %v2844_v8 = vmul.f32 0.03125, %v2841_v7  ;;  %v2849_v28 = vmul.f32 %v2846_v1, %v2846_v1 }
0x10ec   :  { %v2847_v9 = vsub.f32 %v2828_v58, %v2844_v8  ;;  %v2854_v10 = vsel %vm104_vm0, %v2849_v28, 0.0 }
0x10ed   :  { %2855 = vadd.xlane.f32.xlu0 %v2854_v10 }
0x10ee   :  { %v2850_v55 = vmul.f32 %v2847_v9, %v2847_v9 }
0x10f0   :  { %v2857_v12 = vsel %vm111_vm1, %v2850_v55, 0.0 }
0x10f1   :  { %2858 = vadd.xlane.f32.xlu1 %v2857_v12 }
0x1172   :  { %v2853_v18 = vpop.xlane.xlu1 %2852 }
0x1173   :  { %v2860_v21 = vmul.f32 0.03125, %v2853_v18 }
0x1175   :  { %v2863_v49 = vadd.f32 1e-05, %v2860_v21 }
0x1177   :  { %6848 = vrsqrt.f32 %v2863_v49 }
0x117a   :  { %v2856_v22 = vpop.xlane.xlu0 %2855 }
0x117b   :  { %v2861_v23 = vmul.f32 0.03125, %v2856_v22 }
0x117d   :  { %v2864_v56 = vadd.f32 1e-05, %v2861_v23 }
0x117e   :  { %v2859_v29 = vpop.xlane.xlu1 %2858 }
0x117f   :  { %6850 = vrsqrt.f32 %v2864_v56  ;;  %v2862_v30 = vmul.f32 0.03125, %v2859_v29 }
0x1181   :  { %v6849_v31 = vpop.eup %6848  ;;  %v2865_v19 = vadd.f32 1e-05, %v2862_v30 }
0x1182   :  { %v2869_v32 = vmul.f32 %v6849_v31, %v2845_v20 }
0x1183   :  { %6852 = vrsqrt.f32 %v2865_v19 }
0x1184   :  { %v2878_v34 = vmul.f32 %v5659_v51, %v2869_v32 }
0x1186   :  { %v7655_v35 = vadd.f32 %v5660_v33, %v2878_v34 }
0x1188   :  { %6152 = vmatmul.mubr.msk.f32.vlgmr.msra.gmra.mrb[22].mxu1 %vm104_vm0, %v7655_v35 }
0x1189   :  { %6154 = vmatprep.mubr.msk.f32.mxu1 %vm6982_vm2, %v6983_v27  ;;  %v6851_v36 = vpop.eup %6850 }
0x118a   :  { %v2870_v37 = vmul.f32 %v6851_v36, %v2846_v1 }
0x118c   :  { %v2879_v61 = vmul.f32 %v5659_v51, %v2870_v37 }
0x118d   :  { %v6853_v38 = vpop.eup %6852 }
0x118e   :  { %v7661_v11 = vadd.f32 %v5660_v33, %v2879_v61  ;;  %v2871_v25 = vmul.f32 %v6853_v38, %v2847_v9 }
0x1190   :  { %6155 = vmatmul.mubr.msk.f32.gmra.mrb[24].mxu1 %vm104_vm0, %v7661_v11  ;;  %v2880_v44 = vmul.f32 %v5659_v51, %v2871_v25 }
0x1191   :  { %6157 = vmatprep.mubr.msk.f32.mxu1 %vm6982_vm2, %v6983_v27 }
0x1192   :  { %v7667_v39 = vadd.f32 %v5660_v33, %v2880_v44 }
0x1194   :  { %6158 = vmatmul.mubr.msk.f32.gmra.mrb[26].mxu1 %vm104_vm0, %v7667_v39 }
0x125b   :  { %v2970_v40 = vpop.f32.mrb[22].mxu1 }
0x125c   :  { %v2987_v48 = vcombine.high %v2970_v40, %v2970_v40  ;;  %v2994_v50 = vrot.slane %v2970_v40, %v7133_v57  ;;  %v6153_v52 = vpop.f32.mrb[23].mxu1 }
0x125e   :  { %v3001_v43 = vrot.slane %v2987_v48, %v7133_v57  ;;  %v3002_v42 = vcombine.high %v2994_v50, %v2994_v50  ;;  %v3010_v62 = vrot.slane %v2994_v50, %v7133_v57 }
0x1260   :  { %v3003_v46 = vcombine.high %v3001_v43, %v3001_v43  ;;  %v3024_v53 = vrot.slane %v3002_v42, %v7133_v57  ;;  %v3017_v47 = vrot.slane %v3001_v43, %v7133_v57 }
0x1262   :  { %v3031_v54 = vrot.slane %v3003_v46, %v7133_v57  ;;  %v3107_v58 = vcombine.low %v3010_v62, %v3024_v53  ;;  %v5668_v0 = vcombine.high %v3010_v62, %v3024_v53 }
0x1263   :  { %v2975_v5 = vpop.f32.mrb[24].mxu1 }
0x1264   :  { %v3109_v63 = vcombine.low %v3017_v47, %v3031_v54  ;;  %v5669_v60 = vcombine.high %v3017_v47, %v3031_v54  ;;  %v3117_v20 = vrot.slane %v3107_v58, %v7133_v57  ;;  %v3124_v3 = vrot.slane %v5668_v0, %v7133_v57  ;;  %v6156_v1 = vpop.f32.mrb[25].mxu1 }
0x1265   :  { %v3036_v6 = vcombine.high %v2975_v5, %v2975_v5  ;;  %v3043_v59 = vrot.slane %v2975_v5, %v7133_v57 }
0x1266   :  { %v3131_v7 = vrot.slane %v3109_v63, %v7133_v57  ;;  %v3138_v8 = vrot.slane %v5669_v60, %v7133_v57  ;;  %v3139_v28 = vcombine.low %v3117_v20, %v3124_v3 }
0x1267   :  { %v3050_v9 = vrot.slane %v3036_v6, %v7133_v57  ;;  %v3051_v10 = vcombine.high %v3043_v59, %v3043_v59  ;;  %v3059_v55 = vrot.slane %v3043_v59, %v7133_v57  ;;  %v2980_v13 = vpop.f32.mrb[26].mxu1 }
0x1268   :  { %v3140_v12 = vcombine.low %v3131_v7, %v3138_v8  ;;  %v6159_v16 = vpop.f32.mrb[27].mxu1  ;;  %v3147_v18 = vrot.slane %v3139_v28, %v7133_v57  ;;  %v3091_v22 = vrot.slane %v2980_v13, %v7133_v57 }
0x1269   :  { %v3052_v41 = vcombine.high %v3050_v9, %v3050_v9  ;;  %v3066_v45 = vrot.slane %v3050_v9, %v7133_v57  ;;  %v3073_v14 = vrot.slane %v3051_v10, %v7133_v57  ;;  %v3081_v15 = vcombine.high %v3059_v55, %v3059_v55 }
0x126a   :  { %v3154_v21 = vrot.slane %v3140_v12, %v7133_v57  ;;  %v3162_v49 = vrot.slane %v3059_v55, %v7133_v57  ;;  %v3092_v32 = vcombine.high %v3091_v22, %v3091_v22  ;;  %v3099_v36 = vrot.slane %v3091_v22, %v7133_v57 }
0x126b   :  { %v3080_v23 = vrot.slane %v3052_v41, %v7133_v57  ;;  %v3082_v56 = vcombine.high %v3066_v45, %v3066_v45  ;;  %v3083_v29 = vcombine.high %v3073_v14, %v3073_v14  ;;  %v3257_v30 = vcombine.low %v3073_v14, %v3081_v15 }
0x126c   :  { %v7691_v31 = vcombine.low %v3147_v18, %v3154_v21  ;;  %v7694_v51 = vrot.slane %v3162_v49, %v7133_v57  ;;  %v3106_v25 = vrot.slane %v3092_v32, %v7133_v57 }
0x126d   :  { %v3258_v19 = vcombine.low %v3083_v29, %v3066_v45  ;;  %v3259_v33 = vcombine.low %v3080_v23, %v3082_v56  ;;  %v3084_v34 = vcombine.high %v3080_v23, %v3080_v23  ;;  %v3267_v61 = vrot.slane %v3257_v30, %v7133_v57 }
0x126e   :  { %6164 = vmatprep.mubr.msk.f32.mxu1 %vm447_vm3, %v7691_v31  ;;  %v7701_v37 = vpack.i.bf16 %v7694_v51, %v7691_v31  ;;  %v3312_v43 = vrot.slane %v3106_v25, %v7133_v57 }
0x126f   :  { %v3274_v38 = vrot.slane %v3258_v19, %v7133_v57  ;;  %v3260_v44 = vcombine.low %v3084_v34, %v3099_v36  ;;  %v3281_v48 = vrot.slane %v3259_v33, %v7133_v57 }
0x1270   :  { %6687 = vrot.lane.b32.xlu0 %v7701_v37, %s6985_s16  ;;  %v7716_v53 = vrot.slane %v3312_v43, %v7133_v57 }
0x1271   :  { %v3289_v40 = vcombine.low %v3267_v61, %v3274_v38  ;;  %v3288_v50 = vrot.slane %v3260_v44, %v7133_v57 }
0x1273   :  { %v3290_v52 = vcombine.low %v3281_v48, %v3288_v50  ;;  %v3297_v42 = vrot.slane %v3289_v40, %v7133_v57 }
0x1275   :  { %v3304_v46 = vrot.slane %v3290_v52, %v7133_v57 }
0x1277   :  { %v7713_v62 = vcombine.low %v3297_v42, %v3304_v46 }
0x1279   :  { %6171 = vmatprep.mubr.msk.f32.mxu0 %vm447_vm3, %v7713_v62  ;;  %v7722_v47 = vpack.i.bf16 %v7716_v53, %v7713_v62 }
0x127b   :  { %6692 = vrot.lane.b32.xlu1 %v7722_v47, %s6985_s16  ;;  %s8186_s16 = smov 40  }
0x12e2   :  { %v6688_v54 = vpop.permute.xlu0 %6687 }
0x12e3   :  { %v6690_v58 = vunpack.i.h.bf16 %v6688_v54  ;;  %v6689_v0 = vunpack.i.l.bf16 %v6688_v54 }
0x12e5   :  { %v6463_v63 = vpack.c.bf16 %v6690_v58, %v6689_v0 }
0x12e7   :  { %6465 = vmatprep.subr.msk.bf16.mxu1 %vm7192_vm4, %v6463_v63 }
0x12e8   :  { %6468 = vmatpush3.bf16.xpose.msk.msra.mxu1 %vm7192_vm4, %v6463_v63 }
0x12ed   :  { %v6693_v60 = vpop.permute.xlu1 %6692 }
0x12ee   :  { %v6695_v20 = vunpack.i.h.bf16 %v6693_v60  ;;  %v6694_v3 = vunpack.i.l.bf16 %v6693_v60 }
0x12ef   :  { %6165 = vmatmul.mubr.msk.f32.vlgmr.msra.gmra.mrb[28].mxu1 %vm447_vm3, %v7694_v51 }
0x12f0   :  { %v6469_v5 = vpack.c.bf16 %v6695_v20, %v6694_v3 }
0x12f2   :  { %6471 = vmatprep.subr.msk.bf16.mxu0 %vm7192_vm4, %v6469_v5 }
0x12f3   :  { %6474 = vmatpush3.bf16.xpose.msk.msra.mxu0 %vm7192_vm4, %v6469_v5 }
0x12fa   :  { %6172 = vmatmul.mubr.msk.f32.vlgmr.msra.gmra.mrb[34].mxu0 %vm447_vm3, %v7716_v53 }
0x13c2   :  { %v6166_v6 = vpop.f32.mrb[28].mxu1 }
0x13c3   :  { %v3408_v59 = vmul.f32 0.35355338, %v6166_v6  ;;  %v3248_v1 = vpop.f32.mrb[29].mxu1 }
0x13c4   :  { %v3407_v7 = vmul.f32 0.35355338, %v3248_v1 }
0x13c5   :  { %v3412_v8 = vsel %vm100_vm7, -1e+09, %v3408_v59 }
0x13c6   :  { %v3418_v28 = vsel %vm693_vm8, %v3412_v8, -inf  ;;  %v3411_v9 = vsel %vm100_vm7, -1e+09, %v3407_v7 }
0x13c7   :  { %3419 = vmax.xlane.f32.xlu0 %v3418_v28  ;;  %v3415_v10 = vsel %vm689_vm9, %v3411_v9, -inf }
0x13c8   :  { %3416 = vmax.xlane.f32.xlu1 %v3415_v10 }
0x13cd   :  { %v6173_v55 = vpop.f32.mrb[34].mxu0 }
0x13ce   :  { %v3410_v12 = vmul.f32 0.35355338, %v6173_v55  ;;  %v3398_v13 = vpop.f32.mrb[35].mxu0 }
0x13cf   :  { %v3409_v41 = vmul.f32 0.35355338, %v3398_v13 }
0x13d0   :  { %v3414_v45 = vsel %vm101_vm10, -1e+09, %v3410_v12 }
0x13d1   :  { %v3424_v14 = vsel %vm693_vm8, %v3414_v45, -inf  ;;  %v3413_v15 = vsel %vm101_vm10, -1e+09, %v3409_v41 }
0x13d2   :  { %3425 = vmax.xlane.f32.xlu1 %v3424_v14  ;;  %v3421_v16 = vsel %vm689_vm9, %v3413_v15, -inf }
0x13d3   :  { %3422 = vmax.xlane.f32.xlu0 %v3421_v16 }
0x13e3   :  { %6702 = vrot.lane.b32.xlu1 %v7722_v47, %s6987_s1 }
0x13e7   :  { %6707 = vrot.lane.b32.xlu1 %v7701_v37, %s6988_s21 }
0x13e9   :  { %6697 = vrot.lane.b32.xlu0 %v7701_v37, %s6987_s1 }
0x13eb   :  { %6712 = vrot.lane.b32.xlu1 %v7722_v47, %s6988_s21 }
0x1454   :  { %v3420_v18 = vpop.xlane.xlu0 %3419 }
0x1455   :  { %v3428_v21 = vsub.f32 %v3412_v8, %v3420_v18  ;;  %v3417_v49 = vpop.xlane.xlu1 %3416 }
0x1456   :  { %v3427_v22 = vsub.f32 %v3411_v9, %v3417_v49 }
0x1457   :  { %v3433_v23 = vmul.f32 1.442695, %v3428_v21 }
0x1458   :  { %v3431_v56 = vmul.f32 1.442695, %v3427_v22 }
0x1459   :  { %6854 = vpow2.f32 %v3433_v23 }
0x145a   :  { %6856 = vpow2.f32 %v3431_v56 }
0x145f   :  { %v3426_v29 = vpop.xlane.xlu1 %3425 }
0x1460   :  { %v3430_v30 = vsub.f32 %v3414_v45, %v3426_v29  ;;  %v3423_v32 = vpop.xlane.xlu0 %3422 }
0x1461   :  { %v3429_v19 = vsub.f32 %v3413_v15, %v3423_v32 }
0x1462   :  { %v3437_v33 = vmul.f32 1.442695, %v3430_v30 }
0x1463   :  { %v6855_v34 = vpop.eup %6854  ;;  %v3435_v36 = vmul.f32 1.442695, %v3429_v19  ;;  %v6703_v61 = vpop.permute.xlu1 %6702 }
0x1464   :  { %v6857_v38 = vpop.eup %6856  ;;  %6858 = vpow2.f32 %v3437_v33  ;;  %v6705_v25 = vunpack.i.h.bf16 %v6703_v61  ;;  %v6704_v44 = vunpack.i.l.bf16 %v6703_v61  ;;  %v6698_v40 = vpop.permute.xlu0 %6697  ;;  %v3442_v48 = vsel %vm693_vm8, %v6855_v34, 0.0 }
0x1465   :  { %6860 = vpow2.f32 %v3435_v36  ;;  %v6700_v50 = vunpack.i.h.bf16 %v6698_v40  ;;  %v6699_v52 = vunpack.i.l.bf16 %v6698_v40  ;;  %3443 = vadd.xlane.f32.xlu1 %v3442_v48  ;;  %v3439_v43 = vsel %vm689_vm9, %v6857_v38, 0.0 }
0x1466   :  { %v6481_v42 = vpack.c.bf16 %v6705_v25, %v6704_v44  ;;  %3440 = vadd.xlane.f32.xlu0 %v3439_v43 }
0x1467   :  { %v6475_v46 = vpack.c.bf16 %v6700_v50, %v6699_v52  ;;  %v6708_v54 = vpop.permute.xlu1 %6707 }
0x1468   :  { %v6710_v58 = vunpack.i.h.bf16 %v6708_v54  ;;  %v6709_v0 = vunpack.i.l.bf16 %v6708_v54  ;;  %6483 = vmatprep.subr.msk.bf16.mxu0 %vm7240_vm13, %v6481_v42 }
0x1469   :  { %6477 = vmatprep.subr.msk.bf16.mxu1 %vm7240_vm13, %v6475_v46  ;;  %6486 = vmatpush3.bf16.msk.msra.mxu0 %vm7240_vm13, %v6481_v42 }
0x146a   :  { %v6487_v63 = vpack.c.bf16 %v6710_v58, %v6709_v0  ;;  %6480 = vmatpush3.bf16.msk.msra.mxu1 %vm7240_vm13, %v6475_v46 }
0x146b   :  { %v6713_v60 = vpop.permute.xlu1 %6712 }
0x146c   :  { %v6715_v20 = vunpack.i.h.bf16 %v6713_v60  ;;  %v6714_v3 = vunpack.i.l.bf16 %v6713_v60  ;;  %6489 = vmatprep.subr.msk.bf16.mxu1 %vm7192_vm4, %v6487_v63 }
0x146e   :  { %v6859_v5 = vpop.eup %6858  ;;  %v6493_v6 = vpack.c.bf16 %v6715_v20, %v6714_v3 }
0x146f   :  { %v6861_v59 = vpop.eup %6860  ;;  %v3448_v1 = vsel %vm693_vm8, %v6859_v5, 0.0 }
0x1470   :  { %3449 = vadd.xlane.f32.xlu1 %v3448_v1  ;;  %6495 = vmatprep.subr.msk.bf16.mxu0 %vm7192_vm4, %v6493_v6  ;;  %v3445_v7 = vsel %vm689_vm9, %v6861_v59, 0.0 }
0x1471   :  { %3446 = vadd.xlane.f32.xlu0 %v3445_v7 }
0x1481   :  { %3637 = vrot.lane.b32.xlu1 %v7694_v51, %s6990_s0 }
0x1485   :  { %3728 = vrot.lane.b32.xlu1 %v7716_v53, %s6990_s0 }
0x1487   :  { %3635 = vrot.lane.b32.xlu0 %v7691_v31, %s6990_s0 }
0x148b   :  { %3726 = vrot.lane.b32.xlu0 %v7713_v62, %s6990_s0 }
0x14f2   :  { %v3444_v8 = vpop.xlane.xlu1 %3443 }
0x14f3   :  { %6862 = vrcp.f32 %v3444_v8  ;;  %v3441_v28 = vpop.xlane.xlu0 %3440 }
0x14f4   :  { %6864 = vrcp.f32 %v3441_v28 }
0x14fd   :  { %v6863_v9 = vpop.eup %6862  ;;  %v3450_v10 = vpop.xlane.xlu1 %3449 }
0x14fe   :  { %v6865_v55 = vpop.eup %6864  ;;  %6866 = vrcp.f32 %v3450_v10  ;;  %v3447_v12 = vpop.xlane.xlu0 %3446  ;;  %v3456_v41 = vmul.f32 %v6863_v9, %v6855_v34 }
0x14ff   :  { %6868 = vrcp.f32 %v3447_v12  ;;  %v3455_v13 = vmul.f32 %v6865_v55, %v6857_v38 }
0x1501   :  { %6178 = vmatprep.mubr.msk.f32.mxu1 %vm689_vm9, %v3455_v13  ;;  %v3638_v16 = vpop.permute.xlu1 %3637 }
0x1502   :  { %v3636_v45 = vpop.permute.xlu0 %3635  ;;  %6179 = vmatmul.mubr.msk.f32.vlgmr.msra.gmra.mrb[30].mxu1 %vm689_vm9, %v3456_v41 }
0x1503   :  { %6492 = vmatpush3.bf16.xpose.msk.msra.mxu1 %vm7192_vm4, %v6487_v63  ;;  %6192 = vmatprep.mubr.msk.f32.mxu1 %vm447_vm3, %v3636_v45 }
0x1505   :  { %v3729_v22 = vpop.permute.xlu1 %3728 }
0x1506   :  { %v3727_v49 = vpop.permute.xlu0 %3726 }
0x1508   :  { %v6867_v14 = vpop.eup %6866 }
0x1509   :  { %v6869_v15 = vpop.eup %6868  ;;  %v3458_v21 = vmul.f32 %v6867_v14, %v6859_v5 }
0x150a   :  { %v3457_v18 = vmul.f32 %v6869_v15, %v6861_v59  ;;  %6193 = vmatmul.mubr.msk.f32.vlgmr.msra.gmra.mrb[32].mxu1 %vm447_vm3, %v3638_v16 }
0x150c   :  { %6185 = vmatprep.mubr.msk.f32.mxu0 %vm689_vm9, %v3457_v18 }
0x150d   :  { %6186 = vmatmul.mubr.msk.f32.vlgmr.msra.gmra.mrb[36].mxu0 %vm689_vm9, %v3458_v21 }
0x150e   :  { %6498 = vmatpush3.bf16.xpose.msk.msra.mxu0 %vm7192_vm4, %v6493_v6  ;;  %6199 = vmatprep.mubr.msk.f32.mxu0 %vm447_vm3, %v3727_v49 }
0x1515   :  { %6200 = vmatmul.mubr.msk.f32.vlgmr.msra.gmra.mrb[38].mxu0 %vm447_vm3, %v3729_v22 }
0x15d5   :  { %v7794_v23 = vpop.f32.mrb[30].mxu1 }
0x15d6   :  { %v7796_v56 = vpop.f32.mrb[31].mxu1 }
0x15dd   :  { %v6194_v29 = vpop.f32.mrb[32].mxu1 }
0x15de   :  { %v3818_v30 = vmul.f32 0.35355338, %v6194_v29  ;;  %v3717_v32 = vpop.f32.mrb[33].mxu1 }
0x15df   :  { %v3817_v19 = vmul.f32 0.35355338, %v3717_v32 }
0x15e0   :  { %v3822_v33 = vsel %vm100_vm7, -1e+09, %v3818_v30  ;;  %v7800_v34 = vpop.f32.mrb[36].mxu0 }
0x15e1   :  { %v3821_v36 = vsel %vm100_vm7, -1e+09, %v3817_v19  ;;  %v7804_v61 = vpop.f32.mrb[37].mxu0  ;;  %v3828_v38 = vsel %vm693_vm8, %v3822_v33, -inf }
0x15e2   :  { %3829 = vmax.xlane.f32.xlu1 %v3828_v38  ;;  %v3825_v25 = vsel %vm689_vm9, %v3821_v36, -inf }
0x15e3   :  { %3826 = vmax.xlane.f32.xlu0 %v3825_v25 }
0x15e8   :  { %v6201_v44 = vpop.f32.mrb[38].mxu0 }
0x15e9   :  { %v3808_v40 = vpop.f32.mrb[39].mxu0  ;;  %v3820_v48 = vmul.f32 0.35355338, %v6201_v44 }
0x15ea   :  { %v3819_v50 = vmul.f32 0.35355338, %v3808_v40 }
0x15eb   :  { %v3824_v42 = vsel %vm101_vm10, -1e+09, %v3820_v48 }
0x15ec   :  { %v3823_v52 = vsel %vm101_vm10, -1e+09, %v3819_v50  ;;  %v3834_v46 = vsel %vm693_vm8, %v3824_v42, -inf }
0x15ed   :  { %v3831_v43 = vsel %vm689_vm9, %v3823_v52, -inf }
0x15ee   :  { %3832 = vmax.xlane.f32.xlu0 %v3831_v43 }
0x15f2   :  { %3835 = vmax.xlane.f32.xlu0 %v3834_v46 }
0x15f3   :  { %6722 = vrot.lane.b32.xlu1 %v7722_v47, %s6991_s22 }
0x15f7   :  { %6727 = vrot.lane.b32.xlu1 %v7701_v37, %s6992_s23 }
0x15fb   :  { %6732 = vrot.lane.b32.xlu1 %v7722_v47, %s6992_s23 }
0x1608   :  { %6717 = vrot.lane.b32.xlu0 %v7701_v37, %s6991_s22 }
0x166f   :  { %v3830_v54 = vpop.xlane.xlu1 %3829 }
0x1670   :  { %v3838_v58 = vsub.f32 %v3822_v33, %v3830_v54  ;;  %v3827_v0 = vpop.xlane.xlu0 %3826 }
0x1671   :  { %v3837_v63 = vsub.f32 %v3821_v36, %v3827_v0 }
0x1672   :  { %v3843_v60 = vmul.f32 1.442695, %v3838_v58 }
0x1673   :  { %v3841_v20 = vmul.f32 1.442695, %v3837_v63  ;;  %v6723_v3 = vpop.permute.xlu1 %6722 }
0x1674   :  { %6870 = vpow2.f32 %v3843_v60  ;;  %v6725_v5 = vunpack.i.h.bf16 %v6723_v3  ;;  %v6724_v6 = vunpack.i.l.bf16 %v6723_v3 }
0x1675   :  { %6872 = vpow2.f32 %v3841_v20 }
0x1676   :  { %v6505_v59 = vpack.c.bf16 %v6725_v5, %v6724_v6 }
0x1677   :  { %v6728_v1 = vpop.permute.xlu1 %6727 }
0x1678   :  { %6507 = vmatprep.subr.msk.bf16.mxu0 %vm7240_vm13, %v6505_v59  ;;  %v6730_v21 = vunpack.i.h.bf16 %v6728_v1  ;;  %v6729_v22 = vunpack.i.l.bf16 %v6728_v1 }
0x1679   :  { %6510 = vmatpush3.bf16.msk.msra.mxu0 %vm7240_vm13, %v6505_v59 }
0x167a   :  { %v6511_v19 = vpack.c.bf16 %v6730_v21, %v6729_v22 }
0x167b   :  { %v3833_v7 = vpop.xlane.xlu0 %3832  ;;  %v6733_v8 = vpop.permute.xlu1 %6732 }
0x167c   :  { %v3839_v28 = vsub.f32 %v3823_v52, %v3833_v7  ;;  %v6735_v9 = vunpack.i.h.bf16 %v6733_v8  ;;  %v6734_v10 = vunpack.i.l.bf16 %v6733_v8 }
0x167e   :  { %v6871_v55 = vpop.eup %6870  ;;  %v3845_v12 = vmul.f32 1.442695, %v3839_v28  ;;  %v6517_v13 = vpack.c.bf16 %v6735_v9, %v6734_v10 }
0x167f   :  { %v6873_v41 = vpop.eup %6872  ;;  %v3836_v45 = vpop.xlane.xlu0 %3835  ;;  %v3852_v14 = vsel %vm693_vm8, %v6871_v55, 0.0 }
0x1680   :  { %6874 = vpow2.f32 %v3845_v12  ;;  %v3840_v15 = vsub.f32 %v3824_v42, %v3836_v45  ;;  %3853 = vadd.xlane.f32.xlu1 %v3852_v14  ;;  %6519 = vmatprep.subr.msk.bf16.mxu0 %vm7192_vm4, %v6517_v13  ;;  %v3849_v16 = vsel %vm689_vm9, %v6873_v41, 0.0 }
0x1681   :  { %3850 = vadd.xlane.f32.xlu0 %v3849_v16 }
0x1682   :  { %v3847_v18 = vmul.f32 1.442695, %v3840_v15 }
0x1683   :  { %v6718_v49 = vpop.permute.xlu0 %6717 }
0x1684   :  { %6876 = vpow2.f32 %v3847_v18  ;;  %v6720_v29 = vunpack.i.h.bf16 %v6718_v49  ;;  %v6719_v30 = vunpack.i.l.bf16 %v6718_v49 }
0x1686   :  { %v6499_v32 = vpack.c.bf16 %v6720_v29, %v6719_v30 }
0x1688   :  { %6501 = vmatprep.subr.msk.bf16.mxu1 %vm7240_vm13, %v6499_v32 }
0x1689   :  { %6504 = vmatpush3.bf16.msk.msra.mxu1 %vm7240_vm13, %v6499_v32 }
0x168a   :  { %v6875_v33 = vpop.eup %6874  ;;  %6513 = vmatprep.subr.msk.bf16.mxu1 %vm7192_vm4, %v6511_v19 }
0x168b   :  { %v3855_v36 = vsel %vm689_vm9, %v6875_v33, 0.0 }
0x168c   :  { %3856 = vadd.xlane.f32.xlu0 %v3855_v36 }
0x168e   :  { %v6877_v38 = vpop.eup %6876 }
0x168f   :  { %v3858_v25 = vsel %vm693_vm8, %v6877_v38, 0.0 }
0x1690   :  { %3859 = vadd.xlane.f32.xlu1 %v3858_v25 }
0x16a1   :  { %4047 = vrot.lane.b32.xlu1 %v7694_v51, %s6993_s24 }
0x16a2   :  { %4045 = vrot.lane.b32.xlu0 %v7691_v31, %s6993_s24 }
0x16a5   :  { %4138 = vrot.lane.b32.xlu1 %v7716_v53, %s6993_s24 }
0x16a6   :  { %4136 = vrot.lane.b32.xlu0 %v7713_v62, %s6993_s24 }
0x170d   :  { %v3854_v44 = vpop.xlane.xlu1 %3853 }
0x170e   :  { %6878 = vrcp.f32 %v3854_v44  ;;  %v3851_v40 = vpop.xlane.xlu0 %3850 }
0x170f   :  { %6880 = vrcp.f32 %v3851_v40 }
0x1718   :  { %v6879_v48 = vpop.eup %6878 }
0x1719   :  { %v6881_v50 = vpop.eup %6880  ;;  %v3857_v52 = vpop.xlane.xlu0 %3856  ;;  %v3866_v42 = vmul.f32 %v6879_v48, %v6871_v55 }
0x171a   :  { %6882 = vrcp.f32 %v3857_v52  ;;  %v3865_v43 = vmul.f32 %v6881_v50, %v6873_v41 }
0x171c   :  { %6206 = vmatprep.mubr.msk.f32.mxu1 %vm689_vm9, %v3865_v43 }
0x171d   :  { %v3860_v46 = vpop.xlane.xlu1 %3859  ;;  %v4046_v54 = vpop.permute.xlu0 %4045  ;;  %6207 = vmatmul.mubr.msk.f32.vlgmr.msra.gmra.mrb[34].mxu1 %vm689_vm9, %v3866_v42 }
0x171e   :  { %6884 = vrcp.f32 %v3860_v46  ;;  %6516 = vmatpush3.bf16.xpose.msk.msra.mxu1 %vm7192_vm4, %v6511_v19  ;;  %6220 = vmatprep.mubr.msk.f32.mxu1 %vm447_vm3, %v4046_v54 }
0x1721   :  { %v4048_v0 = vpop.permute.xlu1 %4047  ;;  %v4137_v3 = vpop.permute.xlu0 %4136 }
0x1724   :  { %v6883_v58 = vpop.eup %6882 }
0x1725   :  { %v3867_v63 = vmul.f32 %v6883_v58, %v6875_v33  ;;  %6221 = vmatmul.mubr.msk.f32.vlgmr.msra.gmra.mrb[36].mxu1 %vm447_vm3, %v4048_v0  ;;  %v4139_v5 = vpop.permute.xlu1 %4138 }
0x1727   :  { %6213 = vmatprep.mubr.msk.f32.mxu0 %vm689_vm9, %v3867_v63 }
0x1728   :  { %v6885_v60 = vpop.eup %6884 }
0x1729   :  { %v3868_v20 = vmul.f32 %v6885_v60, %v6877_v38 }
0x172b   :  { %6214 = vmatmul.mubr.msk.f32.vlgmr.msra.gmra.mrb[40].mxu0 %vm689_vm9, %v3868_v20 }
0x172c   :  { %6522 = vmatpush3.bf16.xpose.msk.msra.mxu0 %vm7192_vm4, %v6517_v13  ;;  %6227 = vmatprep.mubr.msk.f32.mxu0 %vm447_vm3, %v4137_v3 }
0x1733   :  { %6228 = vmatmul.mubr.msk.f32.vlgmr.msra.gmra.mrb[42].mxu0 %vm447_vm3, %v4139_v5 }
0x17f0   :  { %v7858_v6 = vpop.f32.mrb[34].mxu1 }
0x17f1   :  { %v7860_v59 = vpop.f32.mrb[35].mxu1 }
0x17f8   :  { %v6222_v1 = vpop.f32.mrb[36].mxu1 }
0x17f9   :  { %v4228_v7 = vmul.f32 0.35355338, %v6222_v1  ;;  %v4127_v8 = vpop.f32.mrb[37].mxu1 }
0x17fa   :  { %v4227_v28 = vmul.f32 0.35355338, %v4127_v8 }
0x17fb   :  { %v4232_v9 = vsel %vm100_vm7, -1e+09, %v4228_v7 }
0x17fc   :  { %v4231_v10 = vsel %vm100_vm7, -1e+09, %v4227_v28  ;;  %v4238_v55 = vsel %vm693_vm8, %v4232_v9, -inf }
0x17fd   :  { %4239 = vmax.xlane.f32.xlu1 %v4238_v55  ;;  %v4235_v12 = vsel %vm689_vm9, %v4231_v10, -inf }
0x17fe   :  { %v7868_v13 = vpop.f32.mrb[40].mxu0  ;;  %4236 = vmax.xlane.f32.xlu0 %v4235_v12 }
0x17ff   :  { %v7870_v41 = vpop.f32.mrb[41].mxu0 }
0x1806   :  { %v6229_v45 = vpop.f32.mrb[42].mxu0 }
0x1807   :  { %v4218_v14 = vpop.f32.mrb[43].mxu0  ;;  %v4230_v15 = vmul.f32 0.35355338, %v6229_v45 }
0x1808   :  { %v4229_v16 = vmul.f32 0.35355338, %v4218_v14 }
0x1809   :  { %v4234_v49 = vsel %vm101_vm10, -1e+09, %v4230_v15 }
0x180a   :  { %v4233_v18 = vsel %vm101_vm10, -1e+09, %v4229_v16  ;;  %v4244_v22 = vsel %vm693_vm8, %v4234_v49, -inf }
0x180b   :  { %v4241_v21 = vsel %vm689_vm9, %v4233_v18, -inf }
0x180c   :  { %4242 = vmax.xlane.f32.xlu0 %v4241_v21 }
0x180e   :  { %6742 = vrot.lane.b32.xlu1 %v7722_v47, %s6994_s25 }
0x1810   :  { %4245 = vmax.xlane.f32.xlu0 %v4244_v22 }
0x1812   :  { %6747 = vrot.lane.b32.xlu1 %v7701_v37, %s8184_s2 }
0x1816   :  { %6752 = vrot.lane.b32.xlu1 %v7722_v47, %s8184_s2 }
0x1826   :  { %6737 = vrot.lane.b32.xlu0 %v7701_v37, %s6994_s25 }
0x188a   :  { %v4240_v29 = vpop.xlane.xlu1 %4239 }
0x188b   :  { %v4248_v30 = vsub.f32 %v4232_v9, %v4240_v29  ;;  %v4237_v32 = vpop.xlane.xlu0 %4236 }
0x188c   :  { %v4247_v19 = vsub.f32 %v4231_v10, %v4237_v32 }
0x188d   :  { %v4253_v33 = vmul.f32 1.442695, %v4248_v30 }
0x188e   :  { %v4251_v36 = vmul.f32 1.442695, %v4247_v19  ;;  %v6743_v38 = vpop.permute.xlu1 %6742 }
0x188f   :  { %6886 = vpow2.f32 %v4253_v33  ;;  %v6745_v25 = vunpack.i.h.bf16 %v6743_v38  ;;  %v6744_v44 = vunpack.i.l.bf16 %v6743_v38 }
0x1890   :  { %6888 = vpow2.f32 %v4251_v36 }
0x1891   :  { %v6529_v40 = vpack.c.bf16 %v6745_v25, %v6744_v44 }
0x1892   :  { %v6748_v48 = vpop.permute.xlu1 %6747 }
0x1893   :  { %6531 = vmatprep.subr.msk.bf16.mxu0 %vm7240_vm13, %v6529_v40  ;;  %v6750_v7 = vunpack.i.h.bf16 %v6748_v48  ;;  %v6749_v28 = vunpack.i.l.bf16 %v6748_v48 }
0x1894   :  { %6534 = vmatpush3.bf16.msk.msra.mxu0 %vm7240_vm13, %v6529_v40 }
0x1895   :  { %v6535_v12 = vpack.c.bf16 %v6750_v7, %v6749_v28 }
0x1896   :  { %v6753_v50 = vpop.permute.xlu1 %6752 }
0x1897   :  { %v6755_v52 = vunpack.i.h.bf16 %v6753_v50  ;;  %v6754_v43 = vunpack.i.l.bf16 %v6753_v50 }
0x1899   :  { %v6887_v42 = vpop.eup %6886  ;;  %v6541_v46 = vpack.c.bf16 %v6755_v52, %v6754_v43  ;;  %v4243_v54 = vpop.xlane.xlu0 %4242 }
0x189a   :  { %v6889_v58 = vpop.eup %6888  ;;  %v4249_v0 = vsub.f32 %v4233_v18, %v4243_v54  ;;  %v4262_v63 = vsel %vm693_vm8, %v6887_v42, 0.0 }
0x189b   :  { %4263 = vadd.xlane.f32.xlu1 %v4262_v63  ;;  %6543 = vmatprep.subr.msk.bf16.mxu0 %vm7192_vm4, %v6541_v46  ;;  %v4259_v60 = vsel %vm689_vm9, %v6889_v58, 0.0 }
0x189c   :  { %v4255_v20 = vmul.f32 1.442695, %v4249_v0  ;;  %4260 = vadd.xlane.f32.xlu0 %v4259_v60 }
0x189d   :  { %v4246_v3 = vpop.xlane.xlu0 %4245 }
0x189e   :  { %6890 = vpow2.f32 %v4255_v20  ;;  %v4250_v5 = vsub.f32 %v4234_v49, %v4246_v3 }
0x18a0   :  { %v4257_v1 = vmul.f32 1.442695, %v4250_v5 }
0x18a1   :  { %v6738_v8 = vpop.permute.xlu0 %6737 }
0x18a2   :  { %6892 = vpow2.f32 %v4257_v1  ;;  %v6740_v9 = vunpack.i.h.bf16 %v6738_v8  ;;  %v6739_v10 = vunpack.i.l.bf16 %v6738_v8 }
0x18a4   :  { %v6523_v55 = vpack.c.bf16 %v6740_v9, %v6739_v10 }
0x18a6   :  { %6525 = vmatprep.subr.msk.bf16.mxu1 %vm7240_vm13, %v6523_v55 }
0x18a7   :  { %6528 = vmatpush3.bf16.msk.msra.mxu1 %vm7240_vm13, %v6523_v55 }
0x18a8   :  { %v6891_v45 = vpop.eup %6890  ;;  %6537 = vmatprep.subr.msk.bf16.mxu1 %vm7192_vm4, %v6535_v12 }
0x18a9   :  { %v4265_v14 = vsel %vm689_vm9, %v6891_v45, 0.0 }
0x18aa   :  { %4266 = vadd.xlane.f32.xlu0 %v4265_v14 }
0x18ac   :  { %v6893_v15 = vpop.eup %6892 }
0x18ad   :  { %v4268_v16 = vsel %vm693_vm8, %v6893_v15, 0.0 }
0x18ae   :  { %4269 = vadd.xlane.f32.xlu1 %v4268_v16 }
0x18bf   :  { %4457 = vrot.lane.b32.xlu1 %v7694_v51, %s8185_s3 }
0x18c0   :  { %4455 = vrot.lane.b32.xlu0 %v7691_v31, %s8185_s3 }
0x18c3   :  { %4548 = vrot.lane.b32.xlu1 %v7716_v53, %s8185_s3 }
0x18c4   :  { %4546 = vrot.lane.b32.xlu0 %v7713_v62, %s8185_s3 }
0x1928   :  { %v4264_v18 = vpop.xlane.xlu1 %4263 }
0x1929   :  { %6894 = vrcp.f32 %v4264_v18  ;;  %v4261_v21 = vpop.xlane.xlu0 %4260 }
0x192a   :  { %6896 = vrcp.f32 %v4261_v21 }
0x1933   :  { %v6895_v49 = vpop.eup %6894 }
0x1934   :  { %v6897_v22 = vpop.eup %6896  ;;  %v4276_v30 = vmul.f32 %v6895_v49, %v6887_v42 }
0x1935   :  { %v4275_v29 = vmul.f32 %v6897_v22, %v6889_v58 }
0x1937   :  { %v4267_v32 = vpop.xlane.xlu0 %4266  ;;  %6234 = vmatprep.mubr.msk.f32.mxu1 %vm689_vm9, %v4275_v29 }
0x1938   :  { %6898 = vrcp.f32 %v4267_v32  ;;  %6235 = vmatmul.mubr.msk.f32.vlgmr.msra.gmra.mrb[38].mxu1 %vm689_vm9, %v4276_v30 }
0x1939   :  { %6540 = vmatpush3.bf16.xpose.msk.msra.mxu1 %vm7192_vm4, %v6535_v12 }
0x193b   :  { %v4270_v31 = vpop.xlane.xlu1 %4269  ;;  %v4456_v51 = vpop.permute.xlu0 %4455 }
0x193c   :  { %6900 = vrcp.f32 %v4270_v31  ;;  %6248 = vmatprep.mubr.msk.f32.mxu1 %vm447_vm3, %v4456_v51 }
0x193f   :  { %v4458_v62 = vpop.permute.xlu1 %4457  ;;  %v4547_v38 = vpop.permute.xlu0 %4546 }
0x1940   :  { %6249 = vmatmul.mubr.msk.f32.vlgmr.msra.gmra.mrb[40].mxu1 %vm447_vm3, %v4458_v62 }
0x1942   :  { %v6899_v53 = vpop.eup %6898 }
0x1943   :  { %v4277_v19 = vmul.f32 %v6899_v53, %v6891_v45  ;;  %v4549_v25 = vpop.permute.xlu1 %4548 }
0x1945   :  { %6241 = vmatprep.mubr.msk.f32.mxu0 %vm689_vm9, %v4277_v19 }
0x1946   :  { %v6901_v33 = vpop.eup %6900 }
0x1947   :  { %v4278_v36 = vmul.f32 %v6901_v33, %v6893_v15 }
0x1949   :  { %6242 = vmatmul.mubr.msk.f32.vlgmr.msra.gmra.mrb[44].mxu0 %vm689_vm9, %v4278_v36 }
0x194a   :  { %6546 = vmatpush3.bf16.xpose.msk.msra.mxu0 %vm7192_vm4, %v6541_v46  ;;  %6255 = vmatprep.mubr.msk.f32.mxu0 %vm447_vm3, %v4547_v38 }
0x1951   :  { %6256 = vmatmul.mubr.msk.f32.vlgmr.msra.gmra.mrb[46].mxu0 %vm447_vm3, %v4549_v25 }
0x1a0b   :  { %v7922_v44 = vpop.f32.mrb[38].mxu1 }
0x1a0c   :  { %v4358_v40 = vpop.f32.mrb[39].mxu1 }
0x1a13   :  { %v6250_v48 = vpop.f32.mrb[40].mxu1 }
0x1a14   :  { %v4638_v50 = vmul.f32 0.35355338, %v6250_v48  ;;  %v4537_v52 = vpop.f32.mrb[41].mxu1 }
0x1a15   :  { %v4637_v43 = vmul.f32 0.35355338, %v4537_v52 }
0x1a16   :  { %v4642_v42 = vsel %vm100_vm7, -1e+09, %v4638_v50 }
0x1a17   :  { %v4641_v54 = vsel %vm100_vm7, -1e+09, %v4637_v43  ;;  %v4648_v4 = vsel %vm693_vm8, %v4642_v42, -inf }
0x1a18   :  { %4649 = vmax.xlane.f32.xlu1 %v4648_v4  ;;  %v4645_v46 = vsel %vm689_vm9, %v4641_v54, -inf }
0x1a19   :  { %4646 = vmax.xlane.f32.xlu0 %v4645_v46 }
0x1a1c   :  { %v7930_v58 = vpop.f32.mrb[44].mxu0 }
0x1a1d   :  { %v4446_v0 = vpop.f32.mrb[45].mxu0 }
0x1a24   :  { %v6257_v63 = vpop.f32.mrb[46].mxu0 }
0x1a25   :  { %v4628_v60 = vpop.f32.mrb[47].mxu0  ;;  %v4640_v20 = vmul.f32 0.35355338, %v6257_v63 }
0x1a26   :  { %v4639_v3 = vmul.f32 0.35355338, %v4628_v60  ;;  %v5727_v60 = vld [vmem:[%s8164_s5 + $0x28] sm:$0xff] }
0x1a27   :  { %v4644_v17 = vsel %vm101_vm10, -1e+09, %v4640_v20  ;;  %v6560_v20 = vpack.c.bf16 %v5727_v60, %v5726_v2 }
0x1a28   :  { %v4643_v5 = vsel %vm101_vm10, -1e+09, %v4639_v3  ;;  %v4654_v7 = vsel %vm693_vm8, %v4644_v17, -inf }
0x1a29   :  { %v4651_v1 = vsel %vm689_vm9, %v4643_v5, -inf }
0x1a2a   :  { %4652 = vmax.xlane.f32.xlu0 %v4651_v1  ;;  %v5729_v1 = vld [vmem:[%s8164_s5 + $0x38] sm:$0xff] }
0x1a2e   :  { %4655 = vmax.xlane.f32.xlu0 %v4654_v7 }
0x1aa5   :  { %v4650_v8 = vpop.xlane.xlu1 %4649 }
0x1aa6   :  { %v4658_v28 = vsub.f32 %v4642_v42, %v4650_v8  ;;  %v4647_v9 = vpop.xlane.xlu0 %4646 }
0x1aa7   :  { %v4657_v10 = vsub.f32 %v4641_v54, %v4647_v9 }
0x1aa8   :  { %v4663_v55 = vmul.f32 1.442695, %v4658_v28 }
0x1aa9   :  { %v4661_v12 = vmul.f32 1.442695, %v4657_v10 }
0x1aaa   :  { %6902 = vpow2.f32 %v4663_v55 }
0x1aab   :  { %6904 = vpow2.f32 %v4661_v12 }
0x1ab4   :  { %v6903_v45 = vpop.eup %6902 }
0x1ab5   :  { %v6905_v14 = vpop.eup %6904  ;;  %v4672_v15 = vsel %vm693_vm8, %v6903_v45, 0.0 }
0x1ab6   :  { %4673 = vadd.xlane.f32.xlu1 %v4672_v15  ;;  %v4669_v26 = vsel %vm689_vm9, %v6905_v14, 0.0 }
0x1ab7   :  { %v4653_v16 = vpop.xlane.xlu0 %4652  ;;  %4670 = vadd.xlane.f32.xlu0 %v4669_v26 }
0x1ab8   :  { %v4659_v18 = vsub.f32 %v4643_v5, %v4653_v16  ;;  %v5728_v5 = vld [vmem:[%s8164_s5 + $0x30] sm:$0xff] }
0x1ab9   :  { %v6563_v7 = vpack.c.bf16 %v5729_v1, %v5728_v5 }
0x1aba   :  { %v4665_v21 = vmul.f32 1.442695, %v4659_v18 }
0x1abb   :  { %v4656_v49 = vpop.xlane.xlu0 %4655 }
0x1abc   :  { %6906 = vpow2.f32 %v4665_v21  ;;  %v4660_v22 = vsub.f32 %v4644_v17, %v4656_v49 }
0x1abe   :  { %v4667_v29 = vmul.f32 1.442695, %v4660_v22 }
0x1ac0   :  { %6908 = vpow2.f32 %v4667_v29 }
0x1ac6   :  { %v6907_v30 = vpop.eup %6906 }
0x1ac7   :  { %v4675_v32 = vsel %vm689_vm9, %v6907_v30, 0.0 }
0x1ac8   :  { %4676 = vadd.xlane.f32.xlu0 %v4675_v32 }
0x1aca   :  { %v6909_v31 = vpop.eup %6908 }
0x1acb   :  { %v4678_v51 = vsel %vm693_vm8, %v6909_v31, 0.0 }
0x1acc   :  { %4679 = vadd.xlane.f32.xlu1 %v4678_v51 }
0x1add   :  { %6762 = vrot.lane.b32.xlu1 %v7722_v47, %s8186_s16 }
0x1ade   :  { %6757 = vrot.lane.b32.xlu0 %v7701_v37, %s8186_s16 }
0x1ae1   :  { %4869 = vrot.lane.b32.xlu1 %v7860_v59, %s6980_s19 }
0x1ae2   :  { %4889 = vrot.lane.b32.xlu0 %v4446_v0, %s6998_s29 }
0x1ae5   :  { %4885 = vrot.lane.b32.xlu1 %v4358_v40, %s6998_s29 }
0x1ae9   :  { %4873 = vrot.lane.b32.xlu1 %v7870_v41, %s6980_s19 }
0x1b43   :  { %v4674_v19 = vpop.xlane.xlu1 %4673 }
0x1b44   :  { %v4671_v62 = vpop.xlane.xlu0 %4670 }
0x1b45   :  { %6910 = vrcp.f32 %v4671_v62 }
0x1b46   :  { %6912 = vrcp.f32 %v4674_v19 }
0x1b4f   :  { %v6911_v53 = vpop.eup %6910 }
0x1b50   :  { %v4685_v33 = vmul.f32 %v6911_v53, %v6905_v14  ;;  %v6913_v40 = vpop.eup %6912 }
0x1b51   :  { %v4686_v43 = vmul.f32 %v6913_v40, %v6903_v45 }
0x1b52   :  { %6262 = vmatprep.mubr.msk.f32.mxu1 %vm689_vm9, %v4685_v33 }
0x1b55   :  { %v4677_v47 = vpop.xlane.xlu0 %4676 }
0x1b56   :  { %6914 = vrcp.f32 %v4677_v47 }
0x1b59   :  { %v4680_v37 = vpop.xlane.xlu1 %4679  ;;  %v6758_v36 = vpop.permute.xlu0 %6757 }
0x1b5a   :  { %6916 = vrcp.f32 %v4680_v37  ;;  %v6760_v59 = vunpack.i.h.bf16 %v6758_v36  ;;  %v6759_v38 = vunpack.i.l.bf16 %v6758_v36 }
0x1b5c   :  { %v6547_v25 = vpack.c.bf16 %v6760_v59, %v6759_v38 }
0x1b5d   :  { %v6763_v48 = vpop.permute.xlu1 %6762  ;;  %v4890_v28 = vpop.permute.xlu0 %4889 }
0x1b5e   :  { %v6765_v50 = vunpack.i.h.bf16 %v6763_v48  ;;  %v6764_v41 = vunpack.i.l.bf16 %v6763_v48  ;;  %6549 = vmatprep.subr.msk.bf16.mxu1 %vm7240_vm13, %v6547_v25 }
0x1b5f   :  { %6552 = vmatpush3.bf16.msk.msra.mxu1 %vm7240_vm13, %v6547_v25 }
0x1b60   :  { %v6915_v52 = vpop.eup %6914  ;;  %v6553_v42 = vpack.c.bf16 %v6765_v50, %v6764_v41  ;;  %6559 = vmatprep.subr.bf16.mxu1 %v6981_v24 }
0x1b61   :  { %v4687_v54 = vmul.f32 %v6915_v52, %v6907_v30 }
0x1b62   :  { %6263 = vmatmul.mubr.msk.f32.vlgmr.msra.gmra.mrb[42].mxu1 %vm689_vm9, %v4686_v43  ;;  %6555 = vmatprep.subr.msk.bf16.mxu0 %vm7240_vm13, %v6553_v42 }
0x1b63   :  { %6558 = vmatpush3.bf16.msk.msra.mxu0 %vm7240_vm13, %v6553_v42  ;;  %6269 = vmatprep.mubr.msk.f32.mxu0 %vm689_vm9, %v4687_v54 }
0x1b64   :  { %v6917_v4 = vpop.eup %6916  ;;  %6280 = vmatprep.mubr.msk.f32.mxu1 %vm6982_vm2, %v6983_v27  ;;  %6565 = vmatprep.subr.bf16.mxu0 %v6981_v24 }
0x1b65   :  { %v4688_v46 = vmul.f32 %v6917_v4, %v6909_v31  ;;  %6561 = vmatpush3.bf16.msra.mxu1 %v6560_v20 }
0x1b66   :  { %6562 = vmatprep.subr.bf16.mxu1 %v6981_v24 }
0x1b67   :  { %6270 = vmatmul.mubr.msk.f32.vlgmr.msra.gmra.mrb[48].mxu0 %vm689_vm9, %v4688_v46 }
0x1b68   :  { %6297 = vmatprep.mubr.msk.f32.mxu0 %vm6982_vm2, %v6983_v27 }
0x1b69   :  { %6564 = vmatpush3.bf16.msra.mxu1 %v6563_v7 }
0x1b6a   :  { %6571 = vmatprep.subr.bf16.mxu1 %v6981_v24 }
0x1c35   :  { %v6264_v0 = vpop.f32.mrb[42].mxu1 }
0x1c36   :  { %v4768_v63 = vpop.f32.mrb[43].mxu1 }
0x1c37   :  { %4901 = vrot.lane.b32.xlu0 %v4768_v63, %s6999_s20 }
0x1c3a   :  { %v6271_v3 = vpop.f32.mrb[48].mxu0 }
0x1c3b   :  { %v4856_v17 = vpop.f32.mrb[49].mxu0  ;;  %4871 = vrot.lane.b32.xlu0 %v7858_v6, %s6980_s19  ;;  %v4870_v6 = vpop.permute.xlu1 %4869 }
0x1c3c   :  { %4905 = vrot.lane.b32.xlu1 %v4856_v17, %s6999_s20  ;;  %v4913_v9 = vsel %vm447_vm3, %v7796_v56, %v4870_v6 }
0x1c3f   :  { %4903 = vrot.lane.b32.xlu0 %v6264_v0, %s6999_s20  ;;  %v4886_v8 = vpop.permute.xlu1 %4885 }
0x1c40   :  { %4887 = vrot.lane.b32.xlu1 %v7922_v44, %s6998_s29  ;;  %v4917_v55 = vsel %vm2194_vm14, %v4913_v9, %v4886_v8 }
0x1c43   :  { %4891 = vrot.lane.b32.xlu0 %v7930_v58, %s6998_s29  ;;  %v4874_v10 = vpop.permute.xlu1 %4873 }
0x1c44   :  { %4875 = vrot.lane.b32.xlu1 %v7868_v13, %s6980_s19  ;;  %v4915_v58 = vsel %vm447_vm3, %v7804_v61, %v4874_v10 }
0x1c45   :  { %v4919_v18 = vsel %vm2194_vm14, %v4915_v58, %v4890_v28 }
0x1c48   :  { %4907 = vrot.lane.b32.xlu1 %v6271_v3, %s6999_s20 }
0x1ca9   :  { %v4902_v12 = vpop.permute.xlu0 %4901 }
0x1caa   :  { %v4921_v44 = vsel %vm2199_vm15, %v4917_v55, %v4902_v12 }
0x1cab   :  { %v4929_v45 = vcombine.high %v4921_v44, %v4921_v44  ;;  %v4936_v13 = vrot.slane %v4921_v44, %v7133_v57 }
0x1cad   :  { %v4943_v14 = vrot.slane %v4929_v45, %v7133_v57  ;;  %v4944_v15 = vcombine.high %v4936_v13, %v4936_v13  ;;  %v4872_v26 = vpop.permute.xlu0 %4871  ;;  %v4952_v21 = vrot.slane %v4936_v13, %v7133_v57 }
0x1cae   :  { %v4906_v16 = vpop.permute.xlu1 %4905  ;;  %v4914_v62 = vsel %vm447_vm3, %v7794_v23, %v4872_v26 }
0x1caf   :  { %v4945_v56 = vcombine.high %v4943_v14, %v4943_v14  ;;  %v4966_v49 = vrot.slane %v4944_v15, %v7133_v57  ;;  %v4923_v22 = vsel %vm2199_vm15, %v4919_v18, %v4906_v16  ;;  %v4959_v30 = vrot.slane %v4943_v14, %v7133_v57 }
0x1cb0   :  { %v4992_v29 = vcombine.high %v4923_v22, %v4923_v22  ;;  %v4999_v61 = vrot.slane %v4923_v22, %v7133_v57 }
0x1cb1   :  { %v4973_v32 = vrot.slane %v4945_v56, %v7133_v57  ;;  %v5068_v31 = vcombine.low %v4952_v21, %v4966_v49  ;;  %v5732_v51 = vcombine.high %v4952_v21, %v4966_v49  ;;  %v4904_v25 = vpop.permute.xlu0 %4903 }
0x1cb2   :  { %v5006_v53 = vrot.slane %v4992_v29, %v7133_v57  ;;  %v5007_v19 = vcombine.high %v4999_v61, %v4999_v61  ;;  %v5015_v33 = vrot.slane %v4999_v61, %v7133_v57  ;;  %v4888_v47 = vpop.permute.xlu1 %4887  ;;  %v5731_v61 = vld [vmem:[%s8165_s6 + $0x1] ss:$0 sm:$0xff] }
0x1cb3   :  { %v5070_v37 = vcombine.low %v4959_v30, %v4973_v32  ;;  %v5733_v36 = vcombine.high %v4959_v30, %v4973_v32  ;;  %v5078_v59 = vrot.slane %v5068_v31, %v7133_v57  ;;  %v5085_v38 = vrot.slane %v5732_v51, %v7133_v57 }
0x1cb4   :  { %v5008_v40 = vcombine.high %v5006_v53, %v5006_v53  ;;  %v5022_v48 = vrot.slane %v5006_v53, %v7133_v57  ;;  %v5029_v50 = vrot.slane %v5007_v19, %v7133_v57  ;;  %v5037_v41 = vcombine.high %v5015_v33, %v5015_v33 }
0x1cb5   :  { %v5092_v23 = vrot.slane %v5070_v37, %v7133_v57  ;;  %v5099_v52 = vrot.slane %v5733_v36, %v7133_v57  ;;  %v5100_v43 = vcombine.low %v5078_v59, %v5085_v38  ;;  %v4918_v42 = vsel %vm2194_vm14, %v4914_v62, %v4888_v47  ;;  %v4892_v7 = vpop.permute.xlu0 %4891 }
0x1cb6   :  { %v5036_v54 = vrot.slane %v5008_v40, %v7133_v57  ;;  %v5038_v4 = vcombine.high %v5022_v48, %v5022_v48  ;;  %v5039_v46 = vcombine.high %v5029_v50, %v5029_v50  ;;  %v4876_v0 = vpop.permute.xlu1 %4875  ;;  %v4922_v2 = vsel %vm2199_vm15, %v4918_v42, %v4904_v25 }
0x1cb7   :  { %v5101_v63 = vcombine.low %v5092_v23, %v5099_v52  ;;  %v4916_v60 = vsel %vm447_vm3, %v7800_v34, %v4876_v0  ;;  %v4984_v5 = vrot.slane %v4922_v2, %v7133_v57  ;;  %v5108_v1 = vrot.slane %v5100_v43, %v7133_v57  ;;  %v5742_v2 = vld [vmem:[%s8168_s9 + $0x28] sm:$0xff] }
0x1cb8   :  { %v5119_v20 = vcombine.low %v5039_v46, %v5022_v48  ;;  %v5120_v3 = vcombine.low %v5036_v54, %v5038_v4  ;;  %v5118_v17 = vcombine.low %v5029_v50, %v5037_v41  ;;  %v4920_v55 = vsel %vm2194_vm14, %v4916_v60, %v4892_v7 }
0x1cb9   :  { %v5115_v6 = vrot.slane %v5101_v63, %v7133_v57  ;;  %v4991_v9 = vrot.slane %v4984_v5, %v7133_v57  ;;  %v5040_v15 = vcombine.high %v5036_v54, %v5036_v54  ;;  %v5741_v63 = vld [vmem:[%s8168_s9 + $0x20] sm:$0xff] }
0x1cba   :  { %v5141_v8 = vrot.slane %v5119_v20, %v7133_v57  ;;  %v5148_v28 = vrot.slane %v5120_v3, %v7133_v57  ;;  %v4908_v10 = vpop.permute.xlu1 %4907  ;;  %v5134_v13 = vrot.slane %v5118_v17, %v7133_v57  ;;  %v6566_v60 = vpack.c.bf16 %v5742_v2, %v5741_v63  ;;  %v5743_v20 = vld [vmem:[%s8168_s9 + $0x30] sm:$0xff]  ;;  %v5744_v3 = vld [vmem:[%s8168_s9 + $0x38] sm:$0xff] }
0x1cbb   :  { %v4924_v34 = vsel %vm2199_vm15, %v4920_v55, %v4908_v10  ;;  %v5116_v12 = vcombine.low %v5108_v1, %v5115_v6  ;;  %v5117_v44 = vcombine.low %v4991_v9, %v5015_v33  ;;  %v6569_v5 = vpack.c.bf16 %v5744_v3, %v5743_v20  ;;  %v5759_v20 = vld [vmem:[%s8171_s12 + $0x1] ss:$0 sm:$0xff]  ;;  %s6952_s12 = scalar_lea.vmem %s5566_s26, 384 }
0x1cbc   :  { %v5047_v58 = vrot.slane %v4924_v34, %v7133_v57  ;;  %v5150_v45 = vcombine.low %v5141_v8, %v5148_v28  ;;  %6567 = vmatpush3.bf16.msra.mxu0 %v6566_v60  ;;  %v5739_v34 = vld [vmem:[%s8166_s7 + $0x1] ss:$0 sm:$0xff]  ;;  %p6953_p8 = scmp.ne.s32.totalorder %s5566_s26, %s6952_s12  ;;  %p6958_p10 = scmp.lt.s32.totalorder %s6952_s12, %s6952_s12 }
0x1cbd   :  { %6281 = vmatmul.mubr.msk.f32.vlgmr.msra.gmra.mrb[44].mxu1 %vm104_vm0, %v5116_v12  ;;  %v5127_v14 = vrot.slane %v5117_v44, %v7133_v57  ;;  %6568 = vmatprep.subr.bf16.mxu0 %v6981_v24 }
0x1cbe   :  { %v5054_v26 = vrot.slane %v5047_v58, %v7133_v57  ;;  %6283 = vmatprep.mubr.msk.f32.mxu1 %vm6982_vm2, %v6983_v27  ;;  %v5164_v56 = vrot.slane %v5150_v45, %v7133_v57  ;;  %v5740_v58 = vld [vmem:[%s8167_s8 + $0x1] ss:$0 sm:$0xff]  ;;  %p6959_p11 = por %p6958_p10, %p6957_p9 }
0x1cbf   :  { %v5149_v18 = vcombine.low %v5127_v14, %v5134_v13 }
0x1cc0   :  { %v5166_v16 = vcombine.low %v5040_v15, %v5054_v26  ;;  %6570 = vmatpush3.bf16.msra.mxu0 %v6569_v5  ;;  %p6960_p12 = pnand %p6959_p11, %p6953_p8 }
0x1cc1   :  { %v5157_v49 = vrot.slane %v5149_v18, %v7133_v57 }
0x1cc2   :  { %v5173_v21 = vrot.slane %v5166_v16, %v7133_v57 }
0x1cc3   :  { %v5165_v22 = vcombine.low %v5157_v49, %v5164_v56 }
0x1cc4   :  { %v5180_v29 = vrot.slane %v5173_v21, %v7133_v57 }
0x1cc5   :  { %6284 = vmatmul.mubr.msk.f32.gmra.mrb[46].mxu1 %vm104_vm0, %v5165_v22  ;;  %v5750_v22 = vld [vmem:[%s8170_s11 + $0x40] sm:$0xff] }
0x1cc6   :  { %6286 = vmatprep.mubr.msk.f32.mxu1 %vm6982_vm2, %v6983_v27 }
0x1cc9   :  { %6287 = vmatmul.mubr.msk.f32.gmra.mrb[48].mxu1 %vm104_vm0, %v5180_v29  ;;  %v5751_v29 = vld [vmem:[%s8170_s11 + $0x48] sm:$0xff] }
0x1cca   :  { %6322 = vmatprep.mubr.msk.f32.mxu1 %vm6982_vm2, %v6983_v27 }
0x1d90   :  { %v5253_v30 = vpop.f32.mrb[44].mxu1 }
0x1d91   :  { %v5254_v32 = vadd.f32 %v5731_v61, %v5253_v30  ;;  %v6282_v31 = vpop.f32.mrb[45].mxu1  ;;  %v5752_v30 = vld [vmem:[%s8170_s11 + $0x50] sm:$0xff] }
0x1d93   :  { %v5267_v51 = vadd.f32 %v5254_v32, %v7655_v35  ;;  %v5753_v32 = vld [vmem:[%s8170_s11 + $0x58] sm:$0xff] }
0x1d94   :  { %v6575_v31 = vpack.c.bf16 %v5753_v32, %v5752_v30 }
0x1d95   :  { %v5274_v62 = vsel %vm104_vm0, %v5267_v51, 0.0 }
0x1d96   :  { %5275 = vadd.xlane.f32.xlu0 %v5274_v62  ;;  %v5755_v62 = vld [vmem:[%s8170_s11 + $0x68] sm:$0xff] }
0x1d98   :  { %v5258_v57 = vpop.f32.mrb[46].mxu1 }
0x1d99   :  { %v5259_v53 = vadd.f32 %v5731_v61, %v5258_v57  ;;  %v6285_v19 = vpop.f32.mrb[47].mxu1 }
0x1d9a   :  { %v5757_v19 = vld [vmem:[%s8170_s11 + $0x78] sm:$0xff] }
0x1d9b   :  { %v5268_v33 = vadd.f32 %v5259_v53, %v7661_v11  ;;  %v5756_v53 = vld [vmem:[%s8170_s11 + $0x70] sm:$0xff] }
0x1d9c   :  { %v5263_v47 = vpop.f32.mrb[48].mxu1 }
0x1d9d   :  { %v5264_v37 = vadd.f32 %v5731_v61, %v5263_v47  ;;  %v6288_v36 = vpop.f32.mrb[49].mxu1  ;;  %v5277_v59 = vsel %vm104_vm0, %v5268_v33, 0.0  ;;  %v6572_v61 = vpack.c.bf16 %v5751_v29, %v5750_v22  ;;  %v5746_v47 = vld [vmem:[%s8169_s10 + $0x1] ss:$0 sm:$0xff] }
0x1d9e   :  { %5278 = vadd.xlane.f32.xlu1 %v5277_v59 }
0x1d9f   :  { %v5269_v38 = vadd.f32 %v5264_v37, %v7667_v39  ;;  %6573 = vmatpush3.bf16.msra.mxu1 %v6572_v61 }
0x1da0   :  { %6574 = vmatprep.subr.bf16.mxu1 %v6981_v24 }
0x1da1   :  { %v5280_v25 = vsel %vm111_vm1, %v5269_v38, 0.0 }
0x1da2   :  { %5281 = vadd.xlane.f32.xlu0 %v5280_v25 }
0x1da3   :  { %6576 = vmatpush3.bf16.msra.mxu1 %v6575_v31 }
0x1da4   :  { %6577 = vmatprep.subr.bf16.mxu1 %v6981_v24 }
0x1e23   :  { %v5276_v35 = vpop.xlane.xlu0 %5275 }
0x1e24   :  { %v5283_v40 = vmul.f32 0.03125, %v5276_v35 }
0x1e26   :  { %v5286_v48 = vsub.f32 %v5267_v51, %v5283_v40  ;;  %v5754_v51 = vld [vmem:[%s8170_s11 + $0x60] sm:$0xff] }
0x1e27   :  { %v6578_v57 = vpack.c.bf16 %v5755_v62, %v5754_v51 }
0x1e28   :  { %v5289_v50 = vmul.f32 %v5286_v48, %v5286_v48 }
0x1e29   :  { %6579 = vmatpush3.bf16.msra.mxu1 %v6578_v57 }
0x1e2a   :  { %v5292_v41 = vsel %vm104_vm0, %v5289_v50, 0.0  ;;  %6580 = vmatprep.subr.bf16.mxu1 %v6981_v24 }
0x1e2b   :  { %5293 = vadd.xlane.f32.xlu0 %v5292_v41  ;;  %v5279_v23 = vpop.xlane.xlu1 %5278 }
0x1e2c   :  { %v5284_v11 = vmul.f32 0.03125, %v5279_v23 }
0x1e2e   :  { %v5287_v52 = vsub.f32 %v5268_v33, %v5284_v11  ;;  %v6581_v33 = vpack.c.bf16 %v5757_v19, %v5756_v53 }
0x1e2f   :  { %v5282_v43 = vpop.xlane.xlu0 %5281 }
0x1e30   :  { %v5285_v42 = vmul.f32 0.03125, %v5282_v43  ;;  %v5290_v54 = vmul.f32 %v5287_v52, %v5287_v52  ;;  %6582 = vmatpush3.bf16.msra.mxu1 %v6581_v33 }
0x1e32   :  { %v5288_v4 = vsub.f32 %v5269_v38, %v5285_v42  ;;  %v5295_v46 = vsel %vm104_vm0, %v5290_v54, 0.0 }
0x1e33   :  { %5296 = vadd.xlane.f32.xlu0 %v5295_v46 }
0x1e34   :  { %v5291_v39 = vmul.f32 %v5288_v4, %v5288_v4 }
0x1e36   :  { %v5298_v0 = vsel %vm111_vm1, %v5291_v39, 0.0 }
0x1e37   :  { %5299 = vadd.xlane.f32.xlu1 %v5298_v0 }
0x1eb8   :  { %v5294_v1 = vpop.xlane.xlu0 %5293 }
0x1eb9   :  { %v5301_v17 = vmul.f32 0.03125, %v5294_v1 }
0x1ebb   :  { %v5304_v7 = vadd.f32 1e-05, %v5301_v17 }
0x1ebd   :  { %6918 = vrsqrt.f32 %v5304_v7 }
0x1ec0   :  { %v5297_v6 = vpop.xlane.xlu0 %5296 }
0x1ec1   :  { %v5302_v8 = vmul.f32 0.03125, %v5297_v6 }
0x1ec3   :  { %v5305_v28 = vadd.f32 1e-05, %v5302_v8 }
0x1ec4   :  { %v5300_v9 = vpop.xlane.xlu1 %5299 }
0x1ec5   :  { %6920 = vrsqrt.f32 %v5305_v28  ;;  %v5303_v10 = vmul.f32 0.03125, %v5300_v9 }
0x1ec7   :  { %v6919_v55 = vpop.eup %6918  ;;  %v5306_v44 = vadd.f32 1e-05, %v5303_v10 }
0x1ec8   :  { %v5310_v12 = vmul.f32 %v6919_v55, %v5286_v48 }
0x1ec9   :  { %6922 = vrsqrt.f32 %v5306_v44 }
0x1eca   :  { %v5319_v45 = vmul.f32 %v5739_v34, %v5310_v12 }
0x1ecc   :  { %v8082_v13 = vadd.f32 %v5740_v58, %v5319_v45 }
0x1ece   :  { %6298 = vmatmul.mubr.msk.f32.vlgmr.msra.gmra.mrb[50].mxu0 %vm104_vm0, %v8082_v13 }
0x1ecf   :  { %6300 = vmatprep.mubr.msk.f32.mxu0 %vm6982_vm2, %v6983_v27  ;;  %v6921_v14 = vpop.eup %6920 }
0x1ed0   :  { %v5311_v15 = vmul.f32 %v6921_v14, %v5287_v52 }
0x1ed2   :  { %v5320_v26 = vmul.f32 %v5739_v34, %v5311_v15 }
0x1ed3   :  { %v6923_v16 = vpop.eup %6922 }
0x1ed4   :  { %v8088_v18 = vadd.f32 %v5740_v58, %v5320_v26  ;;  %v5312_v56 = vmul.f32 %v6923_v16, %v5288_v4 }
0x1ed6   :  { %6301 = vmatmul.mubr.msk.f32.gmra.mrb[52].mxu0 %vm104_vm0, %v8088_v18  ;;  %v5321_v21 = vmul.f32 %v5739_v34, %v5312_v56 }
0x1ed7   :  { %6303 = vmatprep.mubr.msk.f32.mxu0 %vm6982_vm2, %v6983_v27 }
0x1ed8   :  { %v8094_v49 = vadd.f32 %v5740_v58, %v5321_v21 }
0x1eda   :  { %6304 = vmatmul.mubr.msk.f32.gmra.mrb[54].mxu0 %vm104_vm0, %v8094_v49 }
0x1fa1   :  { %v5419_v37 = vpop.f32.mrb[50].mxu0 }
0x1fa2   :  { %v5420_v36 = vadd.f32 %v5746_v47, %v5419_v37  ;;  %v6299_v59 = vpop.f32.mrb[51].mxu0 }
0x1fa4   :  { %v5436_v38 = vmul.f32 0.70710677, %v5420_v36  ;;  %v5433_v11 = vmul.f32 0.5, %v5420_v36 }
0x1fa6   :  { %6924 = verf.f32 %v5436_v38 }
0x1fa9   :  { %v5424_v24 = vpop.f32.mrb[52].mxu0 }
0x1faa   :  { %v5425_v25 = vadd.f32 %v5746_v47, %v5424_v24  ;;  %v6302_v35 = vpop.f32.mrb[53].mxu0 }
0x1fac   :  { %v5437_v40 = vmul.f32 0.70710677, %v5425_v25  ;;  %v5434_v4 = vmul.f32 0.5, %v5425_v25 }
0x1fad   :  { %v5429_v48 = vpop.f32.mrb[54].mxu0 }
0x1fae   :  { %6926 = verf.f32 %v5437_v40  ;;  %v5430_v50 = vadd.f32 %v5746_v47, %v5429_v48  ;;  %v6305_v41 = vpop.f32.mrb[55].mxu0 }
0x1fb0   :  { %v6925_v23 = vpop.eup %6924  ;;  %v5438_v43 = vmul.f32 0.70710677, %v5430_v50  ;;  %v5435_v63 = vmul.f32 0.5, %v5430_v50 }
0x1fb1   :  { %v5442_v52 = vadd.f32 1.0, %v6925_v23 }
0x1fb2   :  { %6928 = verf.f32 %v5438_v43 }
0x1fb3   :  { %v5445_v42 = vmul.f32 %v5442_v52, %v5433_v11 }
0x1fb5   :  { %6323 = vmatmul.mubr.msk.f32.vlgmr.msra.gmra.mrb[50].mxu1 %vm2736_vm5, %v5445_v42 }
0x1fb6   :  { %6325 = vmatprep.mubr.msk.f32.mxu1 %vm6982_vm2, %v6983_v27 }
0x1fb8   :  { %v6927_v54 = vpop.eup %6926 }
0x1fb9   :  { %v5443_v46 = vadd.f32 1.0, %v6927_v54 }
0x1fbb   :  { %v5446_v39 = vmul.f32 %v5443_v46, %v5434_v4 }
0x1fbc   :  { %v6929_v0 = vpop.eup %6928 }
0x1fbd   :  { %v5444_v2 = vadd.f32 1.0, %v6929_v0  ;;  %6326 = vmatmul.mubr.msk.f32.gmra.mrb[52].mxu1 %vm2736_vm5, %v5446_v39 }
0x1fbe   :  { %6328 = vmatprep.mubr.msk.f32.mxu1 %vm6982_vm2, %v6983_v27 }
0x1fbf   :  { %v5447_v60 = vmul.f32 %v5444_v2, %v5435_v63 }
0x1fc1   :  { %6329 = vmatmul.mubr.msk.f32.gmra.mrb[54].mxu1 %vm2736_vm5, %v5447_v60 }
0x2088   :  { %v5540_v3 = vpop.f32.mrb[50].mxu1 }
0x2089   :  { %v5541_v5 = vadd.f32 %v5759_v20, %v5540_v3  ;;  %v6324_v1 = vpop.f32.mrb[51].mxu1 }
0x208b   :  { %v5554_v17 = vadd.f32 %v5541_v5, %v8082_v13 }
0x208d   :  { %5557 = vst.msk [vmem:[#allocation5] sm:$0xff] %vm104_vm0, %v5554_v17 }
0x2090   :  { %v5545_v7 = vpop.f32.mrb[52].mxu1 }
0x2091   :  { %v5546_v6 = vadd.f32 %v5759_v20, %v5545_v7  ;;  %v6327_v8 = vpop.f32.mrb[53].mxu1 }
0x2093   :  { %v5555_v28 = vadd.f32 %v5546_v6, %v8088_v18 }
0x2094   :  { %v5550_v27 = vpop.f32.mrb[54].mxu1 }
0x2095   :  { %5558 = vst.msk [vmem:[#allocation5 + $0x8] sm:$0xff] %vm104_vm0, %v5555_v28  ;;  %v5551_v9 = vadd.f32 %v5759_v20, %v5550_v27  ;;  %v6330_v10 = vpop.f32.mrb[55].mxu1 }
0x2097   :  { %v5556_v55 = vadd.f32 %v5551_v9, %v8094_v49 }
0x2099   :  { %5559 = vst.msk [vmem:[#allocation5 + $0x10] sm:$0x3] %vm111_vm1, %v5556_v55 }
0x209a   :  { %6963 = shalt.err (!%p6960_p12)
}
0x209b   :  { %s6964_s4 = scalar_lea.hbm %s8172_s13, 384 }
0x209c   :  { %p6965_p13 = scmp.ne.s32.totalorder %s8172_s13, %s6964_s4  ;;  %p6968_p0 = scmp.lt.u32.totalorder %s6964_s4, %s8172_s13 }
0x209e   :  { %p6970_p1 = pnand %p6968_p0, %p6965_p13 }
0x20a0   :  { %6973 = shalt.err (!%p6970_p1)
}
0x20a1   :  { %s8187_s8 = smov 128  }
0x20a2   :  { %5571 = dma.vmem_to_hbm [thread:$0]  %s5566_s26, 384, %s8172_s13, [#allocation4], %s8187_s8, %s8187_s8, %s6980_s19  }
0x20a3   :  { %6976 = dma.done.wait [#allocation4], 384  }
0x20a4   :  { %6977 = vsyncadd [#allocation4], 4294966912 }
0x20a5   :  { %5575 = vsyncpa [#allocation3], 1 }
0x20a6   :  { %5576 = vsyncpa [#allocation4], 1 }

</bundles_post_ra>
